<compile_context>
chip_gen: v7x
topology: tpu7x:2x2x1
jax: 0.10.0
libtpu: 0.0.40
codegen_flags: <defaults>
</compile_context>

<pallas_src>
import functools

import jax
import jax.numpy as jnp
from jax.experimental import pallas as pl
from jax.experimental.pallas import tpu as pltpu


# ----------------------------------------------------------------------------
# In-kernel GELU (tanh approximation; transcendental goes to the EUP slot).
# TODO(synk): torch.nn.GELU default is exact-erf; tanh approx differs by <1e-3.
# ----------------------------------------------------------------------------
def _gelu(x):
    c = 0.7978845608028654  # sqrt(2/pi)
    return 0.5 * x * (1.0 + jnp.tanh(c * (x + 0.044715 * x * x * x)))


_PARALLEL_1D = pltpu.CompilerParams(dimension_semantics=("parallel",))
_PARALLEL_2D = pltpu.CompilerParams(dimension_semantics=("parallel", "parallel"))


# ----------------------------------------------------------------------------
# Pallas kernels (all channel-major: tiles are (channels, TN) with TN on lanes)
# ----------------------------------------------------------------------------
def _lift_kernel(x_ref, w_ref, b_ref, o_ref):
    # y[c, n] = sum_k w[c, k] * x[k, n] + b[c]; K=3 -> pure VPU FMAs, no MXU.
    cin = x_ref.shape[0]
    y = None
    for k in range(cin):
        t = w_ref[:, k:k + 1] * x_ref[k:k + 1, :]          # (Cout, TN)
        y = t if y is None else y + t
    o_ref[...] = (y + b_ref[...]).astype(o_ref.dtype)


def _layer_pointwise_kernel(x1_ref, x_ref, m1w_ref, m1b_ref, m2w_ref, m2b_ref,
                            o_ref):
    # Fused per-layer pointwise chain (channel-major):
    #   h   = gelu(mlp1_w @ x1 + mlp1_b)
    #   y   = [mlp2_w | w_w] @ [h ; x] + (mlp2_b + w_b)     (one fused dot)
    #   out = gelu(y)
    h = jnp.dot(m1w_ref[...], x1_ref[...], preferred_element_type=jnp.float32)
    h = _gelu(h + m1b_ref[...])                              # (W, TN)
    hx = jnp.concatenate([h, x_ref[...]], axis=0)            # (2W, TN)
    y = jnp.dot(m2w_ref[...], hx, preferred_element_type=jnp.float32)
    o_ref[...] = _gelu(y + m2b_ref[...]).astype(o_ref.dtype)


def _projection_kernel(x_ref, q1w_ref, q1b_ref, q2w_ref, q2b_ref, o_ref):
    # Fused projection head: gelu(q1 @ x + b1) -> q2 @ h + b2, (1, TN) lane-dense out.
    h = jnp.dot(q1w_ref[...], x_ref[...], preferred_element_type=jnp.float32)
    h = _gelu(h + q1b_ref[...])                               # (4W, TN)
    y = jnp.dot(q2w_ref[...], h, preferred_element_type=jnp.float32)
    o_ref[...] = (y + q2b_ref[...]).astype(o_ref.dtype)       # (1, TN)


def _spectral_kernel(xr_ref, xi_ref, wr_ref, wi_ref, or_ref, oi_ref, *, cin, batch):
    # Complex per-mode channel mix, lane-dense over the mode axis:
    #   out[b, o, m] = sum_i x[i, b, m] * w[i, o, m]   (complex)
    # Straight vreg*vreg FMAs: the weight slab (TCout, TM) is dense, the x row
    # (1, TM) is a single sublane broadcast; no (B, Cout, TM) double-broadcasts.
    acc_r = [None] * batch
    acc_i = [None] * batch
    for i in range(cin):
        wr = wr_ref[i]                                       # (TCout, TM)
        wi = wi_ref[i]
        for b in range(batch):
            xr = xr_ref[i, b:b + 1, :]                       # (1, TM)
            xi = xi_ref[i, b:b + 1, :]
            rr = xr * wr - xi * wi
            ii = xr * wi + xi * wr
            acc_r[b] = rr if acc_r[b] is None else acc_r[b] + rr
            acc_i[b] = ii if acc_i[b] is None else acc_i[b] + ii
    for b in range(batch):
        or_ref[b] = acc_r[b].astype(or_ref.dtype)
        oi_ref[b] = acc_i[b].astype(oi_ref.dtype)


# ----------------------------------------------------------------------------
# Tiling helpers
# ----------------------------------------------------------------------------
def _pick_lane_tile(n, cap=1024, min_tiles=2):
    """Largest lane tile (multiple of 128, <= cap) that exactly divides n,
    preferring >= min_tiles grid steps so both TCs get work on v7x."""
    if n % 128 != 0:
        # TODO(synk): irregular N falls back to one full-width block instead of padding.
        return n
    divisors = [t for t in range(128, min(cap, n) + 1, 128) if n % t == 0]
    if not divisors:
        return n
    preferred = [t for t in divisors if n // t >= min_tiles]
    return max(preferred) if preferred else max(divisors)


def _spectral_tiles(cout, batch, mp, acc_budget_elems=16384):
    """Pick (TCout, TM) so the 2 * batch * TCout * TM f32 accumulators stay in
    vregs, and so the 2-D grid has >= 2 steps when possible."""
    tm = 128
    for cand in (256, 512):
        if mp % cand == 0:
            tm = cand
    if cout % 8 != 0:
        return cout, tm                       # block must cover full Cout
    divisors = [t for t in range(8, cout + 1, 8) if cout % t == 0]
    tcout = max(divisors)
    while 2 * batch * tcout * tm > acc_budget_elems and tcout > 8:
        tcout = max(t for t in divisors if t < tcout)
    if 2 * batch * tcout * tm > acc_budget_elems and tm > 128:
        tm = 128
    if (cout // tcout) * (mp // tm) < 2 and tcout > 8:
        tcout = max(t for t in divisors if t < tcout)
    return tcout, tm


# ----------------------------------------------------------------------------
# Pallas wrappers
# ----------------------------------------------------------------------------
def lift(x, w, b):
    """x: (3, N) channel-major, w: (W, 3), b: (W, 1) -> (W, N)."""
    Cin, N = x.shape
    Cout = w.shape[0]
    TN = _pick_lane_tile(N)
    return pl.pallas_call(
        _lift_kernel,
        out_shape=jax.ShapeDtypeStruct((Cout, N), x.dtype),
        grid=(N // TN,),
        in_specs=[
            pl.BlockSpec((Cin, TN), lambda i: (0, i)),
            pl.BlockSpec((Cout, Cin), lambda i: (0, 0)),
            pl.BlockSpec((Cout, 1), lambda i: (0, 0)),
        ],
        out_specs=pl.BlockSpec((Cout, TN), lambda i: (0, i)),
        compiler_params=_PARALLEL_1D,
    )(x, w, b)


def layer_pointwise(x1, x, lay):
    """Fused mlp1+GELU -> [mlp2|skip] fused dot -> residual GELU. x1, x: (W, N)."""
    W, N = x.shape
    TN = _pick_lane_tile(N)
    return pl.pallas_call(
        _layer_pointwise_kernel,
        out_shape=jax.ShapeDtypeStruct((W, N), x.dtype),
        grid=(N // TN,),
        in_specs=[
            pl.BlockSpec((W, TN), lambda i: (0, i)),
            pl.BlockSpec((W, TN), lambda i: (0, i)),
            pl.BlockSpec((W, W), lambda i: (0, 0)),
            pl.BlockSpec((W, 1), lambda i: (0, 0)),
            pl.BlockSpec((W, 2 * W), lambda i: (0, 0)),
            pl.BlockSpec((W, 1), lambda i: (0, 0)),
        ],
        out_specs=pl.BlockSpec((W, TN), lambda i: (0, i)),
        compiler_params=_PARALLEL_1D,
    )(x1, x, lay["mlp1_w"], lay["mlp1_b"], lay["m2cat_w"], lay["m2cat_b"])


def projection(x, q1_w, q1_b, q2_w, q2_b):
    """Fused q head: (1, N) = q2 @ gelu(q1 @ x + b1) + b2; x: (W, N)."""
    W, N = x.shape
    H = q1_w.shape[0]
    TN = _pick_lane_tile(N)
    return pl.pallas_call(
        _projection_kernel,
        out_shape=jax.ShapeDtypeStruct((1, N), x.dtype),
        grid=(N // TN,),
        in_specs=[
            pl.BlockSpec((W, TN), lambda i: (0, i)),
            pl.BlockSpec((H, W), lambda i: (0, 0)),
            pl.BlockSpec((H, 1), lambda i: (0, 0)),
            pl.BlockSpec((1, H), lambda i: (0, 0)),
            pl.BlockSpec((1, 1), lambda i: (0, 0)),
        ],
        out_specs=pl.BlockSpec((1, TN), lambda i: (0, i)),
        compiler_params=_PARALLEL_1D,
    )(x, q1_w, q1_b, q2_w, q2_b)


def spectral_mul(xr, xi, wr, wi):
    """xr, xi: (Cin, B, Mp); wr, wi: (Cin, Cout, Mp) -> 2x (B, Cout, Mp)."""
    Cin, B, Mp = xr.shape
    Cout = wr.shape[1]
    TCout, TM = _spectral_tiles(Cout, B, Mp)
    kernel = functools.partial(_spectral_kernel, cin=Cin, batch=B)
    return pl.pallas_call(
        kernel,
        out_shape=(
            jax.ShapeDtypeStruct((B, Cout, Mp), jnp.float32),
            jax.ShapeDtypeStruct((B, Cout, Mp), jnp.float32),
        ),
        grid=(Cout // TCout, Mp // TM),
        in_specs=[
            pl.BlockSpec((Cin, B, TM), lambda c, m: (0, 0, m)),
            pl.BlockSpec((Cin, B, TM), lambda c, m: (0, 0, m)),
            pl.BlockSpec((Cin, TCout, TM), lambda c, m: (0, c, m)),
            pl.BlockSpec((Cin, TCout, TM), lambda c, m: (0, c, m)),
        ],
        out_specs=(
            pl.BlockSpec((B, TCout, TM), lambda c, m: (0, c, m)),
            pl.BlockSpec((B, TCout, TM), lambda c, m: (0, c, m)),
        ),
        compiler_params=_PARALLEL_2D,
    )(xr, xi, wr, wi)


# ----------------------------------------------------------------------------
# Model
# ----------------------------------------------------------------------------
def fourier_layer(x, lay, modes1, modes2):
    # x: (W, B, S1, S2) channel-major float32
    Cw, B, S1, S2 = x.shape
    N = B * S1 * S2
    MM = modes1 * modes2
    Mp = lay["spec_wr"].shape[-1]

    # --- SpectralConv2d (channels-major FFT over trailing spatial axes) ---
    x_ft = jnp.fft.rfft2(x, axes=(2, 3))                     # (W, B, S1, S2//2+1) c64
    low = x_ft[:, :, :modes1, :modes2].reshape(Cw, B, MM)
    high = x_ft[:, :, S1 - modes1:, :modes2].reshape(Cw, B, MM)
    xm = jnp.concatenate([low, high], axis=-1)               # (W, B, 2*MM)
    pad = Mp - 2 * MM
    if pad:
        xm = jnp.pad(xm, ((0, 0), (0, 0), (0, pad)))         # tiny mode tensor only

    out_r, out_i = spectral_mul(jnp.real(xm), jnp.imag(xm),
                                lay["spec_wr"], lay["spec_wi"])   # (B, W, Mp) each
    out = jnp.transpose(out_r + 1j * out_i, (1, 0, 2))       # (W, B, Mp), tiny

    low_o = out[:, :, :MM].reshape(Cw, B, modes1, modes2)
    high_o = out[:, :, MM:2 * MM].reshape(Cw, B, modes1, modes2)
    out_ft = jnp.zeros((Cw, B, S1, S2 // 2 + 1), jnp.complex64)
    out_ft = out_ft.at[:, :, :modes1, :modes2].set(low_o)
    out_ft = out_ft.at[:, :, S1 - modes1:, :modes2].set(high_o)
    x1 = jnp.fft.irfft2(out_ft, s=(S1, S2), axes=(2, 3))     # (W, B, S1, S2) f32

    # --- fused MLP + skip 1x1 conv + residual + GELU (lane-dense tiles) ---
    out = layer_pointwise(x1.reshape(Cw, N), x.reshape(Cw, N), lay)
    return out.reshape(Cw, B, S1, S2)


def fno_forward(a, params, *, modes1, modes2):
    B, S1, S2 = a.shape
    W = params["p_w"].shape[0]
    N = B * S1 * S2

    # get_grid + concat, built channel-major: channels = (a, grid_x, grid_y)
    gridx = jnp.linspace(0.0, 1.0, S1, dtype=jnp.float32)
    gridy = jnp.linspace(0.0, 1.0, S2, dtype=jnp.float32)
    gx = jnp.broadcast_to(gridx[None, :, None], (B, S1, S2))
    gy = jnp.broadcast_to(gridy[None, None, :], (B, S1, S2))
    feat = jnp.stack([a.astype(jnp.float32), gx, gy], axis=0).reshape(3, N)

    # lift: Linear(3, width) as VPU FMAs
    x = lift(feat, params["p_w"], params["p_b"]).reshape(W, B, S1, S2)

    # 4 Fourier layers
    for lay in params["layers"]:
        x = fourier_layer(x, lay, modes1, modes2)

    # projection q: MLP(W -> 4W -> 1), fused, lane-dense (1, N) output
    out = projection(x.reshape(W, N), params["q1_w"], params["q1_b"],
                     params["q2_w"], params["q2_b"])
    return out.reshape(B, S1, S2)


# ----------------------------------------------------------------------------
# Deterministic parameter init (shapes follow the PyTorch module, stored
# channel-major / pre-stacked so kernels need no per-call reshaping).
# ----------------------------------------------------------------------------
def init_params(key, modes1, modes2, width):
    W = width
    MM = modes1 * modes2
    M = 2 * MM
    Mp = ((M + 127) // 128) * 128
    keys = iter(jax.random.split(key, 64))

    def conv_w(cout, cin):
        k = 1.0 / (cin ** 0.5)
        w = jax.random.uniform(next(keys), (cout, cin), jnp.float32, -k, k)
        b = jax.random.uniform(next(keys), (cout, 1), jnp.float32, -k, k)
        return w, b

    params = {}
    params["p_w"], params["p_b"] = conv_w(W, 3)

    scale = 1.0 / (W * W)
    layers = []
    for _ in range(4):
        lay = {}

        def rand_cplx():
            r = scale * jax.random.uniform(next(keys), (W, W, modes1, modes2), jnp.float32)
            i = scale * jax.random.uniform(next(keys), (W, W, modes1, modes2), jnp.float32)
            return r, i

        w1r, w1i = rand_cplx()
        w2r, w2i = rand_cplx()

        def pack(w1, w2):  # 2x (Cin, Cout, m1, m2) -> (Cin, Cout, Mp), zero-padded modes
            cat = jnp.concatenate([w1.reshape(W, W, MM), w2.reshape(W, W, MM)], axis=-1)
            return jnp.pad(cat, ((0, 0), (0, 0), (0, Mp - M)))

        lay["spec_wr"] = pack(w1r, w2r)
        lay["spec_wi"] = pack(w1i, w2i)

        lay["mlp1_w"], lay["mlp1_b"] = conv_w(W, W)
        m2w, m2b = conv_w(W, W)
        ww, wb = conv_w(W, W)
        lay["m2cat_w"] = jnp.concatenate([m2w, ww], axis=1)    # (W, 2W): [mlp2 | skip]
        lay["m2cat_b"] = m2b + wb                              # (W, 1)
        layers.append(lay)
    params["layers"] = layers

    params["q1_w"], params["q1_b"] = conv_w(4 * W, W)
    params["q2_w"], params["q2_b"] = conv_w(1, 4 * W)
    return params


# ----------------------------------------------------------------------------
if __name__ == "__main__":
    B, S = 2, 16
    modes1 = modes2 = 4
    width = 16

    root = jax.random.PRNGKey(0)
    k_param, k_input = jax.random.split(root)
    params = init_params(k_param, modes1, modes2, width)
    a = jax.random.normal(k_input, (B, S, S), jnp.float32)   # a(x, y) field

    fwd = jax.jit(functools.partial(fno_forward, modes1=modes1, modes2=modes2))
    out = fwd(a, params)
    jax.block_until_ready(out)

    assert out.shape == (B, S, S), out.shape
    assert out.dtype == jnp.float32
    assert bool(jnp.all(jnp.isfinite(out)))
    print("KERNEL_OK")
</pallas_src>

<mosaic_0001>
module attributes {stable_mosaic.version = 11 : i64} {
  func.func @_lift_kernel(%arg0: i32, %arg1: memref<3x256xf32, #tpu.memory_space<vmem>>, %arg2: memref<16x3xf32, #tpu.memory_space<vmem>>, %arg3: memref<16x1xf32, #tpu.memory_space<vmem>>, %arg4: memref<16x256xf32, #tpu.memory_space<vmem>>) attributes {dimension_semantics = [#tpu.dimension_semantics<parallel>], iteration_bounds = array<i64: 2>, scalar_prefetch = 0 : i64, scratch_operands = 0 : i64, tpu.core_type = #tpu.core_type<tc>, window_params = [{transform_indices = @transform_0, window_bounds = array<i64: 3, 256>}, {pipeline_mode = #tpu.pipeline_mode<synchronous>, transform_indices = @transform_1, window_bounds = array<i64: 16, 3>}, {pipeline_mode = #tpu.pipeline_mode<synchronous>, transform_indices = @transform_2, window_bounds = array<i64: 16, 1>}, {transform_indices = @transform_3, window_bounds = array<i64: 16, 256>}]} {
    %c0 = arith.constant 0 : index
    %c0_0 = arith.constant 0 : index
    %0 = vector.load %arg2[%c0, %c0_0] : memref<16x3xf32, #tpu.memory_space<vmem>>, vector<16x1xf32>
    %c0_1 = arith.constant 0 : index
    %c0_2 = arith.constant 0 : index
    %1 = vector.load %arg1[%c0_1, %c0_2] : memref<3x256xf32, #tpu.memory_space<vmem>>, vector<1x256xf32>
    %2 = vector.broadcast %0 : vector<16x1xf32> to vector<16x256xf32>
    %3 = vector.broadcast %1 : vector<1x256xf32> to vector<16x256xf32>
    %4 = arith.mulf %2, %3 : vector<16x256xf32>
    %c0_3 = arith.constant 0 : index
    %c1 = arith.constant 1 : index
    %5 = vector.load %arg2[%c0_3, %c1] : memref<16x3xf32, #tpu.memory_space<vmem>>, vector<16x1xf32>
    %c1_4 = arith.constant 1 : index
    %c0_5 = arith.constant 0 : index
    %6 = vector.load %arg1[%c1_4, %c0_5] : memref<3x256xf32, #tpu.memory_space<vmem>>, vector<1x256xf32>
    %7 = vector.broadcast %5 : vector<16x1xf32> to vector<16x256xf32>
    %8 = vector.broadcast %6 : vector<1x256xf32> to vector<16x256xf32>
    %9 = arith.mulf %7, %8 : vector<16x256xf32>
    %10 = arith.addf %4, %9 : vector<16x256xf32>
    %c0_6 = arith.constant 0 : index
    %c2 = arith.constant 2 : index
    %11 = vector.load %arg2[%c0_6, %c2] : memref<16x3xf32, #tpu.memory_space<vmem>>, vector<16x1xf32>
    %c2_7 = arith.constant 2 : index
    %c0_8 = arith.constant 0 : index
    %12 = vector.load %arg1[%c2_7, %c0_8] : memref<3x256xf32, #tpu.memory_space<vmem>>, vector<1x256xf32>
    %13 = vector.broadcast %11 : vector<16x1xf32> to vector<16x256xf32>
    %14 = vector.broadcast %12 : vector<1x256xf32> to vector<16x256xf32>
    %15 = arith.mulf %13, %14 : vector<16x256xf32>
    %16 = arith.addf %10, %15 : vector<16x256xf32>
    %c0_9 = arith.constant 0 : index
    %c0_10 = arith.constant 0 : index
    %17 = vector.load %arg3[%c0_9, %c0_10] : memref<16x1xf32, #tpu.memory_space<vmem>>, vector<16x1xf32>
    %18 = vector.broadcast %17 : vector<16x1xf32> to vector<16x256xf32>
    %19 = arith.addf %16, %18 : vector<16x256xf32>
    %c0_11 = arith.constant 0 : index
    %c0_12 = arith.constant 0 : index
    %20 = vector.load %arg4[%c0_11, %c0_12] : memref<16x256xf32, #tpu.memory_space<vmem>>, vector<16x256xf32>
    tpu.vector_store %arg4[%c0_11, %c0_12], %19 {strides = array<i32>} : memref<16x256xf32, #tpu.memory_space<vmem>>, vector<16x256xf32>,
    return
  }
  func.func @transform_0(%arg0: i32) -> (i32, i32) {
    %c0_i32 = arith.constant 0 : i32
    %c0_i32_0 = arith.constant 0 : i32
    return %c0_i32, %arg0 : i32, i32
  }
  func.func @transform_1(%arg0: i32) -> (i32, i32) {
    %c0_i32 = arith.constant 0 : i32
    %c0_i32_0 = arith.constant 0 : i32
    %c0_i32_1 = arith.constant 0 : i32
    return %c0_i32, %c0_i32_0 : i32, i32
  }
  func.func @transform_2(%arg0: i32) -> (i32, i32) {
    %c0_i32 = arith.constant 0 : i32
    %c0_i32_0 = arith.constant 0 : i32
    %c0_i32_1 = arith.constant 0 : i32
    return %c0_i32, %c0_i32_0 : i32, i32
  }
  func.func @transform_3(%arg0: i32) -> (i32, i32) {
    %c0_i32 = arith.constant 0 : i32
    %c0_i32_0 = arith.constant 0 : i32
    return %c0_i32, %arg0 : i32, i32
  }
}

module attributes {stable_mosaic.version = 11 : i64} {
  func.func @_spectral_kernel(%arg0: i32, %arg1: i32, %arg2: memref<16x2x128xf32, #tpu.memory_space<vmem>>, %arg3: memref<16x2x128xf32, #tpu.memory_space<vmem>>, %arg4: memref<16x8x128xf32, #tpu.memory_space<vmem>>, %arg5: memref<16x8x128xf32, #tpu.memory_space<vmem>>, %arg6: memref<2x8x128xf32, #tpu.memory_space<vmem>>, %arg7: memref<2x8x128xf32, #tpu.memory_space<vmem>>) attributes {dimension_semantics = [#tpu.dimension_semantics<parallel>, #tpu.dimension_semantics<parallel>], iteration_bounds = array<i64: 2, 1>, scalar_prefetch = 0 : i64, scratch_operands = 0 : i64, tpu.core_type = #tpu.core_type<tc>, window_params = [{transform_indices = @transform_0, window_bounds = array<i64: 16, 2, 128>}, {transform_indices = @transform_1, window_bounds = array<i64: 16, 2, 128>}, {transform_indices = @transform_2, window_bounds = array<i64: 16, 8, 128>}, {transform_indices = @transform_3, window_bounds = array<i64: 16, 8, 128>}, {transform_indices = @transform_4, window_bounds = array<i64: 2, 8, 128>}, {transform_indices = @transform_5, window_bounds = array<i64: 2, 8, 128>}]} {
    %c0 = arith.constant 0 : index
    %c0_0 = arith.constant 0 : index
    %c0_1 = arith.constant 0 : index
    %0 = vector.load %arg4[%c0, %c0_0, %c0_1] : memref<16x8x128xf32, #tpu.memory_space<vmem>>, vector<1x8x128xf32>
    %1 = vector.shape_cast %0 : vector<1x8x128xf32> to vector<8x128xf32>
    %c0_2 = arith.constant 0 : index
    %c0_3 = arith.constant 0 : index
    %c0_4 = arith.constant 0 : index
    %2 = vector.load %arg5[%c0_2, %c0_3, %c0_4] : memref<16x8x128xf32, #tpu.memory_space<vmem>>, vector<1x8x128xf32>
    %3 = vector.shape_cast %2 : vector<1x8x128xf32> to vector<8x128xf32>
    %c0_5 = arith.constant 0 : index
    %c0_6 = arith.constant 0 : index
    %c0_7 = arith.constant 0 : index
    %4 = vector.load %arg2[%c0_5, %c0_6, %c0_7] : memref<16x2x128xf32, #tpu.memory_space<vmem>>, vector<1x1x128xf32>
    %5 = vector.shape_cast %4 : vector<1x1x128xf32> to vector<1x128xf32>
    %c0_8 = arith.constant 0 : index
    %c0_9 = arith.constant 0 : index
    %c0_10 = arith.constant 0 : index
    %6 = vector.load %arg3[%c0_8, %c0_9, %c0_10] : memref<16x2x128xf32, #tpu.memory_space<vmem>>, vector<1x1x128xf32>
    %7 = vector.shape_cast %6 : vector<1x1x128xf32> to vector<1x128xf32>
    %8 = vector.broadcast %5 : vector<1x128xf32> to vector<8x128xf32>
    %9 = arith.mulf %8, %1 : vector<8x128xf32>
    %10 = vector.broadcast %7 : vector<1x128xf32> to vector<8x128xf32>
    %11 = arith.mulf %10, %3 : vector<8x128xf32>
    %12 = arith.subf %9, %11 : vector<8x128xf32>
    %13 = vector.broadcast %5 : vector<1x128xf32> to vector<8x128xf32>
    %14 = arith.mulf %13, %3 : vector<8x128xf32>
    %15 = vector.broadcast %7 : vector<1x128xf32> to vector<8x128xf32>
    %16 = arith.mulf %15, %1 : vector<8x128xf32>
    %17 = arith.addf %14, %16 : vector<8x128xf32>
    %c0_11 = arith.constant 0 : index
    %c1 = arith.constant 1 : index
    %c0_12 = arith.constant 0 : index
    %18 = vector.load %arg2[%c0_11, %c1, %c0_12] : memref<16x2x128xf32, #tpu.memory_space<vmem>>, vector<1x1x128xf32>
    %19 = vector.shape_cast %18 : vector<1x1x128xf32> to vector<1x128xf32>
    %c0_13 = arith.constant 0 : index
    %c1_14 = arith.constant 1 : index
    %c0_15 = arith.constant 0 : index
    %20 = vector.load %arg3[%c0_13, %c1_14, %c0_15] : memref<16x2x128xf32, #tpu.memory_space<vmem>>, vector<1x1x128xf32>
    %21 = vector.shape_cast %20 : vector<1x1x128xf32> to vector<1x128xf32>
    %22 = vector.broadcast %19 : vector<1x128xf32> to vector<8x128xf32>
    %23 = arith.mulf %22, %1 : vector<8x128xf32>
    %24 = vector.broadcast %21 : vector<1x128xf32> to vector<8x128xf32>
    %25 = arith.mulf %24, %3 : vector<8x128xf32>
    %26 = arith.subf %23, %25 : vector<8x128xf32>
    %27 = vector.broadcast %19 : vector<1x128xf32> to vector<8x128xf32>
    %28 = arith.mulf %27, %3 : vector<8x128xf32>
    %29 = vector.broadcast %21 : vector<1x128xf32> to vector<8x128xf32>
    %30 = arith.mulf %29, %1 : vector<8x128xf32>
    %31 = arith.addf %28, %30 : vector<8x128xf32>
    %c1_16 = arith.constant 1 : index
    %c0_17 = arith.constant 0 : index
    %c0_18 = arith.constant 0 : index
    %32 = vector.load %arg4[%c1_16, %c0_17, %c0_18] : memref<16x8x128xf32, #tpu.memory_space<vmem>>, vector<1x8x128xf32>
    %33 = vector.shape_cast %32 : vector<1x8x128xf32> to vector<8x128xf32>
    %c1_19 = arith.constant 1 : index
    %c0_20 = arith.constant 0 : index
    %c0_21 = arith.constant 0 : index
    %34 = vector.load %arg5[%c1_19, %c0_20, %c0_21] : memref<16x8x128xf32, #tpu.memory_space<vmem>>, vector<1x8x128xf32>
    %35 = vector.shape_cast %34 : vector<1x8x128xf32> to vector<8x128xf32>
    %c1_22 = arith.constant 1 : index
    %c0_23 = arith.constant 0 : index
    %c0_24 = arith.constant 0 : index
    %36 = vector.load %arg2[%c1_22, %c0_23, %c0_24] : memref<16x2x128xf32, #tpu.memory_space<vmem>>, vector<1x1x128xf32>
    %37 = vector.shape_cast %36 : vector<1x1x128xf32> to vector<1x128xf32>
    %c1_25 = arith.constant 1 : index
    %c0_26 = arith.constant 0 : index
    %c0_27 = arith.constant 0 : index
    %38 = vector.load %arg3[%c1_25, %c0_26, %c0_27] : memref<16x2x128xf32, #tpu.memory_space<vmem>>, vector<1x1x128xf32>
    %39 = vector.shape_cast %38 : vector<1x1x128xf32> to vector<1x128xf32>
    %40 = vector.broadcast %37 : vector<1x128xf32> to vector<8x128xf32>
    %41 = arith.mulf %40, %33 : vector<8x128xf32>
    %42 = vector.broadcast %39 : vector<1x128xf32> to vector<8x128xf32>
    %43 = arith.mulf %42, %35 : vector<8x128xf32>
    %44 = arith.subf %41, %43 : vector<8x128xf32>
    %45 = vector.broadcast %37 : vector<1x128xf32> to vector<8x128xf32>
    %46 = arith.mulf %45, %35 : vector<8x128xf32>
    %47 = vector.broadcast %39 : vector<1x128xf32> to vector<8x128xf32>
    %48 = arith.mulf %47, %33 : vector<8x128xf32>
    %49 = arith.addf %46, %48 : vector<8x128xf32>
    %50 = arith.addf %12, %44 : vector<8x128xf32>
    %51 = arith.addf %17, %49 : vector<8x128xf32>
    %c1_28 = arith.constant 1 : index
    %c1_29 = arith.constant 1 : index
    %c0_30 = arith.constant 0 : index
    %52 = vector.load %arg2[%c1_28, %c1_29, %c0_30] : memref<16x2x128xf32, #tpu.memory_space<vmem>>, vector<1x1x128xf32>
    %53 = vector.shape_cast %52 : vector<1x1x128xf32> to vector<1x128xf32>
    %c1_31 = arith.constant 1 : index
    %c1_32 = arith.constant 1 : index
    %c0_33 = arith.constant 0 : index
    %54 = vector.load %arg3[%c1_31, %c1_32, %c0_33] : memref<16x2x128xf32, #tpu.memory_space<vmem>>, vector<1x1x128xf32>
    %55 = vector.shape_cast %54 : vector<1x1x128xf32> to vector<1x128xf32>
    %56 = vector.broadcast %53 : vector<1x128xf32> to vector<8x128xf32>
    %57 = arith.mulf %56, %33 : vector<8x128xf32>
    %58 = vector.broadcast %55 : vector<1x128xf32> to vector<8x128xf32>
    %59 = arith.mulf %58, %35 : vector<8x128xf32>
    %60 = arith.subf %57, %59 : vector<8x128xf32>
    %61 = vector.broadcast %53 : vector<1x128xf32> to vector<8x128xf32>
    %62 = arith.mulf %61, %35 : vector<8x128xf32>
    %63 = vector.broadcast %55 : vector<1x128xf32> to vector<8x128xf32>
    %64 = arith.mulf %63, %33 : vector<8x128xf32>
    %65 = arith.addf %62, %64 : vector<8x128xf32>
    %66 = arith.addf %26, %60 : vector<8x128xf32>
    %67 = arith.addf %31, %65 : vector<8x128xf32>
    %c2 = arith.constant 2 : index
    %c0_34 = arith.constant 0 : index
    %c0_35 = arith.constant 0 : index
    %68 = vector.load %arg4[%c2, %c0_34, %c0_35] : memref<16x8x128xf32, #tpu.memory_space<vmem>>, vector<1x8x128xf32>
    %69 = vector.shape_cast %68 : vector<1x8x128xf32> to vector<8x128xf32>
    %c2_36 = arith.constant 2 : index
    %c0_37 = arith.constant 0 : index
    %c0_38 = arith.constant 0 : index
    %70 = vector.load %arg5[%c2_36, %c0_37, %c0_38] : memref<16x8x128xf32, #tpu.memory_space<vmem>>, vector<1x8x128xf32>
    %71 = vector.shape_cast %70 : vector<1x8x128xf32> to vector<8x128xf32>
    %c2_39 = arith.constant 2 : index
    %c0_40 = arith.constant 0 : index
    %c0_41 = arith.constant 0 : index
    %72 = vector.load %arg2[%c2_39, %c0_40, %c0_41] : memref<16x2x128xf32, #tpu.memory_space<vmem>>, vector<1x1x128xf32>
    %73 = vector.shape_cast %72 : vector<1x1x128xf32> to vector<1x128xf32>
    %c2_42 = arith.constant 2 : index
    %c0_43 = arith.constant 0 : index
    %c0_44 = arith.constant 0 : index
    %74 = vector.load %arg3[%c2_42, %c0_43, %c0_44] : memref<16x2x128xf32, #tpu.memory_space<vmem>>, vector<1x1x128xf32>
    %75 = vector.shape_cast %74 : vector<1x1x128xf32> to vector<1x128xf32>
    %76 = vector.broadcast %73 : vector<1x128xf32> to vector<8x128xf32>
    %77 = arith.mulf %76, %69 : vector<8x128xf32>
    %78 = vector.broadcast %75 : vector<1x128xf32> to vector<8x128xf32>
    %79 = arith.mulf %78, %71 : vector<8x128xf32>
    %80 = arith.subf %77, %79 : vector<8x128xf32>
    %81 = vector.broadcast %73 : vector<1x128xf32> to vector<8x128xf32>
    %82 = arith.mulf %81, %71 : vector<8x128xf32>
    %83 = vector.broadcast %75 : vector<1x128xf32> to vector<8x128xf32>
    %84 = arith.mulf %83, %69 : vector<8x128xf32>
    %85 = arith.addf %82, %84 : vector<8x128xf32>
    %86 = arith.addf %50, %80 : vector<8x128xf32>
    %87 = arith.addf %51, %85 : vector<8x128xf32>
    %c2_45 = arith.constant 2 : index
    %c1_46 = arith.constant 1 : index
    %c0_47 = arith.constant 0 : index
    %88 = vector.load %arg2[%c2_45, %c1_46, %c0_47] : memref<16x2x128xf32, #tpu.memory_space<vmem>>, vector<1x1x128xf32>
    %89 = vector.shape_cast %88 : vector<1x1x128xf32> to vector<1x128xf32>
    %c2_48 = arith.constant 2 : index
    %c1_49 = arith.constant 1 : index
    %c0_50 = arith.constant 0 : index
    %90 = vector.load %arg3[%c2_48, %c1_49, %c0_50] : memref<16x2x128xf32, #tpu.memory_space<vmem>>, vector<1x1x128xf32>
    %91 = vector.shape_cast %90 : vector<1x1x128xf32> to vector<1x128xf32>
    %92 = vector.broadcast %89 : vector<1x128xf32> to vector<8x128xf32>
    %93 = arith.mulf %92, %69 : vector<8x128xf32>
    %94 = vector.broadcast %91 : vector<1x128xf32> to vector<8x128xf32>
    %95 = arith.mulf %94, %71 : vector<8x128xf32>
    %96 = arith.subf %93, %95 : vector<8x128xf32>
    %97 = vector.broadcast %89 : vector<1x128xf32> to vector<8x128xf32>
    %98 = arith.mulf %97, %71 : vector<8x128xf32>
    %99 = vector.broadcast %91 : vector<1x128xf32> to vector<8x128xf32>
    %100 = arith.mulf %99, %69 : vector<8x128xf32>
    %101 = arith.addf %98, %100 : vector<8x128xf32>
    %102 = arith.addf %66, %96 : vector<8x128xf32>
    %103 = arith.addf %67, %101 : vector<8x128xf32>
    %c3 = arith.constant 3 : index
    %c0_51 = arith.constant 0 : index
    %c0_52 = arith.constant 0 : index
    %104 = vector.load %arg4[%c3, %c0_51, %c0_52] : memref<16x8x128xf32, #tpu.memory_space<vmem>>, vector<1x8x128xf32>
    %105 = vector.shape_cast %104 : vector<1x8x128xf32> to vector<8x128xf32>
    %c3_53 = arith.constant 3 : index
    %c0_54 = arith.constant 0 : index
    %c0_55 = arith.constant 0 : index
    %106 = vector.load %arg5[%c3_53, %c0_54, %c0_55] : memref<16x8x128xf32, #tpu.memory_space<vmem>>, vector<1x8x128xf32>
    %107 = vector.shape_cast %106 : vector<1x8x128xf32> to vector<8x128xf32>
    %c3_56 = arith.constant 3 : index
    %c0_57 = arith.constant 0 : index
    %c0_58 = arith.constant 0 : index
    %108 = vector.load %arg2[%c3_56, %c0_57, %c0_58] : memref<16x2x128xf32, #tpu.memory_space<vmem>>, vector<1x1x128xf32>
    %109 = vector.shape_cast %108 : vector<1x1x128xf32> to vector<1x128xf32>
    %c3_59 = arith.constant 3 : index
    %c0_60 = arith.constant 0 : index
    %c0_61 = arith.constant 0 : index
    %110 = vector.load %arg3[%c3_59, %c0_60, %c0_61] : memref<16x2x128xf32, #tpu.memory_space<vmem>>, vector<1x1x128xf32>
    %111 = vector.shape_cast %110 : vector<1x1x128xf32> to vector<1x128xf32>
    %112 = vector.broadcast %109 : vector<1x128xf32> to vector<8x128xf32>
    %113 = arith.mulf %112, %105 : vector<8x128xf32>
    %114 = vector.broadcast %111 : vector<1x128xf32> to vector<8x128xf32>
    %115 = arith.mulf %114, %107 : vector<8x128xf32>
    %116 = arith.subf %113, %115 : vector<8x128xf32>
    %117 = vector.broadcast %109 : vector<1x128xf32> to vector<8x128xf32>
    %118 = arith.mulf %117, %107 : vector<8x128xf32>
    %119 = vector.broadcast %111 : vector<1x128xf32> to vector<8x128xf32>
    %120 = arith.mulf %119, %105 : vector<8x128xf32>
    %121 = arith.addf %118, %120 : vector<8x128xf32>
    %122 = arith.addf %86, %116 : vector<8x128xf32>
    %123 = arith.addf %87, %121 : vector<8x128xf32>
    %c3_62 = arith.constant 3 : index
    %c1_63 = arith.constant 1 : index
    %c0_64 = arith.constant 0 : index
    %124 = vector.load %arg2[%c3_62, %c1_63, %c0_64] : memref<16x2x128xf32, #tpu.memory_space<vmem>>, vector<1x1x128xf32>
    %125 = vector.shape_cast %124 : vector<1x1x128xf32> to vector<1x128xf32>
    %c3_65 = arith.constant 3 : index
    %c1_66 = arith.constant 1 : index
    %c0_67 = arith.constant 0 : index
    %126 = vector.load %arg3[%c3_65, %c1_66, %c0_67] : memref<16x2x128xf32, #tpu.memory_space<vmem>>, vector<1x1x128xf32>
    %127 = vector.shape_cast %126 : vector<1x1x128xf32> to vector<1x128xf32>
    %128 = vector.broadcast %125 : vector<1x128xf32> to vector<8x128xf32>
    %129 = arith.mulf %128, %105 : vector<8x128xf32>
    %130 = vector.broadcast %127 : vector<1x128xf32> to vector<8x128xf32>
    %131 = arith.mulf %130, %107 : vector<8x128xf32>
    %132 = arith.subf %129, %131 : vector<8x128xf32>
    %133 = vector.broadcast %125 : vector<1x128xf32> to vector<8x128xf32>
    %134 = arith.mulf %133, %107 : vector<8x128xf32>
    %135 = vector.broadcast %127 : vector<1x128xf32> to vector<8x128xf32>
    %136 = arith.mulf %135, %105 : vector<8x128xf32>
    %137 = arith.addf %134, %136 : vector<8x128xf32>
    %138 = arith.addf %102, %132 : vector<8x128xf32>
    %139 = arith.addf %103, %137 : vector<8x128xf32>
    %c4 = arith.constant 4 : index
    %c0_68 = arith.constant 0 : index
    %c0_69 = arith.constant 0 : index
    %140 = vector.load %arg4[%c4, %c0_68, %c0_69] : memref<16x8x128xf32, #tpu.memory_space<vmem>>, vector<1x8x128xf32>
    %141 = vector.shape_cast %140 : vector<1x8x128xf32> to vector<8x128xf32>
    %c4_70 = arith.constant 4 : index
    %c0_71 = arith.constant 0 : index
    %c0_72 = arith.constant 0 : index
    %142 = vector.load %arg5[%c4_70, %c0_71, %c0_72] : memref<16x8x128xf32, #tpu.memory_space<vmem>>, vector<1x8x128xf32>
    %143 = vector.shape_cast %142 : vector<1x8x128xf32> to vector<8x128xf32>
    %c4_73 = arith.constant 4 : index
    %c0_74 = arith.constant 0 : index
    %c0_75 = arith.constant 0 : index
    %144 = vector.load %arg2[%c4_73, %c0_74, %c0_75] : memref<16x2x128xf32, #tpu.memory_space<vmem>>, vector<1x1x128xf32>
    %145 = vector.shape_cast %144 : vector<1x1x128xf32> to vector<1x128xf32>
    %c4_76 = arith.constant 4 : index
    %c0_77 = arith.constant 0 : index
    %c0_78 = arith.constant 0 : index
    %146 = vector.load %arg3[%c4_76, %c0_77, %c0_78] : memref<16x2x128xf32, #tpu.memory_space<vmem>>, vector<1x1x128xf32>
    %147 = vector.shape_cast %146 : vector<1x1x128xf32> to vector<1x128xf32>
    %148 = vector.broadcast %145 : vector<1x128xf32> to vector<8x128xf32>
    %149 = arith.mulf %148, %141 : vector<8x128xf32>
    %150 = vector.broadcast %147 : vector<1x128xf32> to vector<8x128xf32>
    %151 = arith.mulf %150, %143 : vector<8x128xf32>
    %152 = arith.subf %149, %151 : vector<8x128xf32>
    %153 = vector.broadcast %145 : vector<1x128xf32> to vector<8x128xf32>
    %154 = arith.mulf %153, %143 : vector<8x128xf32>
    %155 = vector.broadcast %147 : vector<1x128xf32> to vector<8x128xf32>
    %156 = arith.mulf %155, %141 : vector<8x128xf32>
    %157 = arith.addf %154, %156 : vector<8x128xf32>
    %158 = arith.addf %122, %152 : vector<8x128xf32>
    %159 = arith.addf %123, %157 : vector<8x128xf32>
    %c4_79 = arith.constant 4 : index
    %c1_80 = arith.constant 1 : index
    %c0_81 = arith.constant 0 : index
    %160 = vector.load %arg2[%c4_79, %c1_80, %c0_81] : memref<16x2x128xf32, #tpu.memory_space<vmem>>, vector<1x1x128xf32>
    %161 = vector.shape_cast %160 : vector<1x1x128xf32> to vector<1x128xf32>
    %c4_82 = arith.constant 4 : index
    %c1_83 = arith.constant 1 : index
    %c0_84 = arith.constant 0 : index
    %162 = vector.load %arg3[%c4_82, %c1_83, %c0_84] : memref<16x2x128xf32, #tpu.memory_space<vmem>>, vector<1x1x128xf32>
    %163 = vector.shape_cast %162 : vector<1x1x128xf32> to vector<1x128xf32>
    %164 = vector.broadcast %161 : vector<1x128xf32> to vector<8x128xf32>
    %165 = arith.mulf %164, %141 : vector<8x128xf32>
    %166 = vector.broadcast %163 : vector<1x128xf32> to vector<8x128xf32>
    %167 = arith.mulf %166, %143 : vector<8x128xf32>
    %168 = arith.subf %165, %167 : vector<8x128xf32>
    %169 = vector.broadcast %161 : vector<1x128xf32> to vector<8x128xf32>
    %170 = arith.mulf %169, %143 : vector<8x128xf32>
    %171 = vector.broadcast %163 : vector<1x128xf32> to vector<8x128xf32>
    %172 = arith.mulf %171, %141 : vector<8x128xf32>
    %173 = arith.addf %170, %172 : vector<8x128xf32>
    %174 = arith.addf %138, %168 : vector<8x128xf32>
    %175 = arith.addf %139, %173 : vector<8x128xf32>
    %c5 = arith.constant 5 : index
    %c0_85 = arith.constant 0 : index
    %c0_86 = arith.constant 0 : index
    %176 = vector.load %arg4[%c5, %c0_85, %c0_86] : memref<16x8x128xf32, #tpu.memory_space<vmem>>, vector<1x8x128xf32>
    %177 = vector.shape_cast %176 : vector<1x8x128xf32> to vector<8x128xf32>
    %c5_87 = arith.constant 5 : index
    %c0_88 = arith.constant 0 : index
    %c0_89 = arith.constant 0 : index
    %178 = vector.load %arg5[%c5_87, %c0_88, %c0_89] : memref<16x8x128xf32, #tpu.memory_space<vmem>>, vector<1x8x128xf32>
    %179 = vector.shape_cast %178 : vector<1x8x128xf32> to vector<8x128xf32>
    %c5_90 = arith.constant 5 : index
    %c0_91 = arith.constant 0 : index
    %c0_92 = arith.constant 0 : index
    %180 = vector.load %arg2[%c5_90, %c0_91, %c0_92] : memref<16x2x128xf32, #tpu.memory_space<vmem>>, vector<1x1x128xf32>
    %181 = vector.shape_cast %180 : vector<1x1x128xf32> to vector<1x128xf32>
    %c5_93 = arith.constant 5 : index
    %c0_94 = arith.constant 0 : index
    %c0_95 = arith.constant 0 : index
    %182 = vector.load %arg3[%c5_93, %c0_94, %c0_95] : memref<16x2x128xf32, #tpu.memory_space<vmem>>, vector<1x1x128xf32>
    %183 = vector.shape_cast %182 : vector<1x1x128xf32> to vector<1x128xf32>
    %184 = vector.broadcast %181 : vector<1x128xf32> to vector<8x128xf32>
    %185 = arith.mulf %184, %177 : vector<8x128xf32>
    %186 = vector.broadcast %183 : vector<1x128xf32> to vector<8x128xf32>
    %187 = arith.mulf %186, %179 : vector<8x128xf32>
    %188 = arith.subf %185, %187 : vector<8x128xf32>
    %189 = vector.broadcast %181 : vector<1x128xf32> to vector<8x128xf32>
    %190 = arith.mulf %189, %179 : vector<8x128xf32>
    %191 = vector.broadcast %183 : vector<1x128xf32> to vector<8x128xf32>
    %192 = arith.mulf %191, %177 : vector<8x128xf32>
    %193 = arith.addf %190, %192 : vector<8x128xf32>
    %194 = arith.addf %158, %188 : vector<8x128xf32>
    %195 = arith.addf %159, %193 : vector<8x128xf32>
    %c5_96 = arith.constant 5 : index
    %c1_97 = arith.constant 1 : index
    %c0_98 = arith.constant 0 : index
    %196 = vector.load %arg2[%c5_96, %c1_97, %c0_98] : memref<16x2x128xf32, #tpu.memory_space<vmem>>, vector<1x1x128xf32>
    %197 = vector.shape_cast %196 : vector<1x1x128xf32> to vector<1x128xf32>
    %c5_99 = arith.constant 5 : index
    %c1_100 = arith.constant 1 : index
    %c0_101 = arith.constant 0 : index
    %198 = vector.load %arg3[%c5_99, %c1_100, %c0_101] : memref<16x2x128xf32, #tpu.memory_space<vmem>>, vector<1x1x128xf32>
    %199 = vector.shape_cast %198 : vector<1x1x128xf32> to vector<1x128xf32>
    %200 = vector.broadcast %197 : vector<1x128xf32> to vector<8x128xf32>
    %201 = arith.mulf %200, %177 : vector<8x128xf32>
    %202 = vector.broadcast %199 : vector<1x128xf32> to vector<8x128xf32>
    %203 = arith.mulf %202, %179 : vector<8x128xf32>
    %204 = arith.subf %201, %203 : vector<8x128xf32>
    %205 = vector.broadcast %197 : vector<1x128xf32> to vector<8x128xf32>
    %206 = arith.mulf %205, %179 : vector<8x128xf32>
    %207 = vector.broadcast %199 : vector<1x128xf32> to vector<8x128xf32>
    %208 = arith.mulf %207, %177 : vector<8x128xf32>
    %209 = arith.addf %206, %208 : vector<8x128xf32>
    %210 = arith.addf %174, %204 : vector<8x128xf32>
    %211 = arith.addf %175, %209 : vector<8x128xf32>
    %c6 = arith.constant 6 : index
    %c0_102 = arith.constant 0 : index
    %c0_103 = arith.constant 0 : index
    %212 = vector.load %arg4[%c6, %c0_102, %c0_103] : memref<16x8x128xf32, #tpu.memory_space<vmem>>, vector<1x8x128xf32>
    %213 = vector.shape_cast %212 : vector<1x8x128xf32> to vector<8x128xf32>
    %c6_104 = arith.constant 6 : index
    %c0_105 = arith.constant 0 : index
    %c0_106 = arith.constant 0 : index
    %214 = vector.load %arg5[%c6_104, %c0_105, %c0_106] : memref<16x8x128xf32, #tpu.memory_space<vmem>>, vector<1x8x128xf32>
    %215 = vector.shape_cast %214 : vector<1x8x128xf32> to vector<8x128xf32>
    %c6_107 = arith.constant 6 : index
    %c0_108 = arith.constant 0 : index
    %c0_109 = arith.constant 0 : index
    %216 = vector.load %arg2[%c6_107, %c0_108, %c0_109] : memref<16x2x128xf32, #tpu.memory_space<vmem>>, vector<1x1x128xf32>
    %217 = vector.shape_cast %216 : vector<1x1x128xf32> to vector<1x128xf32>
    %c6_110 = arith.constant 6 : index
    %c0_111 = arith.constant 0 : index
    %c0_112 = arith.constant 0 : index
    %218 = vector.load %arg3[%c6_110, %c0_111, %c0_112] : memref<16x2x128xf32, #tpu.memory_space<vmem>>, vector<1x1x128xf32>
    %219 = vector.shape_cast %218 : vector<1x1x128xf32> to vector<1x128xf32>
    %220 = vector.broadcast %217 : vector<1x128xf32> to vector<8x128xf32>
    %221 = arith.mulf %220, %213 : vector<8x128xf32>
    %222 = vector.broadcast %219 : vector<1x128xf32> to vector<8x128xf32>
    %223 = arith.mulf %222, %215 : vector<8x128xf32>
    %224 = arith.subf %221, %223 : vector<8x128xf32>
    %225 = vector.broadcast %217 : vector<1x128xf32> to vector<8x128xf32>
    %226 = arith.mulf %225, %215 : vector<8x128xf32>
    %227 = vector.broadcast %219 : vector<1x128xf32> to vector<8x128xf32>
    %228 = arith.mulf %227, %213 : vector<8x128xf32>
    %229 = arith.addf %226, %228 : vector<8x128xf32>
    %230 = arith.addf %194, %224 : vector<8x128xf32>
    %231 = arith.addf %195, %229 : vector<8x128xf32>
    %c6_113 = arith.constant 6 : index
    %c1_114 = arith.constant 1 : index
    %c0_115 = arith.constant 0 : index
    %232 = vector.load %arg2[%c6_113, %c1_114, %c0_115] : memref<16x2x128xf32, #tpu.memory_space<vmem>>, vector<1x1x128xf32>
    %233 = vector.shape_cast %232 : vector<1x1x128xf32> to vector<1x128xf32>
    %c6_116 = arith.constant 6 : index
    %c1_117 = arith.constant 1 : index
    %c0_118 = arith.constant 0 : index
    %234 = vector.load %arg3[%c6_116, %c1_117, %c0_118] : memref<16x2x128xf32, #tpu.memory_space<vmem>>, vector<1x1x128xf32>
    %235 = vector.shape_cast %234 : vector<1x1x128xf32> to vector<1x128xf32>
    %236 = vector.broadcast %233 : vector<1x128xf32> to vector<8x128xf32>
    %237 = arith.mulf %236, %213 : vector<8x128xf32>
    %238 = vector.broadcast %235 : vector<1x128xf32> to vector<8x128xf32>
    %239 = arith.mulf %238, %215 : vector<8x128xf32>
    %240 = arith.subf %237, %239 : vector<8x128xf32>
    %241 = vector.broadcast %233 : vector<1x128xf32> to vector<8x128xf32>
    %242 = arith.mulf %241, %215 : vector<8x128xf32>
    %243 = vector.broadcast %235 : vector<1x128xf32> to vector<8x128xf32>
    %244 = arith.mulf %243, %213 : vector<8x128xf32>
    %245 = arith.addf %242, %244 : vector<8x128xf32>
    %246 = arith.addf %210, %240 : vector<8x128xf32>
    %247 = arith.addf %211, %245 : vector<8x128xf32>
    %c7 = arith.constant 7 : index
    %c0_119 = arith.constant 0 : index
    %c0_120 = arith.constant 0 : index
    %248 = vector.load %arg4[%c7, %c0_119, %c0_120] : memref<16x8x128xf32, #tpu.memory_space<vmem>>, vector<1x8x128xf32>
    %249 = vector.shape_cast %248 : vector<1x8x128xf32> to vector<8x128xf32>
    %c7_121 = arith.constant 7 : index
    %c0_122 = arith.constant 0 : index
    %c0_123 = arith.constant 0 : index
    %250 = vector.load %arg5[%c7_121, %c0_122, %c0_123] : memref<16x8x128xf32, #tpu.memory_space<vmem>>, vector<1x8x128xf32>
    %251 = vector.shape_cast %250 : vector<1x8x128xf32> to vector<8x128xf32>
    %c7_124 = arith.constant 7 : index
    %c0_125 = arith.constant 0 : index
    %c0_126 = arith.constant 0 : index
    %252 = vector.load %arg2[%c7_124, %c0_125, %c0_126] : memref<16x2x128xf32, #tpu.memory_space<vmem>>, vector<1x1x128xf32>
    %253 = vector.shape_cast %252 : vector<1x1x128xf32> to vector<1x128xf32>
    %c7_127 = arith.constant 7 : index
    %c0_128 = arith.constant 0 : index
    %c0_129 = arith.constant 0 : index
    %254 = vector.load %arg3[%c7_127, %c0_128, %c0_129] : memref<16x2x128xf32, #tpu.memory_space<vmem>>, vector<1x1x128xf32>
    %255 = vector.shape_cast %254 : vector<1x1x128xf32> to vector<1x128xf32>
    %256 = vector.broadcast %253 : vector<1x128xf32> to vector<8x128xf32>
    %257 = arith.mulf %256, %249 : vector<8x128xf32>
    %258 = vector.broadcast %255 : vector<1x128xf32> to vector<8x128xf32>
    %259 = arith.mulf %258, %251 : vector<8x128xf32>
    %260 = arith.subf %257, %259 : vector<8x128xf32>
    %261 = vector.broadcast %253 : vector<1x128xf32> to vector<8x128xf32>
    %262 = arith.mulf %261, %251 : vector<8x128xf32>
    %263 = vector.broadcast %255 : vector<1x128xf32> to vector<8x128xf32>
    %264 = arith.mulf %263, %249 : vector<8x128xf32>
    %265 = arith.addf %262, %264 : vector<8x128xf32>
    %266 = arith.addf %230, %260 : vector<8x128xf32>
    %267 = arith.addf %231, %265 : vector<8x128xf32>
    %c7_130 = arith.constant 7 : index
    %c1_131 = arith.constant 1 : index
    %c0_132 = arith.constant 0 : index
    %268 = vector.load %arg2[%c7_130, %c1_131, %c0_132] : memref<16x2x128xf32, #tpu.memory_space<vmem>>, vector<1x1x128xf32>
    %269 = vector.shape_cast %268 : vector<1x1x128xf32> to vector<1x128xf32>
    %c7_133 = arith.constant 7 : index
    %c1_134 = arith.constant 1 : index
    %c0_135 = arith.constant 0 : index
    %270 = vector.load %arg3[%c7_133, %c1_134, %c0_135] : memref<16x2x128xf32, #tpu.memory_space<vmem>>, vector<1x1x128xf32>
    %271 = vector.shape_cast %270 : vector<1x1x128xf32> to vector<1x128xf32>
    %272 = vector.broadcast %269 : vector<1x128xf32> to vector<8x128xf32>
    %273 = arith.mulf %272, %249 : vector<8x128xf32>
    %274 = vector.broadcast %271 : vector<1x128xf32> to vector<8x128xf32>
    %275 = arith.mulf %274, %251 : vector<8x128xf32>
    %276 = arith.subf %273, %275 : vector<8x128xf32>
    %277 = vector.broadcast %269 : vector<1x128xf32> to vector<8x128xf32>
    %278 = arith.mulf %277, %251 : vector<8x128xf32>
    %279 = vector.broadcast %271 : vector<1x128xf32> to vector<8x128xf32>
    %280 = arith.mulf %279, %249 : vector<8x128xf32>
    %281 = arith.addf %278, %280 : vector<8x128xf32>
    %282 = arith.addf %246, %276 : vector<8x128xf32>
    %283 = arith.addf %247, %281 : vector<8x128xf32>
    %c8 = arith.constant 8 : index
    %c0_136 = arith.constant 0 : index
    %c0_137 = arith.constant 0 : index
    %284 = vector.load %arg4[%c8, %c0_136, %c0_137] : memref<16x8x128xf32, #tpu.memory_space<vmem>>, vector<1x8x128xf32>
    %285 = vector.shape_cast %284 : vector<1x8x128xf32> to vector<8x128xf32>
    %c8_138 = arith.constant 8 : index
    %c0_139 = arith.constant 0 : index
    %c0_140 = arith.constant 0 : index
    %286 = vector.load %arg5[%c8_138, %c0_139, %c0_140] : memref<16x8x128xf32, #tpu.memory_space<vmem>>, vector<1x8x128xf32>
    %287 = vector.shape_cast %286 : vector<1x8x128xf32> to vector<8x128xf32>
    %c8_141 = arith.constant 8 : index
    %c0_142 = arith.constant 0 : index
    %c0_143 = arith.constant 0 : index
    %288 = vector.load %arg2[%c8_141, %c0_142, %c0_143] : memref<16x2x128xf32, #tpu.memory_space<vmem>>, vector<1x1x128xf32>
    %289 = vector.shape_cast %288 : vector<1x1x128xf32> to vector<1x128xf32>
    %c8_144 = arith.constant 8 : index
    %c0_145 = arith.constant 0 : index
    %c0_146 = arith.constant 0 : index
    %290 = vector.load %arg3[%c8_144, %c0_145, %c0_146] : memref<16x2x128xf32, #tpu.memory_space<vmem>>, vector<1x1x128xf32>
    %291 = vector.shape_cast %290 : vector<1x1x128xf32> to vector<1x128xf32>
    %292 = vector.broadcast %289 : vector<1x128xf32> to vector<8x128xf32>
    %293 = arith.mulf %292, %285 : vector<8x128xf32>
    %294 = vector.broadcast %291 : vector<1x128xf32> to vector<8x128xf32>
    %295 = arith.mulf %294, %287 : vector<8x128xf32>
    %296 = arith.subf %293, %295 : vector<8x128xf32>
    %297 = vector.broadcast %289 : vector<1x128xf32> to vector<8x128xf32>
    %298 = arith.mulf %297, %287 : vector<8x128xf32>
    %299 = vector.broadcast %291 : vector<1x128xf32> to vector<8x128xf32>
    %300 = arith.mulf %299, %285 : vector<8x128xf32>
    %301 = arith.addf %298, %300 : vector<8x128xf32>
    %302 = arith.addf %266, %296 : vector<8x128xf32>
    %303 = arith.addf %267, %301 : vector<8x128xf32>
    %c8_147 = arith.constant 8 : index
    %c1_148 = arith.constant 1 : index
    %c0_149 = arith.constant 0 : index
    %304 = vector.load %arg2[%c8_147, %c1_148, %c0_149] : memref<16x2x128xf32, #tpu.memory_space<vmem>>, vector<1x1x128xf32>
    %305 = vector.shape_cast %304 : vector<1x1x128xf32> to vector<1x128xf32>
    %c8_150 = arith.constant 8 : index
    %c1_151 = arith.constant 1 : index
    %c0_152 = arith.constant 0 : index
    %306 = vector.load %arg3[%c8_150, %c1_151, %c0_152] : memref<16x2x128xf32, #tpu.memory_space<vmem>>, vector<1x1x128xf32>
    %307 = vector.shape_cast %306 : vector<1x1x128xf32> to vector<1x128xf32>
    %308 = vector.broadcast %305 : vector<1x128xf32> to vector<8x128xf32>
    %309 = arith.mulf %308, %285 : vector<8x128xf32>
    %310 = vector.broadcast %307 : vector<1x128xf32> to vector<8x128xf32>
    %311 = arith.mulf %310, %287 : vector<8x128xf32>
    %312 = arith.subf %309, %311 : vector<8x128xf32>
    %313 = vector.broadcast %305 : vector<1x128xf32> to vector<8x128xf32>
    %314 = arith.mulf %313, %287 : vector<8x128xf32>
    %315 = vector.broadcast %307 : vector<1x128xf32> to vector<8x128xf32>
    %316 = arith.mulf %315, %285 : vector<8x128xf32>
    %317 = arith.addf %314, %316 : vector<8x128xf32>
    %318 = arith.addf %282, %312 : vector<8x128xf32>
    %319 = arith.addf %283, %317 : vector<8x128xf32>
    %c9 = arith.constant 9 : index
    %c0_153 = arith.constant 0 : index
    %c0_154 = arith.constant 0 : index
    %320 = vector.load %arg4[%c9, %c0_153, %c0_154] : memref<16x8x128xf32, #tpu.memory_space<vmem>>, vector<1x8x128xf32>
    %321 = vector.shape_cast %320 : vector<1x8x128xf32> to vector<8x128xf32>
    %c9_155 = arith.constant 9 : index
    %c0_156 = arith.constant 0 : index
    %c0_157 = arith.constant 0 : index
    %322 = vector.load %arg5[%c9_155, %c0_156, %c0_157] : memref<16x8x128xf32, #tpu.memory_space<vmem>>, vector<1x8x128xf32>
    %323 = vector.shape_cast %322 : vector<1x8x128xf32> to vector<8x128xf32>
    %c9_158 = arith.constant 9 : index
    %c0_159 = arith.constant 0 : index
    %c0_160 = arith.constant 0 : index
    %324 = vector.load %arg2[%c9_158, %c0_159, %c0_160] : memref<16x2x128xf32, #tpu.memory_space<vmem>>, vector<1x1x128xf32>
    %325 = vector.shape_cast %324 : vector<1x1x128xf32> to vector<1x128xf32>
    %c9_161 = arith.constant 9 : index
    %c0_162 = arith.constant 0 : index
    %c0_163 = arith.constant 0 : index
    %326 = vector.load %arg3[%c9_161, %c0_162, %c0_163] : memref<16x2x128xf32, #tpu.memory_space<vmem>>, vector<1x1x128xf32>
    %327 = vector.shape_cast %326 : vector<1x1x128xf32> to vector<1x128xf32>
    %328 = vector.broadcast %325 : vector<1x128xf32> to vector<8x128xf32>
    %329 = arith.mulf %328, %321 : vector<8x128xf32>
    %330 = vector.broadcast %327 : vector<1x128xf32> to vector<8x128xf32>
    %331 = arith.mulf %330, %323 : vector<8x128xf32>
    %332 = arith.subf %329, %331 : vector<8x128xf32>
    %333 = vector.broadcast %325 : vector<1x128xf32> to vector<8x128xf32>
    %334 = arith.mulf %333, %323 : vector<8x128xf32>
    %335 = vector.broadcast %327 : vector<1x128xf32> to vector<8x128xf32>
    %336 = arith.mulf %335, %321 : vector<8x128xf32>
    %337 = arith.addf %334, %336 : vector<8x128xf32>
    %338 = arith.addf %302, %332 : vector<8x128xf32>
    %339 = arith.addf %303, %337 : vector<8x128xf32>
    %c9_164 = arith.constant 9 : index
    %c1_165 = arith.constant 1 : index
    %c0_166 = arith.constant 0 : index
    %340 = vector.load %arg2[%c9_164, %c1_165, %c0_166] : memref<16x2x128xf32, #tpu.memory_space<vmem>>, vector<1x1x128xf32>
    %341 = vector.shape_cast %340 : vector<1x1x128xf32> to vector<1x128xf32>
    %c9_167 = arith.constant 9 : index
    %c1_168 = arith.constant 1 : index
    %c0_169 = arith.constant 0 : index
    %342 = vector.load %arg3[%c9_167, %c1_168, %c0_169] : memref<16x2x128xf32, #tpu.memory_space<vmem>>, vector<1x1x128xf32>
    %343 = vector.shape_cast %342 : vector<1x1x128xf32> to vector<1x128xf32>
    %344 = vector.broadcast %341 : vector<1x128xf32> to vector<8x128xf32>
    %345 = arith.mulf %344, %321 : vector<8x128xf32>
    %346 = vector.broadcast %343 : vector<1x128xf32> to vector<8x128xf32>
    %347 = arith.mulf %346, %323 : vector<8x128xf32>
    %348 = arith.subf %345, %347 : vector<8x128xf32>
    %349 = vector.broadcast %341 : vector<1x128xf32> to vector<8x128xf32>
    %350 = arith.mulf %349, %323 : vector<8x128xf32>
    %351 = vector.broadcast %343 : vector<1x128xf32> to vector<8x128xf32>
    %352 = arith.mulf %351, %321 : vector<8x128xf32>
    %353 = arith.addf %350, %352 : vector<8x128xf32>
    %354 = arith.addf %318, %348 : vector<8x128xf32>
    %355 = arith.addf %319, %353 : vector<8x128xf32>
    %c10 = arith.constant 10 : index
    %c0_170 = arith.constant 0 : index
    %c0_171 = arith.constant 0 : index
    %356 = vector.load %arg4[%c10, %c0_170, %c0_171] : memref<16x8x128xf32, #tpu.memory_space<vmem>>, vector<1x8x128xf32>
    %357 = vector.shape_cast %356 : vector<1x8x128xf32> to vector<8x128xf32>
    %c10_172 = arith.constant 10 : index
    %c0_173 = arith.constant 0 : index
    %c0_174 = arith.constant 0 : index
    %358 = vector.load %arg5[%c10_172, %c0_173, %c0_174] : memref<16x8x128xf32, #tpu.memory_space<vmem>>, vector<1x8x128xf32>
    %359 = vector.shape_cast %358 : vector<1x8x128xf32> to vector<8x128xf32>
    %c10_175 = arith.constant 10 : index
    %c0_176 = arith.constant 0 : index
    %c0_177 = arith.constant 0 : index
    %360 = vector.load %arg2[%c10_175, %c0_176, %c0_177] : memref<16x2x128xf32, #tpu.memory_space<vmem>>, vector<1x1x128xf32>
    %361 = vector.shape_cast %360 : vector<1x1x128xf32> to vector<1x128xf32>
    %c10_178 = arith.constant 10 : index
    %c0_179 = arith.constant 0 : index
    %c0_180 = arith.constant 0 : index
    %362 = vector.load %arg3[%c10_178, %c0_179, %c0_180] : memref<16x2x128xf32, #tpu.memory_space<vmem>>, vector<1x1x128xf32>
    %363 = vector.shape_cast %362 : vector<1x1x128xf32> to vector<1x128xf32>
    %364 = vector.broadcast %361 : vector<1x128xf32> to vector<8x128xf32>
    %365 = arith.mulf %364, %357 : vector<8x128xf32>
    %366 = vector.broadcast %363 : vector<1x128xf32> to vector<8x128xf32>
    %367 = arith.mulf %366, %359 : vector<8x128xf32>
    %368 = arith.subf %365, %367 : vector<8x128xf32>
    %369 = vector.broadcast %361 : vector<1x128xf32> to vector<8x128xf32>
    %370 = arith.mulf %369, %359 : vector<8x128xf32>
    %371 = vector.broadcast %363 : vector<1x128xf32> to vector<8x128xf32>
    %372 = arith.mulf %371, %357 : vector<8x128xf32>
    %373 = arith.addf %370, %372 : vector<8x128xf32>
    %374 = arith.addf %338, %368 : vector<8x128xf32>
    %375 = arith.addf %339, %373 : vector<8x128xf32>
    %c10_181 = arith.constant 10 : index
    %c1_182 = arith.constant 1 : index
    %c0_183 = arith.constant 0 : index
    %376 = vector.load %arg2[%c10_181, %c1_182, %c0_183] : memref<16x2x128xf32, #tpu.memory_space<vmem>>, vector<1x1x128xf32>
    %377 = vector.shape_cast %376 : vector<1x1x128xf32> to vector<1x128xf32>
    %c10_184 = arith.constant 10 : index
    %c1_185 = arith.constant 1 : index
    %c0_186 = arith.constant 0 : index
    %378 = vector.load %arg3[%c10_184, %c1_185, %c0_186] : memref<16x2x128xf32, #tpu.memory_space<vmem>>, vector<1x1x128xf32>
    %379 = vector.shape_cast %378 : vector<1x1x128xf32> to vector<1x128xf32>
    %380 = vector.broadcast %377 : vector<1x128xf32> to vector<8x128xf32>
    %381 = arith.mulf %380, %357 : vector<8x128xf32>
    %382 = vector.broadcast %379 : vector<1x128xf32> to vector<8x128xf32>
    %383 = arith.mulf %382, %359 : vector<8x128xf32>
    %384 = arith.subf %381, %383 : vector<8x128xf32>
    %385 = vector.broadcast %377 : vector<1x128xf32> to vector<8x128xf32>
    %386 = arith.mulf %385, %359 : vector<8x128xf32>
    %387 = vector.broadcast %379 : vector<1x128xf32> to vector<8x128xf32>
    %388 = arith.mulf %387, %357 : vector<8x128xf32>
    %389 = arith.addf %386, %388 : vector<8x128xf32>
    %390 = arith.addf %354, %384 : vector<8x128xf32>
    %391 = arith.addf %355, %389 : vector<8x128xf32>
    %c11 = arith.constant 11 : index
    %c0_187 = arith.constant 0 : index
    %c0_188 = arith.constant 0 : index
    %392 = vector.load %arg4[%c11, %c0_187, %c0_188] : memref<16x8x128xf32, #tpu.memory_space<vmem>>, vector<1x8x128xf32>
    %393 = vector.shape_cast %392 : vector<1x8x128xf32> to vector<8x128xf32>
    %c11_189 = arith.constant 11 : index
    %c0_190 = arith.constant 0 : index
    %c0_191 = arith.constant 0 : index
    %394 = vector.load %arg5[%c11_189, %c0_190, %c0_191] : memref<16x8x128xf32, #tpu.memory_space<vmem>>, vector<1x8x128xf32>
    %395 = vector.shape_cast %394 : vector<1x8x128xf32> to vector<8x128xf32>
    %c11_192 = arith.constant 11 : index
    %c0_193 = arith.constant 0 : index
    %c0_194 = arith.constant 0 : index
    %396 = vector.load %arg2[%c11_192, %c0_193, %c0_194] : memref<16x2x128xf32, #tpu.memory_space<vmem>>, vector<1x1x128xf32>
    %397 = vector.shape_cast %396 : vector<1x1x128xf32> to vector<1x128xf32>
    %c11_195 = arith.constant 11 : index
    %c0_196 = arith.constant 0 : index
    %c0_197 = arith.constant 0 : index
    %398 = vector.load %arg3[%c11_195, %c0_196, %c0_197] : memref<16x2x128xf32, #tpu.memory_space<vmem>>, vector<1x1x128xf32>
    %399 = vector.shape_cast %398 : vector<1x1x128xf32> to vector<1x128xf32>
    %400 = vector.broadcast %397 : vector<1x128xf32> to vector<8x128xf32>
    %401 = arith.mulf %400, %393 : vector<8x128xf32>
    %402 = vector.broadcast %399 : vector<1x128xf32> to vector<8x128xf32>
    %403 = arith.mulf %402, %395 : vector<8x128xf32>
    %404 = arith.subf %401, %403 : vector<8x128xf32>
    %405 = vector.broadcast %397 : vector<1x128xf32> to vector<8x128xf32>
    %406 = arith.mulf %405, %395 : vector<8x128xf32>
    %407 = vector.broadcast %399 : vector<1x128xf32> to vector<8x128xf32>
    %408 = arith.mulf %407, %393 : vector<8x128xf32>
    %409 = arith.addf %406, %408 : vector<8x128xf32>
    %410 = arith.addf %374, %404 : vector<8x128xf32>
    %411 = arith.addf %375, %409 : vector<8x128xf32>
    %c11_198 = arith.constant 11 : index
    %c1_199 = arith.constant 1 : index
    %c0_200 = arith.constant 0 : index
    %412 = vector.load %arg2[%c11_198, %c1_199, %c0_200] : memref<16x2x128xf32, #tpu.memory_space<vmem>>, vector<1x1x128xf32>
    %413 = vector.shape_cast %412 : vector<1x1x128xf32> to vector<1x128xf32>
    %c11_201 = arith.constant 11 : index
    %c1_202 = arith.constant 1 : index
    %c0_203 = arith.constant 0 : index
    %414 = vector.load %arg3[%c11_201, %c1_202, %c0_203] : memref<16x2x128xf32, #tpu.memory_space<vmem>>, vector<1x1x128xf32>
    %415 = vector.shape_cast %414 : vector<1x1x128xf32> to vector<1x128xf32>
    %416 = vector.broadcast %413 : vector<1x128xf32> to vector<8x128xf32>
    %417 = arith.mulf %416, %393 : vector<8x128xf32>
    %418 = vector.broadcast %415 : vector<1x128xf32> to vector<8x128xf32>
    %419 = arith.mulf %418, %395 : vector<8x128xf32>
    %420 = arith.subf %417, %419 : vector<8x128xf32>
    %421 = vector.broadcast %413 : vector<1x128xf32> to vector<8x128xf32>
    %422 = arith.mulf %421, %395 : vector<8x128xf32>
    %423 = vector.broadcast %415 : vector<1x128xf32> to vector<8x128xf32>
    %424 = arith.mulf %423, %393 : vector<8x128xf32>
    %425 = arith.addf %422, %424 : vector<8x128xf32>
    %426 = arith.addf %390, %420 : vector<8x128xf32>
    %427 = arith.addf %391, %425 : vector<8x128xf32>
    %c12 = arith.constant 12 : index
    %c0_204 = arith.constant 0 : index
    %c0_205 = arith.constant 0 : index
    %428 = vector.load %arg4[%c12, %c0_204, %c0_205] : memref<16x8x128xf32, #tpu.memory_space<vmem>>, vector<1x8x128xf32>
    %429 = vector.shape_cast %428 : vector<1x8x128xf32> to vector<8x128xf32>
    %c12_206 = arith.constant 12 : index
    %c0_207 = arith.constant 0 : index
    %c0_208 = arith.constant 0 : index
    %430 = vector.load %arg5[%c12_206, %c0_207, %c0_208] : memref<16x8x128xf32, #tpu.memory_space<vmem>>, vector<1x8x128xf32>
    %431 = vector.shape_cast %430 : vector<1x8x128xf32> to vector<8x128xf32>
    %c12_209 = arith.constant 12 : index
    %c0_210 = arith.constant 0 : index
    %c0_211 = arith.constant 0 : index
    %432 = vector.load %arg2[%c12_209, %c0_210, %c0_211] : memref<16x2x128xf32, #tpu.memory_space<vmem>>, vector<1x1x128xf32>
    %433 = vector.shape_cast %432 : vector<1x1x128xf32> to vector<1x128xf32>
    %c12_212 = arith.constant 12 : index
    %c0_213 = arith.constant 0 : index
    %c0_214 = arith.constant 0 : index
    %434 = vector.load %arg3[%c12_212, %c0_213, %c0_214] : memref<16x2x128xf32, #tpu.memory_space<vmem>>, vector<1x1x128xf32>
    %435 = vector.shape_cast %434 : vector<1x1x128xf32> to vector<1x128xf32>
    %436 = vector.broadcast %433 : vector<1x128xf32> to vector<8x128xf32>
    %437 = arith.mulf %436, %429 : vector<8x128xf32>
    %438 = vector.broadcast %435 : vector<1x128xf32> to vector<8x128xf32>
    %439 = arith.mulf %438, %431 : vector<8x128xf32>
    %440 = arith.subf %437, %439 : vector<8x128xf32>
    %441 = vector.broadcast %433 : vector<1x128xf32> to vector<8x128xf32>
    %442 = arith.mulf %441, %431 : vector<8x128xf32>
    %443 = vector.broadcast %435 : vector<1x128xf32> to vector<8x128xf32>
    %444 = arith.mulf %443, %429 : vector<8x128xf32>
    %445 = arith.addf %442, %444 : vector<8x128xf32>
    %446 = arith.addf %410, %440 : vector<8x128xf32>
    %447 = arith.addf %411, %445 : vector<8x128xf32>
    %c12_215 = arith.constant 12 : index
    %c1_216 = arith.constant 1 : index
    %c0_217 = arith.constant 0 : index
    %448 = vector.load %arg2[%c12_215, %c1_216, %c0_217] : memref<16x2x128xf32, #tpu.memory_space<vmem>>, vector<1x1x128xf32>
    %449 = vector.shape_cast %448 : vector<1x1x128xf32> to vector<1x128xf32>
    %c12_218 = arith.constant 12 : index
    %c1_219 = arith.constant 1 : index
    %c0_220 = arith.constant 0 : index
    %450 = vector.load %arg3[%c12_218, %c1_219, %c0_220] : memref<16x2x128xf32, #tpu.memory_space<vmem>>, vector<1x1x128xf32>
    %451 = vector.shape_cast %450 : vector<1x1x128xf32> to vector<1x128xf32>
    %452 = vector.broadcast %449 : vector<1x128xf32> to vector<8x128xf32>
    %453 = arith.mulf %452, %429 : vector<8x128xf32>
    %454 = vector.broadcast %451 : vector<1x128xf32> to vector<8x128xf32>
    %455 = arith.mulf %454, %431 : vector<8x128xf32>
    %456 = arith.subf %453, %455 : vector<8x128xf32>
    %457 = vector.broadcast %449 : vector<1x128xf32> to vector<8x128xf32>
    %458 = arith.mulf %457, %431 : vector<8x128xf32>
    %459 = vector.broadcast %451 : vector<1x128xf32> to vector<8x128xf32>
    %460 = arith.mulf %459, %429 : vector<8x128xf32>
    %461 = arith.addf %458, %460 : vector<8x128xf32>
    %462 = arith.addf %426, %456 : vector<8x128xf32>
    %463 = arith.addf %427, %461 : vector<8x128xf32>
    %c13 = arith.constant 13 : index
    %c0_221 = arith.constant 0 : index
    %c0_222 = arith.constant 0 : index
    %464 = vector.load %arg4[%c13, %c0_221, %c0_222] : memref<16x8x128xf32, #tpu.memory_space<vmem>>, vector<1x8x128xf32>
    %465 = vector.shape_cast %464 : vector<1x8x128xf32> to vector<8x128xf32>
    %c13_223 = arith.constant 13 : index
    %c0_224 = arith.constant 0 : index
    %c0_225 = arith.constant 0 : index
    %466 = vector.load %arg5[%c13_223, %c0_224, %c0_225] : memref<16x8x128xf32, #tpu.memory_space<vmem>>, vector<1x8x128xf32>
    %467 = vector.shape_cast %466 : vector<1x8x128xf32> to vector<8x128xf32>
    %c13_226 = arith.constant 13 : index
    %c0_227 = arith.constant 0 : index
    %c0_228 = arith.constant 0 : index
    %468 = vector.load %arg2[%c13_226, %c0_227, %c0_228] : memref<16x2x128xf32, #tpu.memory_space<vmem>>, vector<1x1x128xf32>
    %469 = vector.shape_cast %468 : vector<1x1x128xf32> to vector<1x128xf32>
    %c13_229 = arith.constant 13 : index
    %c0_230 = arith.constant 0 : index
    %c0_231 = arith.constant 0 : index
    %470 = vector.load %arg3[%c13_229, %c0_230, %c0_231] : memref<16x2x128xf32, #tpu.memory_space<vmem>>, vector<1x1x128xf32>
    %471 = vector.shape_cast %470 : vector<1x1x128xf32> to vector<1x128xf32>
    %472 = vector.broadcast %469 : vector<1x128xf32> to vector<8x128xf32>
    %473 = arith.mulf %472, %465 : vector<8x128xf32>
    %474 = vector.broadcast %471 : vector<1x128xf32> to vector<8x128xf32>
    %475 = arith.mulf %474, %467 : vector<8x128xf32>
    %476 = arith.subf %473, %475 : vector<8x128xf32>
    %477 = vector.broadcast %469 : vector<1x128xf32> to vector<8x128xf32>
    %478 = arith.mulf %477, %467 : vector<8x128xf32>
    %479 = vector.broadcast %471 : vector<1x128xf32> to vector<8x128xf32>
    %480 = arith.mulf %479, %465 : vector<8x128xf32>
    %481 = arith.addf %478, %480 : vector<8x128xf32>
    %482 = arith.addf %446, %476 : vector<8x128xf32>
    %483 = arith.addf %447, %481 : vector<8x128xf32>
    %c13_232 = arith.constant 13 : index
    %c1_233 = arith.constant 1 : index
    %c0_234 = arith.constant 0 : index
    %484 = vector.load %arg2[%c13_232, %c1_233, %c0_234] : memref<16x2x128xf32, #tpu.memory_space<vmem>>, vector<1x1x128xf32>
    %485 = vector.shape_cast %484 : vector<1x1x128xf32> to vector<1x128xf32>
    %c13_235 = arith.constant 13 : index
    %c1_236 = arith.constant 1 : index
    %c0_237 = arith.constant 0 : index
    %486 = vector.load %arg3[%c13_235, %c1_236, %c0_237] : memref<16x2x128xf32, #tpu.memory_space<vmem>>, vector<1x1x128xf32>
    %487 = vector.shape_cast %486 : vector<1x1x128xf32> to vector<1x128xf32>
    %488 = vector.broadcast %485 : vector<1x128xf32> to vector<8x128xf32>
    %489 = arith.mulf %488, %465 : vector<8x128xf32>
    %490 = vector.broadcast %487 : vector<1x128xf32> to vector<8x128xf32>
    %491 = arith.mulf %490, %467 : vector<8x128xf32>
    %492 = arith.subf %489, %491 : vector<8x128xf32>
    %493 = vector.broadcast %485 : vector<1x128xf32> to vector<8x128xf32>
    %494 = arith.mulf %493, %467 : vector<8x128xf32>
    %495 = vector.broadcast %487 : vector<1x128xf32> to vector<8x128xf32>
    %496 = arith.mulf %495, %465 : vector<8x128xf32>
    %497 = arith.addf %494, %496 : vector<8x128xf32>
    %498 = arith.addf %462, %492 : vector<8x128xf32>
    %499 = arith.addf %463, %497 : vector<8x128xf32>
    %c14 = arith.constant 14 : index
    %c0_238 = arith.constant 0 : index
    %c0_239 = arith.constant 0 : index
    %500 = vector.load %arg4[%c14, %c0_238, %c0_239] : memref<16x8x128xf32, #tpu.memory_space<vmem>>, vector<1x8x128xf32>
    %501 = vector.shape_cast %500 : vector<1x8x128xf32> to vector<8x128xf32>
    %c14_240 = arith.constant 14 : index
    %c0_241 = arith.constant 0 : index
    %c0_242 = arith.constant 0 : index
    %502 = vector.load %arg5[%c14_240, %c0_241, %c0_242] : memref<16x8x128xf32, #tpu.memory_space<vmem>>, vector<1x8x128xf32>
    %503 = vector.shape_cast %502 : vector<1x8x128xf32> to vector<8x128xf32>
    %c14_243 = arith.constant 14 : index
    %c0_244 = arith.constant 0 : index
    %c0_245 = arith.constant 0 : index
    %504 = vector.load %arg2[%c14_243, %c0_244, %c0_245] : memref<16x2x128xf32, #tpu.memory_space<vmem>>, vector<1x1x128xf32>
    %505 = vector.shape_cast %504 : vector<1x1x128xf32> to vector<1x128xf32>
    %c14_246 = arith.constant 14 : index
    %c0_247 = arith.constant 0 : index
    %c0_248 = arith.constant 0 : index
    %506 = vector.load %arg3[%c14_246, %c0_247, %c0_248] : memref<16x2x128xf32, #tpu.memory_space<vmem>>, vector<1x1x128xf32>
    %507 = vector.shape_cast %506 : vector<1x1x128xf32> to vector<1x128xf32>
    %508 = vector.broadcast %505 : vector<1x128xf32> to vector<8x128xf32>
    %509 = arith.mulf %508, %501 : vector<8x128xf32>
    %510 = vector.broadcast %507 : vector<1x128xf32> to vector<8x128xf32>
    %511 = arith.mulf %510, %503 : vector<8x128xf32>
    %512 = arith.subf %509, %511 : vector<8x128xf32>
    %513 = vector.broadcast %505 : vector<1x128xf32> to vector<8x128xf32>
    %514 = arith.mulf %513, %503 : vector<8x128xf32>
    %515 = vector.broadcast %507 : vector<1x128xf32> to vector<8x128xf32>
    %516 = arith.mulf %515, %501 : vector<8x128xf32>
    %517 = arith.addf %514, %516 : vector<8x128xf32>
    %518 = arith.addf %482, %512 : vector<8x128xf32>
    %519 = arith.addf %483, %517 : vector<8x128xf32>
    %c14_249 = arith.constant 14 : index
    %c1_250 = arith.constant 1 : index
    %c0_251 = arith.constant 0 : index
    %520 = vector.load %arg2[%c14_249, %c1_250, %c0_251] : memref<16x2x128xf32, #tpu.memory_space<vmem>>, vector<1x1x128xf32>
    %521 = vector.shape_cast %520 : vector<1x1x128xf32> to vector<1x128xf32>
    %c14_252 = arith.constant 14 : index
    %c1_253 = arith.constant 1 : index
    %c0_254 = arith.constant 0 : index
    %522 = vector.load %arg3[%c14_252, %c1_253, %c0_254] : memref<16x2x128xf32, #tpu.memory_space<vmem>>, vector<1x1x128xf32>
    %523 = vector.shape_cast %522 : vector<1x1x128xf32> to vector<1x128xf32>
    %524 = vector.broadcast %521 : vector<1x128xf32> to vector<8x128xf32>
    %525 = arith.mulf %524, %501 : vector<8x128xf32>
    %526 = vector.broadcast %523 : vector<1x128xf32> to vector<8x128xf32>
    %527 = arith.mulf %526, %503 : vector<8x128xf32>
    %528 = arith.subf %525, %527 : vector<8x128xf32>
    %529 = vector.broadcast %521 : vector<1x128xf32> to vector<8x128xf32>
    %530 = arith.mulf %529, %503 : vector<8x128xf32>
    %531 = vector.broadcast %523 : vector<1x128xf32> to vector<8x128xf32>
    %532 = arith.mulf %531, %501 : vector<8x128xf32>
    %533 = arith.addf %530, %532 : vector<8x128xf32>
    %534 = arith.addf %498, %528 : vector<8x128xf32>
    %535 = arith.addf %499, %533 : vector<8x128xf32>
    %c15 = arith.constant 15 : index
    %c0_255 = arith.constant 0 : index
    %c0_256 = arith.constant 0 : index
    %536 = vector.load %arg4[%c15, %c0_255, %c0_256] : memref<16x8x128xf32, #tpu.memory_space<vmem>>, vector<1x8x128xf32>
    %537 = vector.shape_cast %536 : vector<1x8x128xf32> to vector<8x128xf32>
    %c15_257 = arith.constant 15 : index
    %c0_258 = arith.constant 0 : index
    %c0_259 = arith.constant 0 : index
    %538 = vector.load %arg5[%c15_257, %c0_258, %c0_259] : memref<16x8x128xf32, #tpu.memory_space<vmem>>, vector<1x8x128xf32>
    %539 = vector.shape_cast %538 : vector<1x8x128xf32> to vector<8x128xf32>
    %c15_260 = arith.constant 15 : index
    %c0_261 = arith.constant 0 : index
    %c0_262 = arith.constant 0 : index
    %540 = vector.load %arg2[%c15_260, %c0_261, %c0_262] : memref<16x2x128xf32, #tpu.memory_space<vmem>>, vector<1x1x128xf32>
    %541 = vector.shape_cast %540 : vector<1x1x128xf32> to vector<1x128xf32>
    %c15_263 = arith.constant 15 : index
    %c0_264 = arith.constant 0 : index
    %c0_265 = arith.constant 0 : index
    %542 = vector.load %arg3[%c15_263, %c0_264, %c0_265] : memref<16x2x128xf32, #tpu.memory_space<vmem>>, vector<1x1x128xf32>
    %543 = vector.shape_cast %542 : vector<1x1x128xf32> to vector<1x128xf32>
    %544 = vector.broadcast %541 : vector<1x128xf32> to vector<8x128xf32>
    %545 = arith.mulf %544, %537 : vector<8x128xf32>
    %546 = vector.broadcast %543 : vector<1x128xf32> to vector<8x128xf32>
    %547 = arith.mulf %546, %539 : vector<8x128xf32>
    %548 = arith.subf %545, %547 : vector<8x128xf32>
    %549 = vector.broadcast %541 : vector<1x128xf32> to vector<8x128xf32>
    %550 = arith.mulf %549, %539 : vector<8x128xf32>
    %551 = vector.broadcast %543 : vector<1x128xf32> to vector<8x128xf32>
    %552 = arith.mulf %551, %537 : vector<8x128xf32>
    %553 = arith.addf %550, %552 : vector<8x128xf32>
    %554 = arith.addf %518, %548 : vector<8x128xf32>
    %555 = arith.addf %519, %553 : vector<8x128xf32>
    %c15_266 = arith.constant 15 : index
    %c1_267 = arith.constant 1 : index
    %c0_268 = arith.constant 0 : index
    %556 = vector.load %arg2[%c15_266, %c1_267, %c0_268] : memref<16x2x128xf32, #tpu.memory_space<vmem>>, vector<1x1x128xf32>
    %557 = vector.shape_cast %556 : vector<1x1x128xf32> to vector<1x128xf32>
    %c15_269 = arith.constant 15 : index
    %c1_270 = arith.constant 1 : index
    %c0_271 = arith.constant 0 : index
    %558 = vector.load %arg3[%c15_269, %c1_270, %c0_271] : memref<16x2x128xf32, #tpu.memory_space<vmem>>, vector<1x1x128xf32>
    %559 = vector.shape_cast %558 : vector<1x1x128xf32> to vector<1x128xf32>
    %560 = vector.broadcast %557 : vector<1x128xf32> to vector<8x128xf32>
    %561 = arith.mulf %560, %537 : vector<8x128xf32>
    %562 = vector.broadcast %559 : vector<1x128xf32> to vector<8x128xf32>
    %563 = arith.mulf %562, %539 : vector<8x128xf32>
    %564 = arith.subf %561, %563 : vector<8x128xf32>
    %565 = vector.broadcast %557 : vector<1x128xf32> to vector<8x128xf32>
    %566 = arith.mulf %565, %539 : vector<8x128xf32>
    %567 = vector.broadcast %559 : vector<1x128xf32> to vector<8x128xf32>
    %568 = arith.mulf %567, %537 : vector<8x128xf32>
    %569 = arith.addf %566, %568 : vector<8x128xf32>
    %570 = arith.addf %534, %564 : vector<8x128xf32>
    %571 = arith.addf %535, %569 : vector<8x128xf32>
    %c0_272 = arith.constant 0 : index
    %c0_273 = arith.constant 0 : index
    %c0_274 = arith.constant 0 : index
    %572 = vector.load %arg6[%c0_272, %c0_273, %c0_274] : memref<2x8x128xf32, #tpu.memory_space<vmem>>, vector<1x8x128xf32>
    %573 = vector.shape_cast %572 : vector<1x8x128xf32> to vector<8x128xf32>
    %574 = vector.shape_cast %554 : vector<8x128xf32> to vector<1x8x128xf32>
    tpu.vector_store %arg6[%c0_272, %c0_273, %c0_274], %574 {strides = array<i32>} : memref<2x8x128xf32, #tpu.memory_space<vmem>>, vector<1x8x128xf32>,
    %c0_275 = arith.constant 0 : index
    %c0_276 = arith.constant 0 : index
    %c0_277 = arith.constant 0 : index
    %575 = vector.load %arg7[%c0_275, %c0_276, %c0_277] : memref<2x8x128xf32, #tpu.memory_space<vmem>>, vector<1x8x128xf32>
    %576 = vector.shape_cast %575 : vector<1x8x128xf32> to vector<8x128xf32>
    %577 = vector.shape_cast %555 : vector<8x128xf32> to vector<1x8x128xf32>
    tpu.vector_store %arg7[%c0_275, %c0_276, %c0_277], %577 {strides = array<i32>} : memref<2x8x128xf32, #tpu.memory_space<vmem>>, vector<1x8x128xf32>,
    %c1_278 = arith.constant 1 : index
    %c0_279 = arith.constant 0 : index
    %c0_280 = arith.constant 0 : index
    %578 = vector.load %arg6[%c1_278, %c0_279, %c0_280] : memref<2x8x128xf32, #tpu.memory_space<vmem>>, vector<1x8x128xf32>
    %579 = vector.shape_cast %578 : vector<1x8x128xf32> to vector<8x128xf32>
    %580 = vector.shape_cast %570 : vector<8x128xf32> to vector<1x8x128xf32>
    tpu.vector_store %arg6[%c1_278, %c0_279, %c0_280], %580 {strides = array<i32>} : memref<2x8x128xf32, #tpu.memory_space<vmem>>, vector<1x8x128xf32>,
    %c1_281 = arith.constant 1 : index
    %c0_282 = arith.constant 0 : index
    %c0_283 = arith.constant 0 : index
    %581 = vector.load %arg7[%c1_281, %c0_282, %c0_283] : memref<2x8x128xf32, #tpu.memory_space<vmem>>, vector<1x8x128xf32>
    %582 = vector.shape_cast %581 : vector<1x8x128xf32> to vector<8x128xf32>
    %583 = vector.shape_cast %571 : vector<8x128xf32> to vector<1x8x128xf32>
    tpu.vector_store %arg7[%c1_281, %c0_282, %c0_283], %583 {strides = array<i32>} : memref<2x8x128xf32, #tpu.memory_space<vmem>>, vector<1x8x128xf32>,
    return
  }
  func.func @transform_0(%arg0: i32, %arg1: i32) -> (i32, i32, i32) {
    %c0_i32 = arith.constant 0 : i32
    %c0_i32_0 = arith.constant 0 : i32
    %c0_i32_1 = arith.constant 0 : i32
    return %c0_i32, %c0_i32_0, %arg1 : i32, i32, i32
  }
  func.func @transform_1(%arg0: i32, %arg1: i32) -> (i32, i32, i32) {
    %c0_i32 = arith.constant 0 : i32
    %c0_i32_0 = arith.constant 0 : i32
    %c0_i32_1 = arith.constant 0 : i32
    return %c0_i32, %c0_i32_0, %arg1 : i32, i32, i32
  }
  func.func @transform_2(%arg0: i32, %arg1: i32) -> (i32, i32, i32) {
    %c0_i32 = arith.constant 0 : i32
    %c0_i32_0 = arith.constant 0 : i32
    return %c0_i32, %arg0, %arg1 : i32, i32, i32
  }
  func.func @transform_3(%arg0: i32, %arg1: i32) -> (i32, i32, i32) {
    %c0_i32 = arith.constant 0 : i32
    %c0_i32_0 = arith.constant 0 : i32
    return %c0_i32, %arg0, %arg1 : i32, i32, i32
  }
  func.func @transform_4(%arg0: i32, %arg1: i32) -> (i32, i32, i32) {
    %c0_i32 = arith.constant 0 : i32
    %c0_i32_0 = arith.constant 0 : i32
    return %c0_i32, %arg0, %arg1 : i32, i32, i32
  }
  func.func @transform_5(%arg0: i32, %arg1: i32) -> (i32, i32, i32) {
    %c0_i32 = arith.constant 0 : i32
    %c0_i32_0 = arith.constant 0 : i32
    return %c0_i32, %arg0, %arg1 : i32, i32, i32
  }
}

module attributes {stable_mosaic.version = 11 : i64} {
  func.func @_layer_pointwise_kernel(%arg0: i32, %arg1: memref<16x256xf32, #tpu.memory_space<vmem>>, %arg2: memref<16x256xf32, #tpu.memory_space<vmem>>, %arg3: memref<16x16xf32, #tpu.memory_space<vmem>>, %arg4: memref<16x1xf32, #tpu.memory_space<vmem>>, %arg5: memref<16x32xf32, #tpu.memory_space<vmem>>, %arg6: memref<16x1xf32, #tpu.memory_space<vmem>>, %arg7: memref<16x256xf32, #tpu.memory_space<vmem>>) attributes {dimension_semantics = [#tpu.dimension_semantics<parallel>], iteration_bounds = array<i64: 2>, scalar_prefetch = 0 : i64, scratch_operands = 0 : i64, tpu.core_type = #tpu.core_type<tc>, window_params = [{transform_indices = @transform_0, window_bounds = array<i64: 16, 256>}, {transform_indices = @transform_1, window_bounds = array<i64: 16, 256>}, {pipeline_mode = #tpu.pipeline_mode<synchronous>, transform_indices = @transform_2, window_bounds = array<i64: 16, 16>}, {pipeline_mode = #tpu.pipeline_mode<synchronous>, transform_indices = @transform_3, window_bounds = array<i64: 16, 1>}, {pipeline_mode = #tpu.pipeline_mode<synchronous>, transform_indices = @transform_4, window_bounds = array<i64: 16, 32>}, {pipeline_mode = #tpu.pipeline_mode<synchronous>, transform_indices = @transform_5, window_bounds = array<i64: 16, 1>}, {transform_indices = @transform_6, window_bounds = array<i64: 16, 256>}]} {
    %c0 = arith.constant 0 : index
    %c0_0 = arith.constant 0 : index
    %0 = vector.load %arg3[%c0, %c0_0] : memref<16x16xf32, #tpu.memory_space<vmem>>, vector<16x16xf32>
    %c0_1 = arith.constant 0 : index
    %c0_2 = arith.constant 0 : index
    %1 = vector.load %arg1[%c0_1, %c0_2] : memref<16x256xf32, #tpu.memory_space<vmem>>, vector<16x256xf32>
    %cst = arith.constant dense<0.000000e+00> : vector<16x256xf32>
    %2 = tpu.matmul %0, %1, %cst {dimension_numbers = #tpu.dot_dimension_numbers<[1], [0], [0], [1], [0, 0, 1, 1], [], []>} : vector<16x16xf32>, vector<16x256xf32>, vector<16x256xf32> -> vector<16x256xf32>
    %c0_3 = arith.constant 0 : index
    %c0_4 = arith.constant 0 : index
    %3 = vector.load %arg4[%c0_3, %c0_4] : memref<16x1xf32, #tpu.memory_space<vmem>>, vector<16x1xf32>
    %4 = vector.broadcast %3 : vector<16x1xf32> to vector<16x256xf32>
    %5 = arith.addf %2, %4 : vector<16x256xf32>
    %cst_5 = arith.constant 5.000000e-01 : f32
    %6 = vector.broadcast %cst_5 : f32 to vector<16x256xf32>
    %7 = arith.mulf %6, %5 : vector<16x256xf32>
    %cst_6 = arith.constant 4.471500e-02 : f32
    %8 = vector.broadcast %cst_6 : f32 to vector<16x256xf32>
    %9 = arith.mulf %8, %5 : vector<16x256xf32>
    %10 = arith.mulf %9, %5 : vector<16x256xf32>
    %11 = arith.mulf %10, %5 : vector<16x256xf32>
    %12 = arith.addf %5, %11 : vector<16x256xf32>
    %cst_7 = arith.constant 0.797884583 : f32
    %13 = vector.broadcast %cst_7 : f32 to vector<16x256xf32>
    %14 = arith.mulf %13, %12 : vector<16x256xf32>
    %15 = math.tanh %14 : vector<16x256xf32>
    %cst_8 = arith.constant 1.000000e+00 : f32
    %16 = vector.broadcast %cst_8 : f32 to vector<16x256xf32>
    %17 = arith.addf %16, %15 : vector<16x256xf32>
    %18 = arith.mulf %7, %17 : vector<16x256xf32>
    %c0_9 = arith.constant 0 : index
    %c0_10 = arith.constant 0 : index
    %19 = vector.load %arg2[%c0_9, %c0_10] : memref<16x256xf32, #tpu.memory_space<vmem>>, vector<16x256xf32>
    %20 = tpu.concatenate %18, %19 in 0 : vector<16x256xf32>, vector<16x256xf32> -> vector<32x256xf32>
    %c0_11 = arith.constant 0 : index
    %c0_12 = arith.constant 0 : index
    %21 = vector.load %arg5[%c0_11, %c0_12] : memref<16x32xf32, #tpu.memory_space<vmem>>, vector<16x32xf32>
    %cst_13 = arith.constant dense<0.000000e+00> : vector<16x256xf32>
    %22 = tpu.matmul %21, %20, %cst_13 {dimension_numbers = #tpu.dot_dimension_numbers<[1], [0], [0], [1], [0, 0, 1, 1], [], []>} : vector<16x32xf32>, vector<32x256xf32>, vector<16x256xf32> -> vector<16x256xf32>
    %c0_14 = arith.constant 0 : index
    %c0_15 = arith.constant 0 : index
    %23 = vector.load %arg6[%c0_14, %c0_15] : memref<16x1xf32, #tpu.memory_space<vmem>>, vector<16x1xf32>
    %24 = vector.broadcast %23 : vector<16x1xf32> to vector<16x256xf32>
    %25 = arith.addf %22, %24 : vector<16x256xf32>
    %cst_16 = arith.constant 5.000000e-01 : f32
    %26 = vector.broadcast %cst_16 : f32 to vector<16x256xf32>
    %27 = arith.mulf %26, %25 : vector<16x256xf32>
    %cst_17 = arith.constant 4.471500e-02 : f32
    %28 = vector.broadcast %cst_17 : f32 to vector<16x256xf32>
    %29 = arith.mulf %28, %25 : vector<16x256xf32>
    %30 = arith.mulf %29, %25 : vector<16x256xf32>
    %31 = arith.mulf %30, %25 : vector<16x256xf32>
    %32 = arith.addf %25, %31 : vector<16x256xf32>
    %cst_18 = arith.constant 0.797884583 : f32
    %33 = vector.broadcast %cst_18 : f32 to vector<16x256xf32>
    %34 = arith.mulf %33, %32 : vector<16x256xf32>
    %35 = math.tanh %34 : vector<16x256xf32>
    %cst_19 = arith.constant 1.000000e+00 : f32
    %36 = vector.broadcast %cst_19 : f32 to vector<16x256xf32>
    %37 = arith.addf %36, %35 : vector<16x256xf32>
    %38 = arith.mulf %27, %37 : vector<16x256xf32>
    %c0_20 = arith.constant 0 : index
    %c0_21 = arith.constant 0 : index
    %39 = vector.load %arg7[%c0_20, %c0_21] : memref<16x256xf32, #tpu.memory_space<vmem>>, vector<16x256xf32>
    tpu.vector_store %arg7[%c0_20, %c0_21], %38 {strides = array<i32>} : memref<16x256xf32, #tpu.memory_space<vmem>>, vector<16x256xf32>,
    return
  }
  func.func @transform_0(%arg0: i32) -> (i32, i32) {
    %c0_i32 = arith.constant 0 : i32
    %c0_i32_0 = arith.constant 0 : i32
    return %c0_i32, %arg0 : i32, i32
  }
  func.func @transform_1(%arg0: i32) -> (i32, i32) {
    %c0_i32 = arith.constant 0 : i32
    %c0_i32_0 = arith.constant 0 : i32
    return %c0_i32, %arg0 : i32, i32
  }
  func.func @transform_2(%arg0: i32) -> (i32, i32) {
    %c0_i32 = arith.constant 0 : i32
    %c0_i32_0 = arith.constant 0 : i32
    %c0_i32_1 = arith.constant 0 : i32
    return %c0_i32, %c0_i32_0 : i32, i32
  }
  func.func @transform_3(%arg0: i32) -> (i32, i32) {
    %c0_i32 = arith.constant 0 : i32
    %c0_i32_0 = arith.constant 0 : i32
    %c0_i32_1 = arith.constant 0 : i32
    return %c0_i32, %c0_i32_0 : i32, i32
  }
  func.func @transform_4(%arg0: i32) -> (i32, i32) {
    %c0_i32 = arith.constant 0 : i32
    %c0_i32_0 = arith.constant 0 : i32
    %c0_i32_1 = arith.constant 0 : i32
    return %c0_i32, %c0_i32_0 : i32, i32
  }
  func.func @transform_5(%arg0: i32) -> (i32, i32) {
    %c0_i32 = arith.constant 0 : i32
    %c0_i32_0 = arith.constant 0 : i32
    %c0_i32_1 = arith.constant 0 : i32
    return %c0_i32, %c0_i32_0 : i32, i32
  }
  func.func @transform_6(%arg0: i32) -> (i32, i32) {
    %c0_i32 = arith.constant 0 : i32
    %c0_i32_0 = arith.constant 0 : i32
    return %c0_i32, %arg0 : i32, i32
  }
}

module attributes {stable_mosaic.version = 11 : i64} {
  func.func @_projection_kernel(%arg0: i32, %arg1: memref<16x256xf32, #tpu.memory_space<vmem>>, %arg2: memref<64x16xf32, #tpu.memory_space<vmem>>, %arg3: memref<64x1xf32, #tpu.memory_space<vmem>>, %arg4: memref<1x64xf32, #tpu.memory_space<vmem>>, %arg5: memref<1x1xf32, #tpu.memory_space<vmem>>, %arg6: memref<1x256xf32, #tpu.memory_space<vmem>>) attributes {dimension_semantics = [#tpu.dimension_semantics<parallel>], iteration_bounds = array<i64: 2>, scalar_prefetch = 0 : i64, scratch_operands = 0 : i64, tpu.core_type = #tpu.core_type<tc>, window_params = [{transform_indices = @transform_0, window_bounds = array<i64: 16, 256>}, {pipeline_mode = #tpu.pipeline_mode<synchronous>, transform_indices = @transform_1, window_bounds = array<i64: 64, 16>}, {pipeline_mode = #tpu.pipeline_mode<synchronous>, transform_indices = @transform_2, window_bounds = array<i64: 64, 1>}, {pipeline_mode = #tpu.pipeline_mode<synchronous>, transform_indices = @transform_3, window_bounds = array<i64: 1, 64>}, {pipeline_mode = #tpu.pipeline_mode<synchronous>, transform_indices = @transform_4, window_bounds = array<i64: 1, 1>}, {transform_indices = @transform_5, window_bounds = array<i64: 1, 256>}]} {
    %c0 = arith.constant 0 : index
    %c0_0 = arith.constant 0 : index
    %0 = vector.load %arg2[%c0, %c0_0] : memref<64x16xf32, #tpu.memory_space<vmem>>, vector<64x16xf32>
    %c0_1 = arith.constant 0 : index
    %c0_2 = arith.constant 0 : index
    %1 = vector.load %arg1[%c0_1, %c0_2] : memref<16x256xf32, #tpu.memory_space<vmem>>, vector<16x256xf32>
    %cst = arith.constant dense<0.000000e+00> : vector<64x256xf32>
    %2 = tpu.matmul %0, %1, %cst {dimension_numbers = #tpu.dot_dimension_numbers<[1], [0], [0], [1], [0, 0, 1, 1], [], []>} : vector<64x16xf32>, vector<16x256xf32>, vector<64x256xf32> -> vector<64x256xf32>
    %c0_3 = arith.constant 0 : index
    %c0_4 = arith.constant 0 : index
    %3 = vector.load %arg3[%c0_3, %c0_4] : memref<64x1xf32, #tpu.memory_space<vmem>>, vector<64x1xf32>
    %4 = vector.broadcast %3 : vector<64x1xf32> to vector<64x256xf32>
    %5 = arith.addf %2, %4 : vector<64x256xf32>
    %cst_5 = arith.constant 5.000000e-01 : f32
    %6 = vector.broadcast %cst_5 : f32 to vector<64x256xf32>
    %7 = arith.mulf %6, %5 : vector<64x256xf32>
    %cst_6 = arith.constant 4.471500e-02 : f32
    %8 = vector.broadcast %cst_6 : f32 to vector<64x256xf32>
    %9 = arith.mulf %8, %5 : vector<64x256xf32>
    %10 = arith.mulf %9, %5 : vector<64x256xf32>
    %11 = arith.mulf %10, %5 : vector<64x256xf32>
    %12 = arith.addf %5, %11 : vector<64x256xf32>
    %cst_7 = arith.constant 0.797884583 : f32
    %13 = vector.broadcast %cst_7 : f32 to vector<64x256xf32>
    %14 = arith.mulf %13, %12 : vector<64x256xf32>
    %15 = math.tanh %14 : vector<64x256xf32>
    %cst_8 = arith.constant 1.000000e+00 : f32
    %16 = vector.broadcast %cst_8 : f32 to vector<64x256xf32>
    %17 = arith.addf %16, %15 : vector<64x256xf32>
    %18 = arith.mulf %7, %17 : vector<64x256xf32>
    %c0_9 = arith.constant 0 : index
    %c0_10 = arith.constant 0 : index
    %19 = vector.load %arg4[%c0_9, %c0_10] : memref<1x64xf32, #tpu.memory_space<vmem>>, vector<1x64xf32>
    %cst_11 = arith.constant dense<0.000000e+00> : vector<1x256xf32>
    %20 = tpu.matmul %19, %18, %cst_11 {dimension_numbers = #tpu.dot_dimension_numbers<[1], [0], [0], [1], [0, 0, 1, 1], [], []>} : vector<1x64xf32>, vector<64x256xf32>, vector<1x256xf32> -> vector<1x256xf32>
    %c0_12 = arith.constant 0 : index
    %c0_13 = arith.constant 0 : index
    %21 = vector.load %arg5[%c0_12, %c0_13] : memref<1x1xf32, #tpu.memory_space<vmem>>, vector<1x1xf32>
    %22 = vector.broadcast %21 : vector<1x1xf32> to vector<1x256xf32>
    %23 = arith.addf %20, %22 : vector<1x256xf32>
    %c0_14 = arith.constant 0 : index
    %c0_15 = arith.constant 0 : index
    %24 = vector.load %arg6[%c0_14, %c0_15] : memref<1x256xf32, #tpu.memory_space<vmem>>, vector<1x256xf32>
    tpu.vector_store %arg6[%c0_14, %c0_15], %23 {strides = array<i32>} : memref<1x256xf32, #tpu.memory_space<vmem>>, vector<1x256xf32>,
    return
  }
  func.func @transform_0(%arg0: i32) -> (i32, i32) {
    %c0_i32 = arith.constant 0 : i32
    %c0_i32_0 = arith.constant 0 : i32
    return %c0_i32, %arg0 : i32, i32
  }
  func.func @transform_1(%arg0: i32) -> (i32, i32) {
    %c0_i32 = arith.constant 0 : i32
    %c0_i32_0 = arith.constant 0 : i32
    %c0_i32_1 = arith.constant 0 : i32
    return %c0_i32, %c0_i32_0 : i32, i32
  }
  func.func @transform_2(%arg0: i32) -> (i32, i32) {
    %c0_i32 = arith.constant 0 : i32
    %c0_i32_0 = arith.constant 0 : i32
    %c0_i32_1 = arith.constant 0 : i32
    return %c0_i32, %c0_i32_0 : i32, i32
  }
  func.func @transform_3(%arg0: i32) -> (i32, i32) {
    %c0_i32 = arith.constant 0 : i32
    %c0_i32_0 = arith.constant 0 : i32
    %c0_i32_1 = arith.constant 0 : i32
    return %c0_i32, %c0_i32_0 : i32, i32
  }
  func.func @transform_4(%arg0: i32) -> (i32, i32) {
    %c0_i32 = arith.constant 0 : i32
    %c0_i32_0 = arith.constant 0 : i32
    %c0_i32_1 = arith.constant 0 : i32
    return %c0_i32, %c0_i32_0 : i32, i32
  }
  func.func @transform_5(%arg0: i32) -> (i32, i32) {
    %c0_i32 = arith.constant 0 : i32
    %c0_i32_0 = arith.constant 0 : i32
    return %c0_i32, %arg0 : i32, i32
  }
}

</mosaic_0001>

<bundles_post_ra>
// kernel: fno_forward.10
= control target key start
LH: loop header
LB: loop body
LE: loop exit
PB: predicated region body
PF: predicated region fallthrough
CT: control target
= control target key end

     0   :  { %s453_s12 = smov 0   ;;  %s455_s13 = smov 0   ;;  %s515_s0 = inlined_call_operand.vmem [shape: f32[3,512], index: 0, kind: input, shape index: {}]   ;;  %s516_s1 = inlined_call_operand.vmem [shape: f32[16,3], index: 1, kind: input, shape index: {}]   ;;  %s517_s2 = inlined_call_operand.vmem [shape: f32[16,1], index: 2, kind: input, shape index: {}]   ;;  %s518_s3 = inlined_call_operand.vmem [shape: f32[16,512], index: 3, kind: output, shape index: {}]  }
   0x1   :  { %s457_s14 = smov 0  }
   0x2 LB: > { %s466_s15 = sadd.s32 4294967295, %s428_s14   ;;  %s468_s16 = sadd.s32 1, %s428_s14   ;;  %s428_s14 = sphi %s457_s14, %s522_s14   ;;  %s424_s13 = sphi %s455_s13, %s521_s13   ;;  %s420_s12 = sphi %s453_s12, %s520_s12  }
   0x3   : > { %s85_s17 = ssub.s32 %s428_s14, %s468_s16  ;;  %s88_s18 = sadd.s32 1, %s424_s13 }
   0x4   : > { %p86_p0 = scmp.eq.s32.totalorder %s85_s17, 0  ;;  %p98_p1 = scmp.ne.s32.totalorder %s424_s13, %s420_s12 }
   0x5   : > { %p99_p2 = scmp.eq.s32.totalorder %s466_s15, 1  ;;  %p361_p3 = scmp.ge.s32.totalorder %s428_s14, 1 }
   0x6   : > { %s476_s19 = scalar_select %p86_p0, %s424_s13, %s88_s18  }
   0x7   : > { %p478_p4 = por %p99_p2, %p98_p1  ;;  %p138_p5 = scmp.lt.s32.totalorder %s428_s14, 3 }
   0x9   : > { %p139_p6 = pnand %p361_p3, %p138_p5 }
   0xa   : > { %v168_v0 = vld [vmem:[%s516_s1] sm:$0xff] (!%p139_p6)  ;;  %v430_v1 = vmov (!%p139_p6), 1   ;;  %v431_v2 = vmov (!%p139_p6), 0   ;;  %v169_v3 = vld [vmem:[%s516_s1 + $0x8] sm:$0xff] (!%p139_p6)  ;;  %v432_v4 = vmov (!%p139_p6), 2   ;;  %s363_s29 = sshll.u32 (!%p139_p6), %s466_s15, 1  ;;  %v182_v7 = vlaneseq (!%p139_p6) }
   0xb   : > { %142 = sbr.rel (%p139_p6) target bundleno = 166 (0xa6), region = 32  ;;  %401 = vset.pattern.permute.xlu1 (!%p139_p6), %v430_v1  ;;  %400 = vset.pattern.permute.xlu0 (!%p139_p6), %v431_v2  ;;  %v254_v5 = vld [vmem:[%s517_s2] sm:$0xff] (!%p139_p6)  ;;  %v255_v6 = vld [vmem:[%s517_s2 + $0x8] sm:$0xff] (!%p139_p6)  ;;  %p162_p7 = scmp.lt.s32.totalorder (!%p139_p6), %s363_s29, 3 }
   0xc   : > { %199 = vperm.xlu1 (!%p139_p6), %401, %v168_v0   ;;  %173 = vperm.xlu0 (!%p139_p6), %400, %v168_v0   ;;  %v183_v8 = vshrl.u32 (!%p139_p6), %v182_v7, 7  ;;  %s158_s7 = sand.u32 (!%p139_p6), 1, %s420_s12  }
   0xd   : > { %s362_s8 = sshll.u32 (!%p139_p6), %s158_s7, 5 }
   0xe   : > { %v184_v9 = vsub.s32 (!%p139_p6), 0, %v183_v8  ;;  %v188_v10 = vsub.s32 (!%p139_p6), 1, %v183_v8  ;;  %s160_s9 = scalar_lea.vmem (!%p139_p6), [#allocation2], %s362_s8 }
  0x10   : > { %203 = vperm.xlu1 (!%p139_p6), %401, %v169_v3   ;;  %178 = vperm.xlu0 (!%p139_p6), %400, %v169_v3  }
  0x12   : > { %s524_s29 = smov (!%p162_p7, %s363_s29), 3  ;;  %s372_s10 = sshll.u32 (%p478_p4), %s466_s15, 4 }
  0x13   : > { %s364_s30 = sshll.u32 %s524_s29, 2  ;;  %s283_s14 = scalar_lea.vmem (%p478_p4), %s518_s3, %s372_s10 }
  0x14   : > { %403 = vset.pattern.permute.xlu1 %v432_v4  ;;  %402 = vset.pattern.permute.xlu0 %v432_v4  ;;  %s165_s6 = scalar_lea.vmem %s515_s0, %s364_s30 }
  0x15   : > { %232 = vperm.xlu1 %403, %v169_v3   ;;  %228 = vperm.xlu0 %402, %v168_v0   ;;  %v365_v11 = vld [vmem:[%s165_s6 + $0x1] ss:$4 sm:$0x3]  ;;  %v170_v12 = vld [vmem:[%s165_s6] ss:$4 sm:$0x3] }
  0x16   : > { %v210_v14 = vrot.slane %v365_v11, %v184_v9  ;;  %v214_v15 = vrot.slane %v365_v11, %v188_v10  ;;  %v185_v17 = vrot.slane %v170_v12, %v184_v9  ;;  %v189_v18 = vrot.slane %v170_v12, %v188_v10  ;;  %v366_v19 = vld [vmem:[%s165_s6 + $0x2] ss:$4 sm:$0x3] }
  0x17   : > { %v239_v30 = vrot.slane %v366_v19, %v184_v9  ;;  %v243_v31 = vrot.slane %v366_v19, %v188_v10 }
  0x19   : > { %404 = vset.pattern.permute.xlu1 %v431_v2  ;;  %405 = vset.pattern.permute.xlu0 %v431_v2 }
  0x1a   : > { %258 = vperm.xlu1 %404, %v254_v5   ;;  %263 = vperm.xlu0 %405, %v255_v6  }
  0x8b   : > { %v200_v13 = vpop.permute.xlu1 %199  ;;  %v174_v16 = vpop.permute.xlu0 %173 }
  0x8c   : > { %v217_v20 = vmul.f32 %v210_v14, %v200_v13  ;;  %v218_v21 = vmul.f32 %v214_v15, %v200_v13  ;;  %v192_v22 = vmul.f32 %v185_v17, %v174_v16  ;;  %v193_v23 = vmul.f32 %v189_v18, %v174_v16 }
  0x8e   : > { %v221_v32 = vadd.f32 %v217_v20, %v192_v22  ;;  %v222_v33 = vadd.f32 %v218_v21, %v193_v23 }
  0x8f   : > { %v204_v24 = vpop.permute.xlu1 %203  ;;  %v179_v25 = vpop.permute.xlu0 %178 }
  0x90   : > { %v219_v26 = vmul.f32 %v210_v14, %v204_v24  ;;  %v220_v27 = vmul.f32 %v214_v15, %v204_v24  ;;  %v194_v28 = vmul.f32 %v185_v17, %v179_v25  ;;  %v195_v29 = vmul.f32 %v189_v18, %v179_v25 }
  0x92   : > { %v223_v34 = vadd.f32 %v219_v26, %v194_v28  ;;  %v224_v35 = vadd.f32 %v220_v27, %v195_v29 }
  0x94   : > { %v233_v36 = vpop.permute.xlu1 %232  ;;  %v229_v37 = vpop.permute.xlu0 %228 }
  0x95   : > { %v248_v38 = vmul.f32 %v239_v30, %v233_v36  ;;  %v249_v39 = vmul.f32 %v243_v31, %v233_v36  ;;  %v246_v40 = vmul.f32 %v239_v30, %v229_v37  ;;  %v247_v41 = vmul.f32 %v243_v31, %v229_v37 }
  0x97   : > { %v250_v42 = vadd.f32 %v246_v40, %v221_v32  ;;  %v251_v43 = vadd.f32 %v247_v41, %v222_v33  ;;  %v252_v44 = vadd.f32 %v248_v38, %v223_v34  ;;  %v253_v45 = vadd.f32 %v249_v39, %v224_v35  ;;  %280 = sbr.rel (!%p478_p4) target bundleno = 166 (0xa6), region = 36 }
  0x99   : > { %v259_v46 = vpop.permute.xlu1 %258  ;;  %v264_v47 = vpop.permute.xlu0 %263 }
  0x9a   : > { %v266_v48 = vadd.f32 %v259_v46, %v250_v42  ;;  %v267_v49 = vadd.f32 %v259_v46, %v251_v43  ;;  %v268_v50 = vadd.f32 %v264_v47, %v252_v44  ;;  %v269_v51 = vadd.f32 %v264_v47, %v253_v45 }
  0x9c   : > { %270 = vst [vmem:[%s160_s9] sm:$0xff] %v266_v48  ;;  %271 = vst [vmem:[%s160_s9 + $0x8] sm:$0xff] %v267_v49 }
  0x9d   : > { %272 = vst [vmem:[%s160_s9 + $0x10] sm:$0xff] %v268_v50  ;;  %273 = vst [vmem:[%s160_s9 + $0x18] sm:$0xff] %v269_v51 }
  0xa3   : > { %v296_v52 = vld [vmem:[%s160_s9] sm:$0xff]  ;;  %v298_v53 = vld [vmem:[%s160_s9 + $0x8] sm:$0xff] }
  0xa4   : > { %v300_v54 = vld [vmem:[%s160_s9 + $0x10] sm:$0xff]  ;;  %v302_v55 = vld [vmem:[%s160_s9 + $0x18] sm:$0xff]  ;;  %297 = vst [vmem:[%s283_s14] sm:$0xff] %v296_v52  ;;  %299 = vst [vmem:[%s283_s14 + $0x8] sm:$0xff] %v298_v53 }
  0xa5   : > { %301 = vst [vmem:[%s283_s14 + $0x20] sm:$0xff] %v300_v54  ;;  %303 = vst [vmem:[%s283_s14 + $0x28] sm:$0xff] %v302_v55 }
  0xa6 PF: > { %p10_p8 = scmp.ge.s32.totalorder %s468_s16, 4   ;;  %s520_s12 = smov %s424_s13 }
  0xa7   : > { %s521_s13 = smov %s476_s19  ;;  %s522_s14 = smov %s468_s16 }
  0xa8   :  { %12 = sbr.rel (!%p10_p8) target bundleno = 2 (0x2), region = 87 }

// kernel: fno_forward.11
= control target key start
LH: loop header
LB: loop body
LE: loop exit
PB: predicated region body
PF: predicated region fallthrough
CT: control target
= control target key end

     0   :  { %s1684_s18 = smov 0   ;;  %s1686_s19 = smov 0   ;;  %s2043_s0 = inlined_call_operand.vmem [shape: f32[16,2,128], index: 0, kind: input, shape index: {}]   ;;  %s2044_s1 = inlined_call_operand.vmem [shape: f32[16,2,128], index: 1, kind: input, shape index: {}]   ;;  %s2045_s2 = inlined_call_operand.vmem [shape: f32[16,16,128], index: 2, kind: input, shape index: {}]   ;;  %s2046_s3 = inlined_call_operand.vmem [shape: f32[16,16,128], index: 3, kind: input, shape index: {}]   ;;  %s2047_s4 = inlined_call_operand.vmem [shape: f32[2,16,128], index: 4, kind: output, shape index: {0}]   ;;  %s2048_s5 = inlined_call_operand.vmem [shape: f32[2,16,128], index: 5, kind: output, shape index: {1}]  }
   0x1   :  { %s1688_s20 = smov 0   ;;  %s1690_s21 = smov 0  }
   0x2   :  { %s1692_s22 = smov 0  }
   0x3 LB: > { %s28_s23 = sadd.s32 1, %s1648_s21  ;;  %s1397_s24 = sadd.s32 4294967295, %s1652_s22   ;;  %s1652_s22 = sphi %s1692_s22, %s16_s22   ;;  %s1648_s21 = sphi %s1690_s21, %s2054_s21   ;;  %s1644_s20 = sphi %s1688_s20, %s2053_s20   ;;  %s1640_s19 = sphi %s1686_s19, %s2052_s19   ;;  %s1636_s18 = sphi %s1684_s18, %s2051_s18  }
   0x4   : > { %p30_p0 = scmp.ge.s32.totalorder %s28_s23, 2  ;;  %p96_p1 = scmp.ne.s32.totalorder %s1640_s19, %s1636_s18 }
   0x5   : > { %p97_p2 = scmp.eq.s32.totalorder %s1652_s22, 0  ;;  %p156_p4 = scmp.eq.s32.totalorder %s1397_s24, 1 }
   0x6   : > { %s2056_s23 = smov (%p30_p0, %s28_s23), 0  ;;  %s89_s27 = sadd.s32 1, %s1640_s19 }
   0x7   : > { %p1716_p3 = por %p97_p2, %p96_p1  ;;  %s84_s26 = ssub.s32 %s1648_s21, %s2056_s23 }
   0x8   : > { %p87_p5 = scmp.eq.s32.totalorder %s84_s26, 0  ;;  %p1723_p6 = por %p156_p4, %p96_p1 }
   0x9   : > { %p1402_p7 = scmp.ge.s32.totalorder %s1652_s22, 2 }
   0xa   : > { %s1728_s29 = scalar_select %p87_p5, %s1640_s19, %s89_s27  }
   0xb   : > { %220 = sbr.rel (%p1402_p7) target bundleno = 42 (0x2a), region = 24 }
  0x12   : > { %223 = sbr.rel (!%p1716_p3) target bundleno = 30 (0x1e), region = 28  ;;  %s225_s30 = sand.u32 (%p1716_p3), 1, %s1640_s19  }
  0x13   : > { %s1404_s6 = sshll.u32 (%p1716_p3), %s1648_s21, 3  ;;  %s1403_s7 = sshll.u32 (%p1716_p3), %s225_s30, 7 }
  0x14   : > { %s1738_s10 = scalar_lea.vmem (%p1716_p3), %s2045_s2, %s1404_s6  ;;  %s227_s11 = scalar_lea.vmem (%p1716_p3), [#allocation2], %s1403_s7 }
  0x15   : > { %v288_v0 = vld [vmem:[%s1738_s10] sm:$0xff] (%p1716_p3)  ;;  %v290_v1 = vld [vmem:[%s1738_s10 + $0x10] sm:$0xff] (%p1716_p3) }
  0x16   : > { %v292_v2 = vld [vmem:[%s1738_s10 + $0x20] sm:$0xff] (%p1716_p3)  ;;  %289 = vst [vmem:[%s227_s11] sm:$0xff] (%p1716_p3), %v288_v0  ;;  %291 = vst [vmem:[%s227_s11 + $0x8] sm:$0xff] (%p1716_p3), %v290_v1  ;;  %v294_v3 = vld [vmem:[%s1738_s10 + $0x30] sm:$0xff] (%p1716_p3) }
  0x17   : > { %293 = vst [vmem:[%s227_s11 + $0x10] sm:$0xff] (%p1716_p3), %v292_v2  ;;  %v296_v4 = vld [vmem:[%s1738_s10 + $0x40] sm:$0xff] (%p1716_p3)  ;;  %v298_v5 = vld [vmem:[%s1738_s10 + $0x50] sm:$0xff] (%p1716_p3)  ;;  %295 = vst [vmem:[%s227_s11 + $0x18] sm:$0xff] (%p1716_p3), %v294_v3 }
  0x18   : > { %297 = vst [vmem:[%s227_s11 + $0x20] sm:$0xff] (%p1716_p3), %v296_v4  ;;  %299 = vst [vmem:[%s227_s11 + $0x28] sm:$0xff] (%p1716_p3), %v298_v5  ;;  %v300_v6 = vld [vmem:[%s1738_s10 + $0x60] sm:$0xff] (%p1716_p3)  ;;  %v302_v7 = vld [vmem:[%s1738_s10 + $0x70] sm:$0xff] (%p1716_p3) }
  0x19   : > { %v304_v8 = vld [vmem:[%s1738_s10 + $0x80] sm:$0xff]  ;;  %301 = vst [vmem:[%s227_s11 + $0x30] sm:$0xff] %v300_v6  ;;  %303 = vst [vmem:[%s227_s11 + $0x38] sm:$0xff] %v302_v7  ;;  %v306_v9 = vld [vmem:[%s1738_s10 + $0x90] sm:$0xff] }
  0x1a   : > { %305 = vst [vmem:[%s227_s11 + $0x40] sm:$0xff] %v304_v8  ;;  %v308_v10 = vld [vmem:[%s1738_s10 + $0xa0] sm:$0xff]  ;;  %v310_v11 = vld [vmem:[%s1738_s10 + $0xb0] sm:$0xff]  ;;  %307 = vst [vmem:[%s227_s11 + $0x48] sm:$0xff] %v306_v9 }
  0x1b   : > { %309 = vst [vmem:[%s227_s11 + $0x50] sm:$0xff] %v308_v10  ;;  %311 = vst [vmem:[%s227_s11 + $0x58] sm:$0xff] %v310_v11  ;;  %v312_v12 = vld [vmem:[%s1738_s10 + $0xc0] sm:$0xff]  ;;  %v314_v13 = vld [vmem:[%s1738_s10 + $0xd0] sm:$0xff] }
  0x1c   : > { %v316_v14 = vld [vmem:[%s1738_s10 + $0xe0] sm:$0xff]  ;;  %313 = vst [vmem:[%s227_s11 + $0x60] sm:$0xff] %v312_v12  ;;  %315 = vst [vmem:[%s227_s11 + $0x68] sm:$0xff] %v314_v13  ;;  %v318_v15 = vld [vmem:[%s1738_s10 + $0xf0] sm:$0xff] }
  0x1d   : > { %317 = vst [vmem:[%s227_s11 + $0x70] sm:$0xff] %v316_v14  ;;  %319 = vst [vmem:[%s227_s11 + $0x78] sm:$0xff] %v318_v15 }
  0x1e PF: > { %325 = sbr.rel (!%p1716_p3) target bundleno = 42 (0x2a), region = 66  ;;  %s327_s12 = sand.u32 (%p1716_p3), 1, %s1640_s19  }
  0x1f   : > { %s1406_s13 = sshll.u32 (%p1716_p3), %s1648_s21, 3  ;;  %s1405_s14 = sshll.u32 (%p1716_p3), %s327_s12, 7 }
  0x20   : > { %s1763_s17 = scalar_lea.vmem (%p1716_p3), %s2046_s3, %s1406_s13  ;;  %s329_s24 = scalar_lea.vmem (%p1716_p3), [#allocation3], %s1405_s14 }
  0x21   : > { %v390_v16 = vld [vmem:[%s1763_s17] sm:$0xff] (%p1716_p3)  ;;  %v392_v17 = vld [vmem:[%s1763_s17 + $0x10] sm:$0xff] (%p1716_p3) }
  0x22   : > { %v394_v18 = vld [vmem:[%s1763_s17 + $0x20] sm:$0xff] (%p1716_p3)  ;;  %391 = vst [vmem:[%s329_s24] sm:$0xff] (%p1716_p3), %v390_v16  ;;  %393 = vst [vmem:[%s329_s24 + $0x8] sm:$0xff] (%p1716_p3), %v392_v17  ;;  %v396_v19 = vld [vmem:[%s1763_s17 + $0x30] sm:$0xff] (%p1716_p3) }
  0x23   : > { %395 = vst [vmem:[%s329_s24 + $0x10] sm:$0xff] (%p1716_p3), %v394_v18  ;;  %v398_v20 = vld [vmem:[%s1763_s17 + $0x40] sm:$0xff] (%p1716_p3)  ;;  %v400_v21 = vld [vmem:[%s1763_s17 + $0x50] sm:$0xff] (%p1716_p3)  ;;  %397 = vst [vmem:[%s329_s24 + $0x18] sm:$0xff] (%p1716_p3), %v396_v19 }
  0x24   : > { %399 = vst [vmem:[%s329_s24 + $0x20] sm:$0xff] (%p1716_p3), %v398_v20  ;;  %401 = vst [vmem:[%s329_s24 + $0x28] sm:$0xff] (%p1716_p3), %v400_v21  ;;  %v402_v22 = vld [vmem:[%s1763_s17 + $0x60] sm:$0xff] (%p1716_p3)  ;;  %v404_v23 = vld [vmem:[%s1763_s17 + $0x70] sm:$0xff] (%p1716_p3) }
  0x25   : > { %v406_v24 = vld [vmem:[%s1763_s17 + $0x80] sm:$0xff]  ;;  %403 = vst [vmem:[%s329_s24 + $0x30] sm:$0xff] %v402_v22  ;;  %405 = vst [vmem:[%s329_s24 + $0x38] sm:$0xff] %v404_v23  ;;  %v408_v25 = vld [vmem:[%s1763_s17 + $0x90] sm:$0xff] }
  0x26   : > { %407 = vst [vmem:[%s329_s24 + $0x40] sm:$0xff] %v406_v24  ;;  %v410_v26 = vld [vmem:[%s1763_s17 + $0xa0] sm:$0xff]  ;;  %v412_v27 = vld [vmem:[%s1763_s17 + $0xb0] sm:$0xff]  ;;  %409 = vst [vmem:[%s329_s24 + $0x48] sm:$0xff] %v408_v25 }
  0x27   : > { %411 = vst [vmem:[%s329_s24 + $0x50] sm:$0xff] %v410_v26  ;;  %413 = vst [vmem:[%s329_s24 + $0x58] sm:$0xff] %v412_v27  ;;  %v414_v28 = vld [vmem:[%s1763_s17 + $0xc0] sm:$0xff]  ;;  %v416_v29 = vld [vmem:[%s1763_s17 + $0xd0] sm:$0xff] }
  0x28   : > { %v418_v30 = vld [vmem:[%s1763_s17 + $0xe0] sm:$0xff]  ;;  %415 = vst [vmem:[%s329_s24 + $0x60] sm:$0xff] %v414_v28  ;;  %417 = vst [vmem:[%s329_s24 + $0x68] sm:$0xff] %v416_v29  ;;  %v420_v31 = vld [vmem:[%s1763_s17 + $0xf0] sm:$0xff] }
  0x29   : > { %419 = vst [vmem:[%s329_s24 + $0x70] sm:$0xff] %v418_v30  ;;  %421 = vst [vmem:[%s329_s24 + $0x78] sm:$0xff] %v420_v31 }
  0x2a PF: > { %p1407_p8 = scmp.ge.s32.totalorder %s1652_s22, 1  ;;  %p426_p9 = scmp.lt.s32.totalorder %s1652_s22, 3 }
  0x2c   : > { %p427_p10 = pnand %p1407_p8, %p426_p9 }
  0x2d   : > { %s433_s25 = sand.u32 (!%p427_p10), 1, %s1636_s18   ;;  %v1412_v32 = vld [vmem:[%s2043_s0] ss:$0 sm:$0xff] (!%p427_p10)  ;;  %v1414_v34 = vld [vmem:[%s2043_s0 + $0x1] ss:$0 sm:$0xff] (!%p427_p10) }
  0x2e   : > { %430 = sbr.rel (%p427_p10) target bundleno = 131 (0x83), region = 104  ;;  %v1413_v33 = vld [vmem:[%s2044_s1] ss:$0 sm:$0xff] (!%p427_p10)  ;;  %s1408_s7 = sshll.u32 (!%p427_p10), %s433_s25, 7  ;;  %v1415_v35 = vld [vmem:[%s2044_s1 + $0x1] ss:$0 sm:$0xff] (!%p427_p10) }
  0x2f   : > { %v1420_v36 = vld [vmem:[%s2043_s0 + $0x2] ss:$0 sm:$0xff] (!%p427_p10)  ;;  %s1804_s16 = scalar_lea.vmem (!%p427_p10), [#allocation2], %s1408_s7  ;;  %s1807_s17 = scalar_lea.vmem (!%p427_p10), [#allocation3], %s1408_s7  ;;  %v1424_v50 = vld [vmem:[%s2043_s0 + $0x3] ss:$0 sm:$0xff] (!%p427_p10) }
  0x30   : > { %v1421_v37 = vld [vmem:[%s2044_s1 + $0x2] ss:$0 sm:$0xff] (!%p427_p10)  ;;  %v1416_v40 = vld [vmem:[%s1804_s16 + $0x8] sm:$0xff] (!%p427_p10)  ;;  %v1425_v51 = vld [vmem:[%s2044_s1 + $0x3] ss:$0 sm:$0xff] (!%p427_p10) }
  0x31   : > { %v490_v38 = vld [vmem:[%s1804_s16] sm:$0xff] (!%p427_p10)  ;;  %v1417_v45 = vld [vmem:[%s1807_s17 + $0x8] sm:$0xff] (!%p427_p10)  ;;  %v1426_v52 = vld [vmem:[%s1804_s16 + $0x10] sm:$0xff] (!%p427_p10)  ;;  %v536_v55 = vmul.f32 (!%p427_p10), %v1420_v36, %v1416_v40  ;;  %v544_v63 = vmul.f32 (!%p427_p10), %v1421_v37, %v1416_v40  ;;  %v554_v1 = vmul.f32 (!%p427_p10), %v1424_v50, %v1416_v40  ;;  %v562_v6 = vmul.f32 (!%p427_p10), %v1425_v51, %v1416_v40 }
  0x32   : > { %v491_v39 = vld [vmem:[%s1807_s17] sm:$0xff] (!%p427_p10)  ;;  %v498_v41 = vmul.f32 (!%p427_p10), %v1412_v32, %v490_v38  ;;  %v506_v44 = vmul.f32 (!%p427_p10), %v1413_v33, %v490_v38  ;;  %v514_v46 = vmul.f32 (!%p427_p10), %v1414_v34, %v490_v38  ;;  %v522_v49 = vmul.f32 (!%p427_p10), %v1415_v35, %v490_v38  ;;  %v1427_v57 = vld [vmem:[%s1807_s17 + $0x10] sm:$0xff] (!%p427_p10)  ;;  %v1436_v14 = vld [vmem:[%s1804_s16 + $0x18] sm:$0xff] (!%p427_p10) }
  0x33   : > { %v503_v42 = vmul.f32 (!%p427_p10), %v1413_v33, %v491_v39  ;;  %v505_v43 = vmul.f32 (!%p427_p10), %v1412_v32, %v491_v39  ;;  %v519_v47 = vmul.f32 (!%p427_p10), %v1415_v35, %v491_v39  ;;  %v521_v48 = vmul.f32 (!%p427_p10), %v1414_v34, %v491_v39  ;;  %v1430_v58 = vld [vmem:[%s2043_s0 + $0x4] ss:$0 sm:$0xff] (!%p427_p10)  ;;  %v1434_v4 = vld [vmem:[%s2043_s0 + $0x5] ss:$0 sm:$0xff] (!%p427_p10)  ;;  %v1440_v15 = vld [vmem:[%s2043_s0 + $0x6] ss:$0 sm:$0xff] (!%p427_p10) }
  0x34   : > { %v541_v56 = vmul.f32 (!%p427_p10), %v1421_v37, %v1417_v45  ;;  %v1431_v59 = vld [vmem:[%s2044_s1 + $0x4] ss:$0 sm:$0xff] (!%p427_p10)  ;;  %v543_v62 = vmul.f32 (!%p427_p10), %v1420_v36, %v1417_v45  ;;  %v559_v2 = vmul.f32 (!%p427_p10), %v1425_v51, %v1417_v45  ;;  %v561_v3 = vmul.f32 (!%p427_p10), %v1424_v50, %v1417_v45  ;;  %v1435_v9 = vld [vmem:[%s2044_s1 + $0x5] ss:$0 sm:$0xff] (!%p427_p10)  ;;  %v1437_v20 = vld [vmem:[%s1807_s17 + $0x18] sm:$0xff] (!%p427_p10) }
  0x35   : > { %v504_v53 = vsub.f32 %v498_v41, %v503_v42  ;;  %v507_v54 = vadd.f32 %v506_v44, %v505_v43  ;;  %v520_v60 = vsub.f32 %v514_v46, %v519_v47  ;;  %v523_v61 = vadd.f32 %v522_v49, %v521_v48  ;;  %v1441_v21 = vld [vmem:[%s2044_s1 + $0x6] ss:$0 sm:$0xff]  ;;  %v1444_v26 = vld [vmem:[%s2043_s0 + $0x7] ss:$0 sm:$0xff]  ;;  %v1450_v37 = vld [vmem:[%s2043_s0 + $0x8] ss:$0 sm:$0xff] }
  0x36   : > { %v542_v0 = vsub.f32 %v536_v55, %v541_v56  ;;  %v545_v5 = vadd.f32 %v544_v63, %v543_v62  ;;  %v578_v7 = vmul.f32 %v1430_v58, %v1426_v52  ;;  %v583_v8 = vmul.f32 %v1431_v59, %v1427_v57  ;;  %v1445_v27 = vld [vmem:[%s2044_s1 + $0x7] ss:$0 sm:$0xff]  ;;  %v1451_v43 = vld [vmem:[%s2044_s1 + $0x8] ss:$0 sm:$0xff]  ;;  %v1454_v48 = vld [vmem:[%s2043_s0 + $0x9] ss:$0 sm:$0xff] }
  0x37   : > { %v560_v11 = vsub.f32 %v554_v1, %v559_v2  ;;  %v585_v12 = vmul.f32 %v1430_v58, %v1427_v57  ;;  %v586_v13 = vmul.f32 %v1431_v59, %v1426_v52  ;;  %v563_v17 = vadd.f32 %v562_v6, %v561_v3  ;;  %v1446_v36 = vld [vmem:[%s1804_s16 + $0x20] sm:$0xff]  ;;  %v1457_v59 = vld [vmem:[%s1807_s17 + $0x28] sm:$0xff]  ;;  %s1570_s30 = sshll.u32 (%p1723_p6), %s1644_s20, 3 }
  0x38   : > { %v546_v10 = vadd.f32 %v542_v0, %v504_v53  ;;  %v547_v16 = vadd.f32 %v545_v5, %v507_v54  ;;  %v584_v18 = vsub.f32 %v578_v7, %v583_v8  ;;  %v596_v19 = vmul.f32 %v1434_v4, %v1426_v52  ;;  %v1447_v42 = vld [vmem:[%s1807_s17 + $0x20] sm:$0xff]  ;;  %v1455_v53 = vld [vmem:[%s2044_s1 + $0x9] ss:$0 sm:$0xff]  ;;  %v1464_v6 = vld [vmem:[%s2043_s0 + $0xb] ss:$0 sm:$0xff]  ;;  %s1173_s8 = scalar_lea.vmem (%p1723_p6), %s2047_s4, %s1570_s30 }
  0x39   : > { %v564_v22 = vadd.f32 %v560_v11, %v520_v60  ;;  %v587_v23 = vadd.f32 %v586_v13, %v585_v12  ;;  %v601_v24 = vmul.f32 %v1435_v9, %v1427_v57  ;;  %v603_v25 = vmul.f32 %v1434_v4, %v1427_v57  ;;  %v1456_v54 = vld [vmem:[%s1804_s16 + $0x28] sm:$0xff] }
  0x3a   : > { %v565_v28 = vadd.f32 %v563_v17, %v523_v61  ;;  %v588_v29 = vadd.f32 %v584_v18, %v546_v10  ;;  %v604_v30 = vmul.f32 %v1435_v9, %v1426_v52  ;;  %v620_v31 = vmul.f32 %v1440_v15, %v1436_v14  ;;  %v1460_v60 = vld [vmem:[%s2043_s0 + $0xa] ss:$0 sm:$0xff]  ;;  %v1465_v11 = vld [vmem:[%s2044_s1 + $0xb] ss:$0 sm:$0xff]  ;;  %v1470_v17 = vld [vmem:[%s2043_s0 + $0xc] ss:$0 sm:$0xff] }
  0x3b   : > { %v589_v32 = vadd.f32 %v587_v23, %v547_v16  ;;  %v602_v33 = vsub.f32 %v596_v19, %v601_v24  ;;  %v625_v34 = vmul.f32 %v1441_v21, %v1437_v20  ;;  %v627_v35 = vmul.f32 %v1440_v15, %v1437_v20  ;;  %v1461_v61 = vld [vmem:[%s2044_s1 + $0xa] ss:$0 sm:$0xff]  ;;  %v1466_v16 = vld [vmem:[%s1804_s16 + $0x30] sm:$0xff]  ;;  %v1471_v23 = vld [vmem:[%s2044_s1 + $0xc] ss:$0 sm:$0xff] }
  0x3c   : > { %v605_v38 = vadd.f32 %v604_v30, %v603_v25  ;;  %v628_v39 = vmul.f32 %v1441_v21, %v1436_v14  ;;  %v638_v40 = vmul.f32 %v1444_v26, %v1436_v14  ;;  %v643_v41 = vmul.f32 %v1445_v27, %v1437_v20 }
  0x3d   : > { %v606_v44 = vadd.f32 %v602_v33, %v564_v22  ;;  %v626_v45 = vsub.f32 %v620_v31, %v625_v34  ;;  %v645_v46 = vmul.f32 %v1444_v26, %v1437_v20  ;;  %v646_v47 = vmul.f32 %v1445_v27, %v1436_v14  ;;  %v1467_v22 = vld [vmem:[%s1807_s17 + $0x30] sm:$0xff] }
  0x3e   : > { %v607_v49 = vadd.f32 %v605_v38, %v565_v28  ;;  %v629_v50 = vadd.f32 %v628_v39, %v627_v35  ;;  %v644_v51 = vsub.f32 %v638_v40, %v643_v41  ;;  %v662_v52 = vmul.f32 %v1450_v37, %v1446_v36  ;;  %v1474_v28 = vld [vmem:[%s2043_s0 + $0xd] ss:$0 sm:$0xff]  ;;  %v1476_v38 = vld [vmem:[%s1804_s16 + $0x38] sm:$0xff]  ;;  %v1480_v39 = vld [vmem:[%s2043_s0 + $0xe] ss:$0 sm:$0xff] }
  0x3f   : > { %v630_v55 = vadd.f32 %v626_v45, %v588_v29  ;;  %v647_v56 = vadd.f32 %v646_v47, %v645_v46  ;;  %v667_v57 = vmul.f32 %v1451_v43, %v1447_v42  ;;  %v669_v58 = vmul.f32 %v1450_v37, %v1447_v42  ;;  %v1475_v29 = vld [vmem:[%s2044_s1 + $0xd] ss:$0 sm:$0xff]  ;;  %v1481_v45 = vld [vmem:[%s2044_s1 + $0xe] ss:$0 sm:$0xff] }
  0x40   : > { %v631_v62 = vadd.f32 %v629_v50, %v589_v32  ;;  %v648_v63 = vadd.f32 %v644_v51, %v606_v44  ;;  %v670_v0 = vmul.f32 %v1451_v43, %v1446_v36  ;;  %v680_v1 = vmul.f32 %v1454_v48, %v1446_v36  ;;  %v1477_v44 = vld [vmem:[%s1807_s17 + $0x38] sm:$0xff]  ;;  %v1484_v50 = vld [vmem:[%s2043_s0 + $0xf] ss:$0 sm:$0xff] }
  0x41   : > { %v649_v2 = vadd.f32 %v647_v56, %v607_v49  ;;  %v668_v3 = vsub.f32 %v662_v52, %v667_v57  ;;  %v685_v4 = vmul.f32 %v1455_v53, %v1447_v42  ;;  %v687_v5 = vmul.f32 %v1454_v48, %v1447_v42  ;;  %v1486_v56 = vld [vmem:[%s1804_s16 + $0x40] sm:$0xff] }
  0x42   : > { %v671_v7 = vadd.f32 %v670_v0, %v669_v58  ;;  %v688_v8 = vmul.f32 %v1455_v53, %v1446_v36  ;;  %v704_v9 = vmul.f32 %v1460_v60, %v1456_v54  ;;  %v709_v10 = vmul.f32 %v1461_v61, %v1457_v59 }
  0x43   : > { %v672_v12 = vadd.f32 %v668_v3, %v630_v55  ;;  %v686_v13 = vsub.f32 %v680_v1, %v685_v4  ;;  %v711_v14 = vmul.f32 %v1460_v60, %v1457_v59  ;;  %v712_v15 = vmul.f32 %v1461_v61, %v1456_v54  ;;  %v1485_v55 = vld [vmem:[%s2044_s1 + $0xf] ss:$0 sm:$0xff]  ;;  %v1487_v61 = vld [vmem:[%s1807_s17 + $0x40] sm:$0xff] }
  0x44   : > { %v673_v18 = vadd.f32 %v671_v7, %v631_v62  ;;  %v689_v19 = vadd.f32 %v688_v8, %v687_v5  ;;  %v710_v20 = vsub.f32 %v704_v9, %v709_v10  ;;  %v722_v21 = vmul.f32 %v1464_v6, %v1456_v54  ;;  %v1490_v62 = vld [vmem:[%s2043_s0 + $0x10] ss:$0 sm:$0xff]  ;;  %v1494_v8 = vld [vmem:[%s2043_s0 + $0x11] ss:$0 sm:$0xff] }
  0x45   : > { %v690_v24 = vadd.f32 %v686_v13, %v648_v63  ;;  %v713_v25 = vadd.f32 %v712_v15, %v711_v14  ;;  %v727_v26 = vmul.f32 %v1465_v11, %v1457_v59  ;;  %v729_v27 = vmul.f32 %v1464_v6, %v1457_v59  ;;  %v1491_v63 = vld [vmem:[%s2044_s1 + $0x10] ss:$0 sm:$0xff]  ;;  %v1495_v13 = vld [vmem:[%s2044_s1 + $0x11] ss:$0 sm:$0xff] }
  0x46   : > { %v691_v30 = vadd.f32 %v689_v19, %v649_v2  ;;  %v714_v31 = vadd.f32 %v710_v20, %v672_v12  ;;  %v730_v32 = vmul.f32 %v1465_v11, %v1456_v54  ;;  %v746_v33 = vmul.f32 %v1470_v17, %v1466_v16  ;;  %v1500_v19 = vld [vmem:[%s2043_s0 + $0x12] ss:$0 sm:$0xff] }
  0x47   : > { %v715_v34 = vadd.f32 %v713_v25, %v673_v18  ;;  %v728_v35 = vsub.f32 %v722_v21, %v727_v26  ;;  %v751_v36 = vmul.f32 %v1471_v23, %v1467_v22  ;;  %v753_v37 = vmul.f32 %v1470_v17, %v1467_v22  ;;  %v1496_v18 = vld [vmem:[%s1804_s16 + $0x48] sm:$0xff]  ;;  %v1501_v25 = vld [vmem:[%s2044_s1 + $0x12] ss:$0 sm:$0xff] }
  0x48   : > { %v731_v40 = vadd.f32 %v730_v32, %v729_v27  ;;  %v754_v41 = vmul.f32 %v1471_v23, %v1466_v16  ;;  %v764_v42 = vmul.f32 %v1474_v28, %v1466_v16  ;;  %v769_v43 = vmul.f32 %v1475_v29, %v1467_v22 }
  0x49   : > { %v732_v46 = vadd.f32 %v728_v35, %v690_v24  ;;  %v752_v47 = vsub.f32 %v746_v33, %v751_v36  ;;  %v771_v48 = vmul.f32 %v1474_v28, %v1467_v22  ;;  %v772_v49 = vmul.f32 %v1475_v29, %v1466_v16  ;;  %v1497_v24 = vld [vmem:[%s1807_s17 + $0x48] sm:$0xff] }
  0x4a   : > { %v733_v51 = vadd.f32 %v731_v40, %v691_v30  ;;  %v755_v52 = vadd.f32 %v754_v41, %v753_v37  ;;  %v770_v53 = vsub.f32 %v764_v42, %v769_v43  ;;  %v788_v54 = vmul.f32 %v1480_v39, %v1476_v38  ;;  %v1504_v30 = vld [vmem:[%s2043_s0 + $0x13] ss:$0 sm:$0xff]  ;;  %v1510_v41 = vld [vmem:[%s2043_s0 + $0x14] ss:$0 sm:$0xff] }
  0x4b   : > { %v756_v57 = vadd.f32 %v752_v47, %v714_v31  ;;  %v773_v58 = vadd.f32 %v772_v49, %v771_v48  ;;  %v793_v59 = vmul.f32 %v1481_v45, %v1477_v44  ;;  %v795_v60 = vmul.f32 %v1480_v39, %v1477_v44  ;;  %v1505_v31 = vld [vmem:[%s2044_s1 + $0x13] ss:$0 sm:$0xff]  ;;  %v1511_v47 = vld [vmem:[%s2044_s1 + $0x14] ss:$0 sm:$0xff] }
  0x4c   : > { %v757_v0 = vadd.f32 %v755_v52, %v715_v34  ;;  %v774_v1 = vadd.f32 %v770_v53, %v732_v46  ;;  %v796_v2 = vmul.f32 %v1481_v45, %v1476_v38  ;;  %v806_v3 = vmul.f32 %v1484_v50, %v1476_v38  ;;  %v1506_v40 = vld [vmem:[%s1804_s16 + $0x50] sm:$0xff] }
  0x4d   : > { %v775_v4 = vadd.f32 %v773_v58, %v733_v51  ;;  %v794_v5 = vsub.f32 %v788_v54, %v793_v59  ;;  %v811_v6 = vmul.f32 %v1485_v55, %v1477_v44  ;;  %v813_v7 = vmul.f32 %v1484_v50, %v1477_v44  ;;  %v1507_v46 = vld [vmem:[%s1807_s17 + $0x50] sm:$0xff]  ;;  %v1516_v58 = vld [vmem:[%s1804_s16 + $0x58] sm:$0xff] }
  0x4e   : > { %v797_v9 = vadd.f32 %v796_v2, %v795_v60  ;;  %v814_v10 = vmul.f32 %v1485_v55, %v1476_v38  ;;  %v830_v11 = vmul.f32 %v1490_v62, %v1486_v56  ;;  %v835_v12 = vmul.f32 %v1491_v63, %v1487_v61  ;;  %v1514_v52 = vld [vmem:[%s2043_s0 + $0x15] ss:$0 sm:$0xff] }
  0x4f   : > { %v798_v14 = vadd.f32 %v794_v5, %v756_v57  ;;  %v812_v15 = vsub.f32 %v806_v3, %v811_v6  ;;  %v837_v16 = vmul.f32 %v1490_v62, %v1487_v61  ;;  %v838_v17 = vmul.f32 %v1491_v63, %v1486_v56  ;;  %v1515_v57 = vld [vmem:[%s2044_s1 + $0x15] ss:$0 sm:$0xff]  ;;  %v1517_v63 = vld [vmem:[%s1807_s17 + $0x58] sm:$0xff] }
  0x50   : > { %v799_v20 = vadd.f32 %v797_v9, %v757_v0  ;;  %v815_v21 = vadd.f32 %v814_v10, %v813_v7  ;;  %v836_v22 = vsub.f32 %v830_v11, %v835_v12  ;;  %v848_v23 = vmul.f32 %v1494_v8, %v1486_v56  ;;  %v1520_v0 = vld [vmem:[%s2043_s0 + $0x16] ss:$0 sm:$0xff]  ;;  %v1524_v10 = vld [vmem:[%s2043_s0 + $0x17] ss:$0 sm:$0xff] }
  0x51   : > { %v816_v26 = vadd.f32 %v812_v15, %v774_v1  ;;  %v839_v27 = vadd.f32 %v838_v17, %v837_v16  ;;  %v853_v28 = vmul.f32 %v1495_v13, %v1487_v61  ;;  %v855_v29 = vmul.f32 %v1494_v8, %v1487_v61  ;;  %v1521_v1 = vld [vmem:[%s2044_s1 + $0x16] ss:$0 sm:$0xff]  ;;  %v1525_v15 = vld [vmem:[%s2044_s1 + $0x17] ss:$0 sm:$0xff] }
  0x52   : > { %v817_v32 = vadd.f32 %v815_v21, %v775_v4  ;;  %v840_v33 = vadd.f32 %v836_v22, %v798_v14  ;;  %v856_v34 = vmul.f32 %v1495_v13, %v1486_v56  ;;  %v872_v35 = vmul.f32 %v1500_v19, %v1496_v18  ;;  %v1530_v21 = vld [vmem:[%s2043_s0 + $0x18] ss:$0 sm:$0xff] }
  0x53   : > { %v841_v36 = vadd.f32 %v839_v27, %v799_v20  ;;  %v854_v37 = vsub.f32 %v848_v23, %v853_v28  ;;  %v877_v38 = vmul.f32 %v1501_v25, %v1497_v24  ;;  %v879_v39 = vmul.f32 %v1500_v19, %v1497_v24  ;;  %v1526_v20 = vld [vmem:[%s1804_s16 + $0x60] sm:$0xff]  ;;  %v1531_v27 = vld [vmem:[%s2044_s1 + $0x18] ss:$0 sm:$0xff] }
  0x54   : > { %v857_v42 = vadd.f32 %v856_v34, %v855_v29  ;;  %v880_v43 = vmul.f32 %v1501_v25, %v1496_v18  ;;  %v890_v44 = vmul.f32 %v1504_v30, %v1496_v18  ;;  %v895_v45 = vmul.f32 %v1505_v31, %v1497_v24 }
  0x55   : > { %v858_v48 = vadd.f32 %v854_v37, %v816_v26  ;;  %v878_v49 = vsub.f32 %v872_v35, %v877_v38  ;;  %v897_v50 = vmul.f32 %v1504_v30, %v1497_v24  ;;  %v898_v51 = vmul.f32 %v1505_v31, %v1496_v18  ;;  %v1527_v26 = vld [vmem:[%s1807_s17 + $0x60] sm:$0xff] }
  0x56   : > { %v859_v53 = vadd.f32 %v857_v42, %v817_v32  ;;  %v881_v54 = vadd.f32 %v880_v43, %v879_v39  ;;  %v896_v55 = vsub.f32 %v890_v44, %v895_v45  ;;  %v914_v56 = vmul.f32 %v1510_v41, %v1506_v40  ;;  %v1534_v32 = vld [vmem:[%s2043_s0 + $0x19] ss:$0 sm:$0xff]  ;;  %v1536_v42 = vld [vmem:[%s1804_s16 + $0x68] sm:$0xff]  ;;  %v1540_v43 = vld [vmem:[%s2043_s0 + $0x1a] ss:$0 sm:$0xff] }
  0x57   : > { %v882_v59 = vadd.f32 %v878_v49, %v840_v33  ;;  %v899_v60 = vadd.f32 %v898_v51, %v897_v50  ;;  %v919_v61 = vmul.f32 %v1511_v47, %v1507_v46  ;;  %v921_v62 = vmul.f32 %v1510_v41, %v1507_v46  ;;  %v1535_v33 = vld [vmem:[%s2044_s1 + $0x19] ss:$0 sm:$0xff]  ;;  %v1541_v49 = vld [vmem:[%s2044_s1 + $0x1a] ss:$0 sm:$0xff] }
  0x58   : > { %v883_v2 = vadd.f32 %v881_v54, %v841_v36  ;;  %v900_v3 = vadd.f32 %v896_v55, %v858_v48  ;;  %v922_v4 = vmul.f32 %v1511_v47, %v1506_v40  ;;  %v932_v5 = vmul.f32 %v1514_v52, %v1506_v40  ;;  %v1537_v48 = vld [vmem:[%s1807_s17 + $0x68] sm:$0xff]  ;;  %v1544_v54 = vld [vmem:[%s2043_s0 + $0x1b] ss:$0 sm:$0xff] }
  0x59   : > { %v901_v6 = vadd.f32 %v899_v60, %v859_v53  ;;  %v920_v7 = vsub.f32 %v914_v56, %v919_v61  ;;  %v937_v8 = vmul.f32 %v1515_v57, %v1507_v46  ;;  %v939_v9 = vmul.f32 %v1514_v52, %v1507_v46  ;;  %v1546_v60 = vld [vmem:[%s1804_s16 + $0x70] sm:$0xff] }
  0x5a   : > { %v923_v11 = vadd.f32 %v922_v4, %v921_v62  ;;  %v940_v12 = vmul.f32 %v1515_v57, %v1506_v40  ;;  %v956_v13 = vmul.f32 %v1520_v0, %v1516_v58  ;;  %v961_v14 = vmul.f32 %v1521_v1, %v1517_v63 }
  0x5b   : > { %v924_v16 = vadd.f32 %v920_v7, %v882_v59  ;;  %v938_v17 = vsub.f32 %v932_v5, %v937_v8  ;;  %v963_v18 = vmul.f32 %v1520_v0, %v1517_v63  ;;  %v964_v19 = vmul.f32 %v1521_v1, %v1516_v58  ;;  %v1545_v59 = vld [vmem:[%s2044_s1 + $0x1b] ss:$0 sm:$0xff]  ;;  %v1547_v1 = vld [vmem:[%s1807_s17 + $0x70] sm:$0xff] }
  0x5c   : > { %v925_v22 = vadd.f32 %v923_v11, %v883_v2  ;;  %v941_v23 = vadd.f32 %v940_v12, %v939_v9  ;;  %v962_v24 = vsub.f32 %v956_v13, %v961_v14  ;;  %v974_v25 = vmul.f32 %v1524_v10, %v1516_v58  ;;  %v1550_v2 = vld [vmem:[%s2043_s0 + $0x1c] ss:$0 sm:$0xff]  ;;  %v1554_v12 = vld [vmem:[%s2043_s0 + $0x1d] ss:$0 sm:$0xff] }
  0x5d   : > { %v942_v28 = vadd.f32 %v938_v17, %v900_v3  ;;  %v965_v29 = vadd.f32 %v964_v19, %v963_v18  ;;  %v979_v30 = vmul.f32 %v1525_v15, %v1517_v63  ;;  %v981_v31 = vmul.f32 %v1524_v10, %v1517_v63  ;;  %v1551_v3 = vld [vmem:[%s2044_s1 + $0x1c] ss:$0 sm:$0xff]  ;;  %v1555_v17 = vld [vmem:[%s2044_s1 + $0x1d] ss:$0 sm:$0xff] }
  0x5e   : > { %v943_v34 = vadd.f32 %v941_v23, %v901_v6  ;;  %v966_v35 = vadd.f32 %v962_v24, %v924_v16  ;;  %v982_v36 = vmul.f32 %v1525_v15, %v1516_v58  ;;  %v998_v37 = vmul.f32 %v1530_v21, %v1526_v20  ;;  %v1560_v23 = vld [vmem:[%s2043_s0 + $0x1e] ss:$0 sm:$0xff] }
  0x5f   : > { %v967_v38 = vadd.f32 %v965_v29, %v925_v22  ;;  %v980_v39 = vsub.f32 %v974_v25, %v979_v30  ;;  %v1003_v40 = vmul.f32 %v1531_v27, %v1527_v26  ;;  %v1005_v41 = vmul.f32 %v1530_v21, %v1527_v26  ;;  %v1556_v22 = vld [vmem:[%s1804_s16 + $0x78] sm:$0xff] }
  0x60   : > { %v983_v44 = vadd.f32 %v982_v36, %v981_v31  ;;  %v1006_v45 = vmul.f32 %v1531_v27, %v1526_v20  ;;  %v1016_v46 = vmul.f32 %v1534_v32, %v1526_v20  ;;  %v1021_v47 = vmul.f32 %v1535_v33, %v1527_v26  ;;  %v1561_v29 = vld [vmem:[%s2044_s1 + $0x1e] ss:$0 sm:$0xff] }
  0x61   : > { %v984_v50 = vadd.f32 %v980_v39, %v942_v28  ;;  %v1004_v51 = vsub.f32 %v998_v37, %v1003_v40  ;;  %v1023_v52 = vmul.f32 %v1534_v32, %v1527_v26  ;;  %v1024_v53 = vmul.f32 %v1535_v33, %v1526_v20  ;;  %v1557_v28 = vld [vmem:[%s1807_s17 + $0x78] sm:$0xff]  ;;  %s1410_s17 = sshll.u32 %s433_s25, 4 }
  0x62   : > { %v985_v55 = vadd.f32 %v983_v44, %v943_v34  ;;  %v1007_v56 = vadd.f32 %v1006_v45, %v1005_v41  ;;  %v1022_v57 = vsub.f32 %v1016_v46, %v1021_v47  ;;  %v1040_v58 = vmul.f32 %v1540_v43, %v1536_v42  ;;  %v1564_v34 = vld [vmem:[%s2043_s0 + $0x1f] ss:$0 sm:$0xff]  ;;  %s475_s18 = scalar_lea.vmem [#allocation4], %s1410_s17  ;;  %s481_s25 = scalar_lea.vmem [#allocation5], %s1410_s17 }
  0x63   : > { %v1008_v61 = vadd.f32 %v1004_v51, %v966_v35  ;;  %v1025_v62 = vadd.f32 %v1024_v53, %v1023_v52  ;;  %v1045_v63 = vmul.f32 %v1541_v49, %v1537_v48  ;;  %v1047_v0 = vmul.f32 %v1540_v43, %v1537_v48  ;;  %v1565_v35 = vld [vmem:[%s2044_s1 + $0x1f] ss:$0 sm:$0xff] }
  0x64   : > { %v1009_v4 = vadd.f32 %v1007_v56, %v967_v38  ;;  %v1026_v5 = vadd.f32 %v1022_v57, %v984_v50  ;;  %v1048_v6 = vmul.f32 %v1541_v49, %v1536_v42  ;;  %v1058_v7 = vmul.f32 %v1544_v54, %v1536_v42 }
  0x65   : > { %v1027_v8 = vadd.f32 %v1025_v62, %v985_v55  ;;  %v1046_v9 = vsub.f32 %v1040_v58, %v1045_v63  ;;  %v1063_v10 = vmul.f32 %v1545_v59, %v1537_v48  ;;  %v1065_v11 = vmul.f32 %v1544_v54, %v1537_v48 }
  0x66   : > { %v1049_v13 = vadd.f32 %v1048_v6, %v1047_v0  ;;  %v1066_v14 = vmul.f32 %v1545_v59, %v1536_v42  ;;  %v1082_v15 = vmul.f32 %v1550_v2, %v1546_v60  ;;  %v1087_v16 = vmul.f32 %v1551_v3, %v1547_v1 }
  0x67   : > { %v1050_v18 = vadd.f32 %v1046_v9, %v1008_v61  ;;  %v1064_v19 = vsub.f32 %v1058_v7, %v1063_v10  ;;  %v1089_v20 = vmul.f32 %v1550_v2, %v1547_v1  ;;  %v1090_v21 = vmul.f32 %v1551_v3, %v1546_v60 }
  0x68   : > { %v1051_v24 = vadd.f32 %v1049_v13, %v1009_v4  ;;  %v1067_v25 = vadd.f32 %v1066_v14, %v1065_v11  ;;  %v1088_v26 = vsub.f32 %v1082_v15, %v1087_v16  ;;  %v1100_v27 = vmul.f32 %v1554_v12, %v1546_v60 }
  0x69   : > { %v1068_v30 = vadd.f32 %v1064_v19, %v1026_v5  ;;  %v1091_v31 = vadd.f32 %v1090_v21, %v1089_v20  ;;  %v1105_v32 = vmul.f32 %v1555_v17, %v1547_v1  ;;  %v1107_v33 = vmul.f32 %v1554_v12, %v1547_v1 }
  0x6a   : > { %v1069_v36 = vadd.f32 %v1067_v25, %v1027_v8  ;;  %v1092_v37 = vadd.f32 %v1088_v26, %v1050_v18  ;;  %v1108_v38 = vmul.f32 %v1555_v17, %v1546_v60  ;;  %v1124_v39 = vmul.f32 %v1560_v23, %v1556_v22 }
  0x6b   : > { %v1093_v40 = vadd.f32 %v1091_v31, %v1051_v24  ;;  %v1106_v41 = vsub.f32 %v1100_v27, %v1105_v32  ;;  %v1129_v42 = vmul.f32 %v1561_v29, %v1557_v28  ;;  %v1131_v43 = vmul.f32 %v1560_v23, %v1557_v28 }
  0x6c   : > { %v1109_v44 = vadd.f32 %v1108_v38, %v1107_v33  ;;  %v1132_v45 = vmul.f32 %v1561_v29, %v1556_v22  ;;  %v1142_v46 = vmul.f32 %v1564_v34, %v1556_v22  ;;  %v1147_v47 = vmul.f32 %v1565_v35, %v1557_v28 }
  0x6d   : > { %v1110_v48 = vadd.f32 %v1106_v41, %v1068_v30  ;;  %v1130_v49 = vsub.f32 %v1124_v39, %v1129_v42  ;;  %v1149_v50 = vmul.f32 %v1564_v34, %v1557_v28  ;;  %v1150_v51 = vmul.f32 %v1565_v35, %v1556_v22  ;;  %1170 = sbr.rel (!%p1723_p6) target bundleno = 123 (0x7b), region = 116 }
  0x6e   : > { %v1111_v52 = vadd.f32 %v1109_v44, %v1069_v36  ;;  %v1133_v53 = vadd.f32 %v1132_v45, %v1131_v43  ;;  %v1148_v54 = vsub.f32 %v1142_v46, %v1147_v47 }
  0x6f   : > { %v1134_v55 = vadd.f32 %v1130_v49, %v1092_v37  ;;  %v1151_v56 = vadd.f32 %v1150_v51, %v1149_v50 }
  0x70   : > { %v1135_v57 = vadd.f32 %v1133_v53, %v1093_v40  ;;  %v1152_v58 = vadd.f32 %v1148_v54, %v1110_v48 }
  0x71   : > { %v1153_v59 = vadd.f32 %v1151_v56, %v1111_v52  ;;  %1154 = vst [vmem:[%s475_s18] sm:$0xff] %v1134_v55 }
  0x72   : > { %1155 = vst [vmem:[%s481_s25] sm:$0xff] %v1135_v57  ;;  %1566 = vst [vmem:[%s475_s18 + $0x8] sm:$0xff] %v1152_v58 }
  0x73   : > { %1567 = vst [vmem:[%s481_s25 + $0x8] sm:$0xff] %v1153_v59 }
  0x78   : > { %v1203_v60 = vld [vmem:[%s475_s18] sm:$0xff] }
  0x79   : > { %v1205_v61 = vld [vmem:[%s475_s18 + $0x8] sm:$0xff]  ;;  %1204 = vst [vmem:[%s1173_s8] sm:$0xff] %v1203_v60 }
  0x7a   : > { %1206 = vst [vmem:[%s1173_s8 + $0x10] sm:$0xff] %v1205_v61 }
  0x7b PF: > { %1212 = sbr.rel (!%p1723_p6) target bundleno = 131 (0x83), region = 154  ;;  %s1571_s9 = sshll.u32 (%p1723_p6), %s1644_s20, 3 }
  0x7c   : > { %s1215_s12 = scalar_lea.vmem (%p1723_p6), %s2048_s5, %s1571_s9 }
  0x80   : > { %v1245_v62 = vld [vmem:[%s481_s25] sm:$0xff] (%p1723_p6) }
  0x81   : > { %v1247_v63 = vld [vmem:[%s481_s25 + $0x8] sm:$0xff] (%p1723_p6)  ;;  %1246 = vst [vmem:[%s1215_s12] sm:$0xff] (%p1723_p6), %v1245_v62 }
  0x82   : > { %1248 = vst [vmem:[%s1215_s12 + $0x10] sm:$0xff] %v1247_v63 }
  0x83 PF: > { %s16_s22 = sadd.s32 1, %s1652_s22   ;;  %s2051_s18 = smov %s1640_s19 }
  0x84   : > { %p13_p11 = scmp.ge.s32.totalorder %s16_s22, 4   ;;  %s2052_s19 = smov %s1728_s29 }
  0x85   : > { %s2053_s20 = smov %s1648_s21  ;;  %s2054_s21 = smov %s2056_s23 }
  0x86   :  { %15 = sbr.rel (!%p13_p11) target bundleno = 3 (0x3), region = 311 }

// kernel: reverse.8
= control target key start
LH: loop header
LB: loop body
LE: loop exit
PB: predicated region body
PF: predicated region fallthrough
CT: control target
= control target key end

     0   :  { %s344_s0 = inlined_call_operand.vmem [shape: f32[16,2,16,7], index: 0, kind: input, shape index: {}]   ;;  %s345_s1 = inlined_call_operand.vmem [shape: f32[16,2,16,7], index: 1, kind: output, shape index: {}]  }
   0x1   :  { %v112_v0 = vld [vmem:[%s344_s0 + $0x60] sm:$0xff]  ;;  %v113_v1 = vld [vmem:[%s344_s0 + $0xd0] sm:$0xff]  ;;  %v138_v14 = vld [vmem:[%s344_s0 + $0x68] sm:$0xff] }
   0x2   :  { %v115_v2 = vld [vmem:[%s344_s0 + $0x50] sm:$0xff]  ;;  %4 = vst [vmem:[%s345_s1] sm:$0xff] %v112_v0  ;;  %114 = vst [vmem:[%s345_s1 + $0x70] sm:$0xff] %v113_v1  ;;  %v117_v3 = vld [vmem:[%s344_s0 + $0xc0] sm:$0xff] }
   0x3   :  { %116 = vst [vmem:[%s345_s1 + $0x10] sm:$0xff] %v115_v2  ;;  %v119_v4 = vld [vmem:[%s344_s0 + $0x40] sm:$0xff]  ;;  %v121_v5 = vld [vmem:[%s344_s0 + $0xb0] sm:$0xff]  ;;  %118 = vst [vmem:[%s345_s1 + $0x80] sm:$0xff] %v117_v3 }
   0x4   :  { %120 = vst [vmem:[%s345_s1 + $0x20] sm:$0xff] %v119_v4  ;;  %122 = vst [vmem:[%s345_s1 + $0x90] sm:$0xff] %v121_v5  ;;  %v123_v6 = vld [vmem:[%s344_s0 + $0x30] sm:$0xff]  ;;  %v125_v7 = vld [vmem:[%s344_s0 + $0xa0] sm:$0xff] }
   0x5   :  { %v127_v8 = vld [vmem:[%s344_s0 + $0x20] sm:$0xff]  ;;  %124 = vst [vmem:[%s345_s1 + $0x30] sm:$0xff] %v123_v6  ;;  %126 = vst [vmem:[%s345_s1 + $0xa0] sm:$0xff] %v125_v7  ;;  %v129_v9 = vld [vmem:[%s344_s0 + $0x90] sm:$0xff] }
   0x6   :  { %128 = vst [vmem:[%s345_s1 + $0x40] sm:$0xff] %v127_v8  ;;  %v131_v10 = vld [vmem:[%s344_s0 + $0x10] sm:$0xff]  ;;  %v133_v11 = vld [vmem:[%s344_s0 + $0x80] sm:$0xff]  ;;  %130 = vst [vmem:[%s345_s1 + $0xb0] sm:$0xff] %v129_v9 }
   0x7   :  { %132 = vst [vmem:[%s345_s1 + $0x50] sm:$0xff] %v131_v10  ;;  %134 = vst [vmem:[%s345_s1 + $0xc0] sm:$0xff] %v133_v11  ;;  %v49_v12 = vld [vmem:[%s344_s0] sm:$0xff]  ;;  %v136_v13 = vld [vmem:[%s344_s0 + $0x70] sm:$0xff] }
   0x8   :  { %135 = vst [vmem:[%s345_s1 + $0x60] sm:$0xff] %v49_v12  ;;  %137 = vst [vmem:[%s345_s1 + $0xd0] sm:$0xff] %v136_v13  ;;  %v140_v15 = vld [vmem:[%s344_s0 + $0xd8] sm:$0xff]  ;;  %v144_v17 = vld [vmem:[%s344_s0 + $0xc8] sm:$0xff] }
   0x9   :  { %139 = vst [vmem:[%s345_s1 + $0x8] sm:$0xff] %v138_v14  ;;  %v142_v16 = vld [vmem:[%s344_s0 + $0x58] sm:$0xff]  ;;  %141 = vst [vmem:[%s345_s1 + $0x78] sm:$0xff] %v140_v15  ;;  %v146_v18 = vld [vmem:[%s344_s0 + $0x48] sm:$0xff] }
   0xa   :  { %143 = vst [vmem:[%s345_s1 + $0x18] sm:$0xff] %v142_v16  ;;  %145 = vst [vmem:[%s345_s1 + $0x88] sm:$0xff] %v144_v17  ;;  %v148_v19 = vld [vmem:[%s344_s0 + $0xb8] sm:$0xff]  ;;  %v152_v21 = vld [vmem:[%s344_s0 + $0xa8] sm:$0xff] }
   0xb   :  { %v150_v20 = vld [vmem:[%s344_s0 + $0x38] sm:$0xff]  ;;  %147 = vst [vmem:[%s345_s1 + $0x28] sm:$0xff] %v146_v18  ;;  %149 = vst [vmem:[%s345_s1 + $0x98] sm:$0xff] %v148_v19  ;;  %v154_v22 = vld [vmem:[%s344_s0 + $0x28] sm:$0xff] }
   0xc   :  { %151 = vst [vmem:[%s345_s1 + $0x38] sm:$0xff] %v150_v20  ;;  %v156_v23 = vld [vmem:[%s344_s0 + $0x98] sm:$0xff]  ;;  %153 = vst [vmem:[%s345_s1 + $0xa8] sm:$0xff] %v152_v21  ;;  %v160_v25 = vld [vmem:[%s344_s0 + $0x88] sm:$0xff] }
   0xd   :  { %155 = vst [vmem:[%s345_s1 + $0x48] sm:$0xff] %v154_v22  ;;  %157 = vst [vmem:[%s345_s1 + $0xb8] sm:$0xff] %v156_v23  ;;  %v158_v24 = vld [vmem:[%s344_s0 + $0x18] sm:$0xff]  ;;  %v162_v26 = vld [vmem:[%s344_s0 + $0x8] sm:$0xff] }
   0xe   :  { %159 = vst [vmem:[%s345_s1 + $0x58] sm:$0xff] %v158_v24  ;;  %161 = vst [vmem:[%s345_s1 + $0xc8] sm:$0xff] %v160_v25  ;;  %v164_v27 = vld [vmem:[%s344_s0 + $0x78] sm:$0xff] }
   0xf   :  { %163 = vst [vmem:[%s345_s1 + $0x68] sm:$0xff] %v162_v26  ;;  %165 = vst [vmem:[%s345_s1 + $0xd8] sm:$0xff] %v164_v27 }

// kernel: fno_forward.12
= control target key start
LH: loop header
LB: loop body
LE: loop exit
PB: predicated region body
PF: predicated region fallthrough
CT: control target
= control target key end

     0   :  { %s851_s21 = smov 0   ;;  %s853_s22 = smov 0   ;;  %s957_s0 = inlined_call_operand.vmem [shape: f32[16,512], index: 0, kind: input, shape index: {}]   ;;  %s958_s1 = inlined_call_operand.vmem [shape: f32[16,512], index: 1, kind: input, shape index: {}]   ;;  %s959_s2 = inlined_call_operand.vmem [shape: f32[16,16], index: 2, kind: input, shape index: {}]   ;;  %s960_s3 = inlined_call_operand.vmem [shape: f32[16,1], index: 3, kind: input, shape index: {}]   ;;  %s961_s4 = inlined_call_operand.vmem [shape: f32[16,32], index: 4, kind: input, shape index: {}]   ;;  %s962_s5 = inlined_call_operand.vmem [shape: f32[16,1], index: 5, kind: input, shape index: {}]   ;;  %s963_s6 = inlined_call_operand.vmem [shape: f32[16,512], index: 6, kind: output, shape index: {}]  }
   0x1   :  { %s855_s23 = smov 0  }
   0x2 LB: > { %s708_s24 = sadd.s32 4294967295, %s812_s23   ;;  %s868_s25 = sadd.s32 1, %s812_s23   ;;  %s812_s23 = sphi %s855_s23, %s968_s23   ;;  %s808_s22 = sphi %s853_s22, %s967_s22   ;;  %s804_s21 = sphi %s851_s21, %s966_s21  }
   0x3   : > { %s20_s26 = ssub.s32 %s812_s23, %s868_s25  ;;  %s23_s27 = sadd.s32 1, %s808_s22 }
   0x4   : > { %p21_p0 = scmp.eq.s32.totalorder %s20_s26, 0  ;;  %p30_p1 = scmp.ne.s32.totalorder %s808_s22, %s804_s21 }
   0x5   : > { %p31_p2 = scmp.eq.s32.totalorder %s812_s23, 0  ;;  %p170_p3 = scmp.eq.s32.totalorder %s708_s24, 1 }
   0x6   : > { %s879_s28 = scalar_select %p21_p0, %s808_s22, %s23_s27  }
   0x7   : > { %p881_p4 = por %p31_p2, %p30_p1  ;;  %p885_p5 = por %p170_p3, %p30_p1 }
   0x8   : > { %p711_p6 = scmp.ge.s32.totalorder %s812_s23, 2 }
   0xa   : > { %204 = sbr.rel (%p711_p6) target bundleno = 31 (0x1f), region = 32 }
  0x11   : > { %207 = sbr.rel (!%p881_p4) target bundleno = 24 (0x18), region = 36  ;;  %s209_s7 = sand.u32 (%p881_p4), 1, %s808_s22  }
  0x12   : > { %s731_s8 = sshll.u32 (%p881_p4), %s812_s23, 4  ;;  %s712_s9 = sshll.u32 (%p881_p4), %s209_s7, 5 }
  0x13   : > { %s214_s12 = scalar_lea.vmem (%p881_p4), %s957_s0, %s731_s8  ;;  %s211_s13 = scalar_lea.vmem (%p881_p4), [#allocation2], %s712_s9 }
  0x14   : > { %v227_v0 = vld [vmem:[%s214_s12] sm:$0xff] (%p881_p4)  ;;  %v229_v1 = vld [vmem:[%s214_s12 + $0x8] sm:$0xff] (%p881_p4) }
  0x15   : > { %v231_v2 = vld [vmem:[%s214_s12 + $0x20] sm:$0xff] (%p881_p4)  ;;  %228 = vst [vmem:[%s211_s13] sm:$0xff] (%p881_p4), %v227_v0  ;;  %230 = vst [vmem:[%s211_s13 + $0x8] sm:$0xff] (%p881_p4), %v229_v1  ;;  %v233_v3 = vld [vmem:[%s214_s12 + $0x28] sm:$0xff] (%p881_p4) }
  0x16   : > { %232 = vst [vmem:[%s211_s13 + $0x10] sm:$0xff] (%p881_p4), %v231_v2  ;;  %234 = vst [vmem:[%s211_s13 + $0x18] sm:$0xff] (%p881_p4), %v233_v3 }
  0x18 PF: > { %240 = sbr.rel (!%p881_p4) target bundleno = 31 (0x1f), region = 59  ;;  %s242_s14 = sand.u32 (%p881_p4), 1, %s808_s22  }
  0x19   : > { %s732_s15 = sshll.u32 (%p881_p4), %s812_s23, 4  ;;  %s715_s16 = sshll.u32 (%p881_p4), %s242_s14, 5 }
  0x1a   : > { %s247_s19 = scalar_lea.vmem (%p881_p4), %s958_s1, %s732_s15  ;;  %s244_s20 = scalar_lea.vmem (%p881_p4), [#allocation3], %s715_s16 }
  0x1b   : > { %v260_v4 = vld [vmem:[%s247_s19] sm:$0xff] (%p881_p4)  ;;  %v262_v5 = vld [vmem:[%s247_s19 + $0x8] sm:$0xff] (%p881_p4) }
  0x1c   : > { %v264_v6 = vld [vmem:[%s247_s19 + $0x20] sm:$0xff] (%p881_p4)  ;;  %261 = vst [vmem:[%s244_s20] sm:$0xff] (%p881_p4), %v260_v4  ;;  %263 = vst [vmem:[%s244_s20 + $0x8] sm:$0xff] (%p881_p4), %v262_v5  ;;  %v266_v7 = vld [vmem:[%s247_s19 + $0x28] sm:$0xff] (%p881_p4) }
  0x1d   : > { %265 = vst [vmem:[%s244_s20 + $0x10] sm:$0xff] (%p881_p4), %v264_v6  ;;  %267 = vst [vmem:[%s244_s20 + $0x18] sm:$0xff] (%p881_p4), %v266_v7 }
  0x1f PF: > { %p718_p7 = scmp.ge.s32.totalorder %s812_s23, 1  ;;  %p272_p8 = scmp.lt.s32.totalorder %s812_s23, 3 }
  0x21   : > { %p273_p9 = pnand %p718_p7, %p272_p8 }
  0x22   : > { %s279_s26 = sand.u32 (!%p273_p9), 1, %s804_s21   ;;  %v814_v8 = vmov (!%p273_p9), 0.0   ;;  %v815_v9 = vmov (!%p273_p9), 0   ;;  %v327_v10 = vld [vmem:[%s960_s3] sm:$0xff] (!%p273_p9)  ;;  %v328_v11 = vld [vmem:[%s960_s3 + $0x8] sm:$0xff] (!%p273_p9)  ;;  %vm339_vm0 = vcmask (!%p273_p9), 130048  }
  0x23   : > { %276 = sbr.rel (%p273_p9) target bundleno = 551 (0x227), region = 82  ;;  %s907_s27 = sshll.u32 (!%p273_p9), %s279_s26, 5  ;;  %410 = vmatprep.mubr.f32.mxu0 (!%p273_p9), %v814_v8  ;;  %772 = vset.pattern.permute.xlu0 (!%p273_p9), %v815_v9  ;;  %v321_v18 = vld [vmem:[%s959_s2] sm:$0xff] (!%p273_p9)  ;;  %v322_v19 = vld [vmem:[%s959_s2 + $0x8] sm:$0xff] (!%p273_p9)  ;;  %vm477_vm1 = vcmask (!%p273_p9), 261120  }
  0x24   : > { %331 = vperm.xlu0 (!%p273_p9), %772, %v327_v10   ;;  %548 = vmatprep.mubr.f32.mxu1 (!%p273_p9), %v814_v8  ;;  %s281_s21 = scalar_lea.vmem (!%p273_p9), [#allocation2], %s907_s27  ;;  %v465_v20 = vld [vmem:[%s962_s5] sm:$0xff] (!%p273_p9)  ;;  %v466_v21 = vld [vmem:[%s962_s5 + $0x8] sm:$0xff] (!%p273_p9)  ;;  %s288_s18 = scalar_lea.vmem (!%p273_p9), [#allocation3], %s907_s27 }
  0x25   : > { %v324_v12 = vld [vmem:[%s281_s21 + $0x8] sm:$0xff] (!%p273_p9)  ;;  %v326_v13 = vld [vmem:[%s281_s21 + $0x18] sm:$0xff] (!%p273_p9)  ;;  %v323_v14 = vld [vmem:[%s281_s21] sm:$0xff] (!%p273_p9)  ;;  %773 = vset.pattern.permute.xlu1 (!%p273_p9), %v815_v9  ;;  %s317_s7 = scalar_lea.vmem (!%p273_p9), [#allocation4], %s907_s27 }
  0x26   : > { %v734_v15 = vpack.c.bf16 (!%p273_p9), %v326_v13, %v324_v12  ;;  %v325_v16 = vld [vmem:[%s281_s21 + $0x10] sm:$0xff] (!%p273_p9)  ;;  %469 = vperm.xlu1 (!%p273_p9), %773, %v465_v20   ;;  %v460_v2 = vld [vmem:[%s288_s18 + $0x8] sm:$0xff] (!%p273_p9)  ;;  %v462_v3 = vld [vmem:[%s288_s18 + $0x18] sm:$0xff] (!%p273_p9) }
  0x27   : > { %v736_v17 = vpack.c.bf16 (!%p273_p9), %v325_v16, %v323_v14  ;;  %v742_v9 = vpack.c.bf16 (!%p273_p9), %v462_v3, %v460_v2  ;;  %v459_v10 = vld [vmem:[%s288_s18] sm:$0xff] (!%p273_p9)  ;;  %v464_v14 = vld [vmem:[%s961_s4 + $0x8] sm:$0xff] (!%p273_p9) }
  0x28   : > { %735 = vmatprep.subr.bf16.mxu0 (!%p273_p9), %v734_v15  ;;  %336 = vperm.xlu0 (!%p273_p9), %772, %v328_v11   ;;  %v461_v11 = vld [vmem:[%s288_s18 + $0x10] sm:$0xff] (!%p273_p9)  ;;  %v463_v13 = vld [vmem:[%s961_s4] sm:$0xff] (!%p273_p9) }
  0x29   : > { %737 = vmatpush1.bf16.msra.mxu0 (!%p273_p9), %v736_v17  ;;  %v744_v12 = vpack.c.bf16 (!%p273_p9), %v461_v11, %v459_v10 }
  0x2a   : > { %474 = vperm.xlu1 %773, %v466_v21   ;;  %s733_s8 = sshll.u32 (%p885_p5), %s708_s24, 4 }
  0x2b   : > { %s610_s21 = scalar_lea.vmem (%p885_p5), %s963_s6, %s733_s8 }
  0x2c   : > { %722 = vmatmul.mubr.msk.f32.vlgmr.msra.gmra.mrb[0].mxu0 %vm339_vm0, %v321_v18 }
  0x2d   : > { %416 = vmatprep.mubr.f32.mxu0 %v814_v8 }
  0x30   : > { %723 = vmatmul.mubr.msk.f32.gmra.mrb[2].mxu0 %vm339_vm0, %v322_v19 }
  0xa3   : > { %v332_v22 = vpop.permute.xlu0 %331 }
  0xa5   : > { %v470_v15 = vpop.permute.xlu1 %469 }
  0xa7   : > { %v337_v28 = vpop.permute.xlu0 %336 }
  0xa9   : > { %v475_v21 = vpop.permute.xlu1 %474 }
  0xff   : > { %v412_v23 = vpop.f32.mrb[0].mxu0 }
 0x100   : > { %v413_v24 = vadd.f32 %v412_v23, %v332_v22  ;;  %v414_v25 = vpop.f32.mrb[1].mxu0 }
 0x101   : > { %v415_v26 = vadd.f32 %v414_v25, %v332_v22 }
 0x102   : > { %v427_v27 = vmul.f32 0.044715, %v413_v24  ;;  %v423_v58 = vmul.f32 0.5, %v413_v24 }
 0x103   : > { %v428_v29 = vmul.f32 0.044715, %v415_v26  ;;  %v418_v30 = vpop.f32.mrb[2].mxu0  ;;  %v424_v61 = vmul.f32 0.5, %v415_v26 }
 0x104   : > { %v431_v31 = vmul.f32 %v427_v27, %v413_v24  ;;  %v419_v32 = vadd.f32 %v418_v30, %v337_v28  ;;  %v420_v33 = vpop.f32.mrb[3].mxu0 }
 0x105   : > { %v421_v34 = vadd.f32 %v420_v33, %v337_v28  ;;  %v432_v35 = vmul.f32 %v428_v29, %v415_v26 }
 0x106   : > { %v429_v36 = vmul.f32 0.044715, %v419_v32  ;;  %v435_v37 = vmul.f32 %v431_v31, %v413_v24  ;;  %v425_v59 = vmul.f32 0.5, %v419_v32 }
 0x107   : > { %v430_v38 = vmul.f32 0.044715, %v421_v34  ;;  %v436_v39 = vmul.f32 %v432_v35, %v415_v26  ;;  %v426_v62 = vmul.f32 0.5, %v421_v34 }
 0x108   : > { %v433_v40 = vmul.f32 %v429_v36, %v419_v32  ;;  %v439_v41 = vadd.f32 %v435_v37, %v413_v24 }
 0x109   : > { %v434_v42 = vmul.f32 %v430_v38, %v421_v34  ;;  %v440_v43 = vadd.f32 %v436_v39, %v415_v26 }
 0x10a   : > { %v437_v44 = vmul.f32 %v433_v40, %v419_v32  ;;  %v443_v45 = vmul.f32 0.7978846, %v439_v41 }
 0x10b   : > { %v438_v46 = vmul.f32 %v434_v42, %v421_v34  ;;  %v444_v47 = vmul.f32 0.7978846, %v440_v43 }
 0x10c   : > { %v441_v48 = vadd.f32 %v437_v44, %v419_v32  ;;  %774 = vtanh.f32 %v443_v45 }
 0x10d   : > { %v442_v49 = vadd.f32 %v438_v46, %v421_v34  ;;  %776 = vtanh.f32 %v444_v47 }
 0x10e   : > { %v445_v50 = vmul.f32 0.7978846, %v441_v48 }
 0x10f   : > { %v446_v51 = vmul.f32 0.7978846, %v442_v49 }
 0x110   : > { %778 = vtanh.f32 %v445_v50 }
 0x111   : > { %780 = vtanh.f32 %v446_v51 }
 0x116   : > { %v775_v52 = vpop.eup %774 }
 0x117   : > { %v777_v53 = vpop.eup %776  ;;  %v451_v54 = vadd.f32 1.0, %v775_v52 }
 0x118   : > { %v452_v56 = vadd.f32 1.0, %v777_v53 }
 0x119   : > { %v455_v0 = vmul.f32 %v451_v54, %v423_v58 }
 0x11a   : > { %v779_v55 = vpop.eup %778  ;;  %v456_v4 = vmul.f32 %v452_v56, %v424_v61 }
 0x11b   : > { %v781_v57 = vpop.eup %780  ;;  %v453_v60 = vadd.f32 1.0, %v779_v55 }
 0x11c   : > { %v454_v63 = vadd.f32 1.0, %v781_v57 }
 0x11d   : > { %v457_v1 = vmul.f32 %v453_v60, %v425_v59 }
 0x11e   : > { %v458_v5 = vmul.f32 %v454_v63, %v426_v62 }
 0x11f   : > { %v740_v6 = vpack.c.bf16 %v457_v1, %v455_v0 }
 0x120   : > { %v738_v7 = vpack.c.bf16 %v458_v5, %v456_v4 }
 0x122   : > { %739 = vmatprep.subr.bf16.mxu1 %v738_v7 }
 0x123   : > { %741 = vmatpush1.bf16.msra.mxu1 %v740_v6 }
 0x124   : > { %743 = vmatprep.subr.bf16.mxu1 %v742_v9 }
 0x127   : > { %745 = vmatpush1.bf16.msra.mxu1 %v744_v12 }
 0x12a   : > { %724 = vmatmul.mubr.msk.f32.vlgmr.msra.gmra.mrb[0].mxu1 %vm477_vm1, %v463_v13 }
 0x12b   : > { %554 = vmatprep.mubr.f32.mxu1 %v814_v8 }
 0x12e   : > { %725 = vmatmul.mubr.msk.f32.gmra.mrb[2].mxu1 %vm477_vm1, %v464_v14 }
 0x1fd   : > { %v550_v16 = vpop.f32.mrb[0].mxu1 }
 0x1fe   : > { %v551_v17 = vadd.f32 %v550_v16, %v470_v15  ;;  %v552_v18 = vpop.f32.mrb[1].mxu1 }
 0x1ff   : > { %v553_v19 = vadd.f32 %v552_v18, %v470_v15 }
 0x200   : > { %v565_v20 = vmul.f32 0.044715, %v551_v17  ;;  %v561_v46 = vmul.f32 0.5, %v551_v17 }
 0x201   : > { %v566_v22 = vmul.f32 0.044715, %v553_v19  ;;  %v556_v23 = vpop.f32.mrb[2].mxu1  ;;  %v562_v48 = vmul.f32 0.5, %v553_v19 }
 0x202   : > { %v569_v24 = vmul.f32 %v565_v20, %v551_v17  ;;  %v557_v25 = vadd.f32 %v556_v23, %v475_v21  ;;  %v558_v26 = vpop.f32.mrb[3].mxu1 }
 0x203   : > { %v570_v27 = vmul.f32 %v566_v22, %v553_v19  ;;  %v559_v28 = vadd.f32 %v558_v26, %v475_v21 }
 0x204   : > { %v573_v8 = vmul.f32 %v569_v24, %v551_v17  ;;  %v567_v29 = vmul.f32 0.044715, %v557_v25  ;;  %v563_v54 = vmul.f32 0.5, %v557_v25 }
 0x205   : > { %v574_v30 = vmul.f32 %v570_v27, %v553_v19  ;;  %v568_v31 = vmul.f32 0.044715, %v559_v28  ;;  %v564_v56 = vmul.f32 0.5, %v559_v28 }
 0x206   : > { %v577_v32 = vadd.f32 %v573_v8, %v551_v17  ;;  %v571_v33 = vmul.f32 %v567_v29, %v557_v25 }
 0x207   : > { %v578_v34 = vadd.f32 %v574_v30, %v553_v19  ;;  %v572_v35 = vmul.f32 %v568_v31, %v559_v28 }
 0x208   : > { %v581_v36 = vmul.f32 0.7978846, %v577_v32  ;;  %v575_v37 = vmul.f32 %v571_v33, %v557_v25 }
 0x209   : > { %v582_v38 = vmul.f32 0.7978846, %v578_v34  ;;  %v576_v39 = vmul.f32 %v572_v35, %v559_v28 }
 0x20a   : > { %782 = vtanh.f32 %v581_v36  ;;  %v579_v40 = vadd.f32 %v575_v37, %v557_v25 }
 0x20b   : > { %784 = vtanh.f32 %v582_v38  ;;  %v580_v41 = vadd.f32 %v576_v39, %v559_v28 }
 0x20c   : > { %v583_v42 = vmul.f32 0.7978846, %v579_v40 }
 0x20d   : > { %v584_v43 = vmul.f32 0.7978846, %v580_v41 }
 0x20e   : > { %786 = vtanh.f32 %v583_v42 }
 0x20f   : > { %788 = vtanh.f32 %v584_v43 }
 0x214   : > { %v783_v44 = vpop.eup %782 }
 0x215   : > { %v785_v45 = vpop.eup %784  ;;  %v589_v47 = vadd.f32 1.0, %v783_v44 }
 0x216   : > { %v590_v49 = vadd.f32 1.0, %v785_v45 }
 0x217   : > { %v593_v50 = vmul.f32 %v589_v47, %v561_v46 }
 0x218   : > { %v787_v51 = vpop.eup %786  ;;  %v594_v52 = vmul.f32 %v590_v49, %v562_v48  ;;  %607 = sbr.rel (!%p885_p5) target bundleno = 551 (0x227), region = 94 }
 0x219   : > { %v789_v53 = vpop.eup %788  ;;  %597 = vst [vmem:[%s317_s7] sm:$0xff] %v593_v50  ;;  %v591_v55 = vadd.f32 1.0, %v787_v51 }
 0x21a   : > { %598 = vst [vmem:[%s317_s7 + $0x8] sm:$0xff] %v594_v52  ;;  %v592_v57 = vadd.f32 1.0, %v789_v53 }
 0x21b   : > { %v595_v58 = vmul.f32 %v591_v55, %v563_v54 }
 0x21c   : > { %v596_v59 = vmul.f32 %v592_v57, %v564_v56 }
 0x21d   : > { %599 = vst [vmem:[%s317_s7 + $0x10] sm:$0xff] %v595_v58 }
 0x21e   : > { %600 = vst [vmem:[%s317_s7 + $0x18] sm:$0xff] %v596_v59 }
 0x220   : > { %v623_v60 = vld [vmem:[%s317_s7] sm:$0xff] }
 0x221   : > { %v625_v61 = vld [vmem:[%s317_s7 + $0x8] sm:$0xff]  ;;  %624 = vst [vmem:[%s610_s21] sm:$0xff] %v623_v60 }
 0x222   : > { %626 = vst [vmem:[%s610_s21 + $0x8] sm:$0xff] %v625_v61 }
 0x224   : > { %v627_v62 = vld [vmem:[%s317_s7 + $0x10] sm:$0xff] }
 0x225   : > { %v629_v63 = vld [vmem:[%s317_s7 + $0x18] sm:$0xff]  ;;  %628 = vst [vmem:[%s610_s21 + $0x20] sm:$0xff] %v627_v62 }
 0x226   : > { %630 = vst [vmem:[%s610_s21 + $0x28] sm:$0xff] %v629_v63 }
 0x227 PF: > { %p13_p10 = scmp.ge.s32.totalorder %s868_s25, 4   ;;  %s966_s21 = smov %s808_s22 }
 0x228   : > { %s967_s22 = smov %s879_s28  ;;  %s968_s23 = smov %s868_s25 }
 0x229   :  { %15 = sbr.rel (!%p13_p10) target bundleno = 2 (0x2), region = 156 }

// kernel: fno_forward.19
= control target key start
LH: loop header
LB: loop body
LE: loop exit
PB: predicated region body
PF: predicated region fallthrough
CT: control target
= control target key end

     0   :  { %s1132_s0 = inlined_call_operand.vmem [shape: f32[16,512], index: 0, kind: input, shape index: {}]   ;;  %s1133_s1 = inlined_call_operand.vmem [shape: f32[64,16], index: 1, kind: input, shape index: {}]   ;;  %s1134_s2 = inlined_call_operand.vmem [shape: f32[64,1], index: 2, kind: input, shape index: {}]   ;;  %s1135_s3 = inlined_call_operand.vmem [shape: f32[1,64], index: 3, kind: input, shape index: {}]   ;;  %s1136_s4 = inlined_call_operand.<no memory space> [shape: f32[1,1], index: 4, kind: input, shape index: {}]   ;;  %s1137_s5 = inlined_call_operand.vmem [shape: f32[1,512], index: 5, kind: output, shape index: {}]  }
   0x1   :  { %v10_v0 = vstv %s1136_s4 }
   0x2   :  { %11 = vst [vmem:[#allocation2] sm:$0x1] %v10_v0 }
   0x3   :  { %s923_s20 = smov 0   ;;  %s925_s21 = smov 0  }
   0x4   :  { %s927_s22 = smov 0  }
   0x5 LB: > { %s760_s4 = sadd.s32 4294967295, %s885_s22   ;;  %s940_s23 = sadd.s32 1, %s885_s22   ;;  %s885_s22 = sphi %s927_s22, %s1140_s22   ;;  %s881_s21 = sphi %s925_s21, %s1139_s21   ;;  %s877_s20 = sphi %s923_s20, %s1138_s20  }
   0x6   : > { %s21_s24 = ssub.s32 %s885_s22, %s940_s23  ;;  %s24_s25 = sadd.s32 1, %s881_s21 }
   0x7   : > { %p22_p0 = scmp.eq.s32.totalorder %s21_s24, 0  ;;  %p31_p1 = scmp.ne.s32.totalorder %s881_s21, %s877_s20 }
   0x8   : > { %p32_p2 = scmp.eq.s32.totalorder %s885_s22, 0  ;;  %p763_p4 = scmp.ge.s32.totalorder %s885_s22, 2 }
   0x9   : > { %s949_s26 = scalar_select %p22_p0, %s881_s21, %s24_s25  }
   0xa   : > { %p33_p3 = por %p32_p2, %p31_p1  ;;  %179 = sbr.rel (%p763_p4) target bundleno = 24 (0x18), region = 32 }
  0x11   : > { %182 = sbr.rel (!%p33_p3) target bundleno = 24 (0x18), region = 36  ;;  %s184_s27 = sand.u32 (%p33_p3), 1, %s881_s21  }
  0x12   : > { %s781_s28 = sshll.u32 (%p33_p3), %s885_s22, 4  ;;  %s764_s29 = sshll.u32 (%p33_p3), %s184_s27, 5 }
  0x13   : > { %s189_s7 = scalar_lea.vmem (%p33_p3), %s1132_s0, %s781_s28  ;;  %s186_s8 = scalar_lea.vmem (%p33_p3), [#allocation3], %s764_s29 }
  0x14   : > { %v202_v1 = vld [vmem:[%s189_s7] sm:$0xff] (%p33_p3)  ;;  %v204_v2 = vld [vmem:[%s189_s7 + $0x8] sm:$0xff] (%p33_p3) }
  0x15   : > { %v206_v3 = vld [vmem:[%s189_s7 + $0x20] sm:$0xff] (%p33_p3)  ;;  %203 = vst [vmem:[%s186_s8] sm:$0xff] (%p33_p3), %v202_v1  ;;  %205 = vst [vmem:[%s186_s8 + $0x8] sm:$0xff] (%p33_p3), %v204_v2  ;;  %v208_v4 = vld [vmem:[%s189_s7 + $0x28] sm:$0xff] (%p33_p3) }
  0x16   : > { %207 = vst [vmem:[%s186_s8 + $0x10] sm:$0xff] (%p33_p3), %v206_v3  ;;  %209 = vst [vmem:[%s186_s8 + $0x18] sm:$0xff] (%p33_p3), %v208_v4 }
  0x18 PF: > { %p767_p5 = scmp.ge.s32.totalorder %s885_s22, 1  ;;  %p214_p6 = scmp.lt.s32.totalorder %s885_s22, 3 }
  0x1a   : > { %p215_p7 = pnand %p767_p5, %p214_p6 }
  0x1b   : > { %s221_s9 = sand.u32 (!%p215_p7), 1, %s877_s20   ;;  %v887_v5 = vmov (!%p215_p7), 0.0   ;;  %v888_v6 = vmov (!%p215_p7), 0   ;;  %v265_v7 = vld [vmem:[%s1134_s2] sm:$0xff] (!%p215_p7)  ;;  %v266_v13 = vld [vmem:[%s1134_s2 + $0x8] sm:$0xff] (!%p215_p7)  ;;  %v267_v14 = vld [vmem:[%s1134_s2 + $0x10] sm:$0xff] (!%p215_p7) }
  0x1c   : > { %218 = sbr.rel (%p215_p7) target bundleno = 534 (0x216), region = 59  ;;  %s768_s10 = sshll.u32 (!%p215_p7), %s221_s9, 5  ;;  %402 = vmatprep.mubr.f32.mxu0 (!%p215_p7), %v887_v5  ;;  %674 = vmatprep.mubr.f32.mxu1 (!%p215_p7), %v887_v5  ;;  %v268_v16 = vld [vmem:[%s1134_s2 + $0x18] sm:$0xff] (!%p215_p7)  ;;  %v253_v17 = vld [vmem:[%s1133_s1] sm:$0xff] (!%p215_p7)  ;;  %vm313_vm0 = vcmask (!%p215_p7), 130048   ;;  %v270_v19 = vld [vmem:[%s1134_s2 + $0x28] sm:$0xff] (!%p215_p7) }
  0x1d   : > { %829 = vset.pattern.permute.xlu0 (!%p215_p7), %v888_v6  ;;  %830 = vset.pattern.permute.xlu1 (!%p215_p7), %v888_v6  ;;  %s223_s13 = scalar_lea.vmem (!%p215_p7), [#allocation3], %s768_s10  ;;  %v269_v18 = vld [vmem:[%s1134_s2 + $0x20] sm:$0xff] (!%p215_p7)  ;;  %v254_v20 = vld [vmem:[%s1133_s1 + $0x8] sm:$0xff] (!%p215_p7)  ;;  %v271_v21 = vld [vmem:[%s1134_s2 + $0x30] sm:$0xff] (!%p215_p7)  ;;  %vm606_vm1 = vcmask (!%p215_p7), 523264   ;;  %s769_s29 = sshll.u32 (!%p215_p7), %s760_s4, 1 }
  0x1e   : > { %v262_v8 = vld [vmem:[%s223_s13 + $0x8] sm:$0xff] (!%p215_p7)  ;;  %v264_v9 = vld [vmem:[%s223_s13 + $0x18] sm:$0xff] (!%p215_p7)  ;;  %v261_v10 = vld [vmem:[%s223_s13] sm:$0xff] (!%p215_p7)  ;;  %275 = vperm.xlu0 (!%p215_p7), %829, %v265_v7   ;;  %285 = vperm.xlu1 (!%p215_p7), %830, %v267_v14   ;;  %p249_p8 = scmp.lt.s32.totalorder (!%p215_p7), %s769_s29, 3 }
  0x1f   : > { %v782_v11 = vpack.c.bf16 (!%p215_p7), %v264_v9, %v262_v8  ;;  %v263_v12 = vld [vmem:[%s223_s13 + $0x10] sm:$0xff] (!%p215_p7)  ;;  %v596_v24 = vld [vmem:[#allocation2] sm:$0x1] (!%p215_p7)  ;;  %v258_v27 = vld [vmem:[%s1133_s1 + $0x28] sm:$0xff] (!%p215_p7) }
  0x20   : > { %v784_v15 = vpack.c.bf16 (!%p215_p7), %v263_v12, %v261_v10  ;;  %v272_v22 = vld [vmem:[%s1134_s2 + $0x38] sm:$0xff] (!%p215_p7)  ;;  %v255_v23 = vld [vmem:[%s1133_s1 + $0x10] sm:$0xff] (!%p215_p7)  ;;  %v257_v26 = vld [vmem:[%s1133_s1 + $0x20] sm:$0xff] (!%p215_p7) }
  0x21   : > { %783 = vmatprep.subr.bf16.mxu0 (!%p215_p7), %v782_v11  ;;  %v256_v25 = vld [vmem:[%s1133_s1 + $0x18] sm:$0xff] (!%p215_p7)  ;;  %v259_v28 = vld [vmem:[%s1133_s1 + $0x30] sm:$0xff] (!%p215_p7) }
  0x22   : > { %785 = vmatpush1.bf16.msra.mxu0 (!%p215_p7), %v784_v15  ;;  %280 = vperm.xlu0 (!%p215_p7), %829, %v266_v13   ;;  %v260_v29 = vld [vmem:[%s1133_s1 + $0x38] sm:$0xff] (!%p215_p7) }
  0x23   : > { %290 = vperm.xlu1 %830, %v268_v16   ;;  %s1142_s29 = smov (!%p249_p8, %s769_s29), 3 }
  0x24   : > { %s251_s7 = scalar_lea.vmem %s1137_s5, %s1142_s29 }
  0x25   : > { %770 = vmatmul.mubr.msk.f32.vlgmr.msra.gmra.mrb[0].mxu0 %vm313_vm0, %v253_v17 }
  0x26   : > { %408 = vmatprep.mubr.f32.mxu0 %v887_v5  ;;  %295 = vperm.xlu0 %829, %v269_v18  }
  0x27   : > { %300 = vperm.xlu1 %830, %v270_v19  }
  0x29   : > { %771 = vmatmul.mubr.msk.f32.gmra.mrb[2].mxu0 %vm313_vm0, %v254_v20 }
  0x2a   : > { %414 = vmatprep.mubr.f32.mxu0 %v887_v5  ;;  %305 = vperm.xlu0 %829, %v271_v21  }
  0x2b   : > { %310 = vperm.xlu1 %830, %v272_v22  }
  0x2d   : > { %772 = vmatmul.mubr.msk.f32.gmra.mrb[4].mxu0 %vm313_vm0, %v255_v23 }
  0x2e   : > { %420 = vmatprep.mubr.f32.mxu0 %v887_v5  ;;  %599 = vperm.xlu0 %829, %v596_v24  }
  0x31   : > { %773 = vmatmul.mubr.msk.f32.gmra.mrb[6].mxu0 %vm313_vm0, %v256_v25 }
  0x32   : > { %426 = vmatprep.mubr.f32.mxu0 %v887_v5 }
  0x35   : > { %774 = vmatmul.mubr.msk.f32.gmra.mrb[8].mxu0 %vm313_vm0, %v257_v26 }
  0x36   : > { %432 = vmatprep.mubr.f32.mxu0 %v887_v5 }
  0x39   : > { %775 = vmatmul.mubr.msk.f32.gmra.mrb[10].mxu0 %vm313_vm0, %v258_v27 }
  0x3a   : > { %438 = vmatprep.mubr.f32.mxu0 %v887_v5 }
  0x3d   : > { %776 = vmatmul.mubr.msk.f32.gmra.mrb[12].mxu0 %vm313_vm0, %v259_v28 }
  0x3e   : > { %444 = vmatprep.mubr.f32.mxu0 %v887_v5 }
  0x41   : > { %777 = vmatmul.mubr.msk.f32.gmra.mrb[14].mxu0 %vm313_vm0, %v260_v29 }
  0x9d   : > { %v276_v30 = vpop.permute.xlu0 %275  ;;  %v286_v42 = vpop.permute.xlu1 %285 }
  0xa1   : > { %v281_v36 = vpop.permute.xlu0 %280 }
  0xa2   : > { %v291_v60 = vpop.permute.xlu1 %290 }
  0xa5   : > { %v296_v11 = vpop.permute.xlu0 %295 }
  0xa6   : > { %v301_v27 = vpop.permute.xlu1 %300 }
  0xf8   : > { %v404_v31 = vpop.f32.mrb[0].mxu0 }
  0xf9   : > { %v405_v32 = vadd.f32 %v404_v31, %v276_v30  ;;  %v406_v33 = vpop.f32.mrb[1].mxu0 }
  0xfa   : > { %v1016_v34 = vadd.f32 %v406_v33, %v276_v30 }
  0xfb   : > { %v467_v35 = vmul.f32 0.044715, %v405_v32  ;;  %v451_v25 = vmul.f32 0.5, %v405_v32 }
  0xfc   : > { %v468_v37 = vmul.f32 0.044715, %v1016_v34  ;;  %v410_v38 = vpop.f32.mrb[2].mxu0  ;;  %v452_v31 = vmul.f32 0.5, %v1016_v34 }
  0xfd   : > { %v483_v39 = vmul.f32 %v467_v35, %v405_v32  ;;  %v411_v40 = vadd.f32 %v410_v38, %v281_v36  ;;  %v412_v41 = vpop.f32.mrb[3].mxu0 }
  0xfe   : > { %v1019_v43 = vadd.f32 %v412_v41, %v281_v36  ;;  %v484_v44 = vmul.f32 %v468_v37, %v1016_v34 }
  0xff   : > { %v469_v45 = vmul.f32 0.044715, %v411_v40  ;;  %v499_v46 = vmul.f32 %v483_v39, %v405_v32  ;;  %v453_v37 = vmul.f32 0.5, %v411_v40 }
 0x100   : > { %v470_v47 = vmul.f32 0.044715, %v1019_v43  ;;  %v416_v48 = vpop.f32.mrb[4].mxu0  ;;  %v500_v49 = vmul.f32 %v484_v44, %v1016_v34 }
 0x101   : > { %v485_v50 = vmul.f32 %v469_v45, %v411_v40  ;;  %v1024_v51 = vadd.f32 %v416_v48, %v286_v42  ;;  %v418_v52 = vpop.f32.mrb[5].mxu0  ;;  %v515_v53 = vadd.f32 %v499_v46, %v405_v32  ;;  %v454_v45 = vmul.f32 0.5, %v1019_v43 }
 0x102   : > { %v1026_v54 = vadd.f32 %v418_v52, %v286_v42  ;;  %v486_v55 = vmul.f32 %v470_v47, %v1019_v43  ;;  %v516_v56 = vadd.f32 %v500_v49, %v1016_v34 }
 0x103   : > { %v471_v57 = vmul.f32 0.044715, %v1024_v51  ;;  %v501_v58 = vmul.f32 %v485_v50, %v411_v40  ;;  %v531_v59 = vmul.f32 0.7978846, %v515_v53 }
 0x104   : > { %v472_v61 = vmul.f32 0.044715, %v1026_v54  ;;  %v422_v62 = vpop.f32.mrb[6].mxu0  ;;  %v502_v63 = vmul.f32 %v486_v55, %v1019_v43  ;;  %v532_v0 = vmul.f32 0.7978846, %v516_v56 }
 0x105   : > { %v487_v1 = vmul.f32 %v471_v57, %v1024_v51  ;;  %v1034_v2 = vadd.f32 %v422_v62, %v291_v60  ;;  %v424_v3 = vpop.f32.mrb[7].mxu0  ;;  %v517_v4 = vadd.f32 %v501_v58, %v411_v40  ;;  %831 = vtanh.f32 %v531_v59  ;;  %v306_v40 = vpop.permute.xlu0 %305 }
 0x106   : > { %v488_v5 = vmul.f32 %v472_v61, %v1026_v54  ;;  %v1037_v6 = vadd.f32 %v424_v3, %v291_v60  ;;  %v518_v7 = vadd.f32 %v502_v63, %v1019_v43  ;;  %833 = vtanh.f32 %v532_v0 }
 0x107   : > { %v503_v8 = vmul.f32 %v487_v1, %v1024_v51  ;;  %v473_v9 = vmul.f32 0.044715, %v1034_v2  ;;  %v533_v10 = vmul.f32 0.7978846, %v517_v4  ;;  %v455_v60 = vmul.f32 0.5, %v1024_v51  ;;  %v311_v4 = vpop.permute.xlu1 %310 }
 0x108   : > { %v504_v12 = vmul.f32 %v488_v5, %v1026_v54  ;;  %v474_v13 = vmul.f32 0.044715, %v1037_v6  ;;  %v428_v14 = vpop.f32.mrb[8].mxu0  ;;  %v534_v15 = vmul.f32 0.7978846, %v518_v7 }
 0x109   : > { %v489_v16 = vmul.f32 %v473_v9, %v1034_v2  ;;  %v1045_v17 = vadd.f32 %v428_v14, %v296_v11  ;;  %v430_v18 = vpop.f32.mrb[9].mxu0  ;;  %835 = vtanh.f32 %v533_v10  ;;  %v519_v19 = vadd.f32 %v503_v8, %v1024_v51 }
 0x10a   : > { %v490_v20 = vmul.f32 %v474_v13, %v1037_v6  ;;  %v1049_v21 = vadd.f32 %v430_v18, %v296_v11  ;;  %837 = vtanh.f32 %v534_v15  ;;  %v520_v22 = vadd.f32 %v504_v12, %v1026_v54 }
 0x10b   : > { %v505_v23 = vmul.f32 %v489_v16, %v1034_v2  ;;  %v475_v24 = vmul.f32 0.044715, %v1045_v17  ;;  %v535_v26 = vmul.f32 0.7978846, %v519_v19 }
 0x10c   : > { %v506_v28 = vmul.f32 %v490_v20, %v1037_v6  ;;  %v476_v29 = vmul.f32 0.044715, %v1049_v21  ;;  %v434_v30 = vpop.f32.mrb[10].mxu0  ;;  %v536_v33 = vmul.f32 0.7978846, %v520_v22 }
 0x10d   : > { %v1057_v35 = vadd.f32 %v434_v30, %v301_v27  ;;  %v436_v36 = vpop.f32.mrb[11].mxu0  ;;  %v521_v38 = vadd.f32 %v505_v23, %v1034_v2  ;;  %839 = vtanh.f32 %v535_v26  ;;  %v491_v44 = vmul.f32 %v475_v24, %v1045_v17 }
 0x10e   : > { %v492_v39 = vmul.f32 %v476_v29, %v1049_v21  ;;  %v1061_v32 = vadd.f32 %v436_v36, %v301_v27  ;;  %v522_v41 = vadd.f32 %v506_v28, %v1037_v6  ;;  %841 = vtanh.f32 %v536_v33 }
 0x10f   : > { %v832_v42 = vpop.eup %831  ;;  %v477_v34 = vmul.f32 0.044715, %v1057_v35  ;;  %v537_v46 = vmul.f32 0.7978846, %v521_v38  ;;  %v507_v62 = vmul.f32 %v491_v44, %v1045_v17  ;;  %v456_v29 = vmul.f32 0.5, %v1026_v54 }
 0x110   : > { %v834_v47 = vpop.eup %833  ;;  %v508_v48 = vmul.f32 %v492_v39, %v1049_v21  ;;  %v478_v49 = vmul.f32 0.044715, %v1061_v32  ;;  %v440_v50 = vpop.f32.mrb[12].mxu0  ;;  %v563_v52 = vadd.f32 1.0, %v832_v42  ;;  %v538_v53 = vmul.f32 0.7978846, %v522_v41 }
 0x111   : > { %v493_v55 = vmul.f32 %v477_v34, %v1057_v35  ;;  %v1070_v56 = vadd.f32 %v440_v50, %v306_v40  ;;  %v442_v57 = vpop.f32.mrb[13].mxu0  ;;  %v564_v58 = vadd.f32 1.0, %v834_v47  ;;  %843 = vtanh.f32 %v537_v46 }
 0x112   : > { %v494_v59 = vmul.f32 %v478_v49, %v1061_v32  ;;  %v1073_v43 = vadd.f32 %v442_v57, %v306_v40  ;;  %845 = vtanh.f32 %v538_v53  ;;  %v579_v1 = vmul.f32 %v563_v52, %v451_v25 }
 0x113   : > { %v836_v61 = vpop.eup %835  ;;  %v509_v63 = vmul.f32 %v493_v55, %v1057_v35  ;;  %v479_v0 = vmul.f32 0.044715, %v1070_v56  ;;  %v524_v10 = vadd.f32 %v508_v48, %v1049_v21  ;;  %v580_v14 = vmul.f32 %v564_v58, %v452_v31 }
 0x114   : > { %v838_v3 = vpop.eup %837  ;;  %v510_v5 = vmul.f32 %v494_v59, %v1061_v32  ;;  %v480_v7 = vmul.f32 0.044715, %v1073_v43  ;;  %v446_v8 = vpop.f32.mrb[14].mxu0  ;;  %v565_v9 = vadd.f32 1.0, %v836_v61  ;;  %v523_v25 = vadd.f32 %v507_v62, %v1045_v17 }
 0x115   : > { %v495_v51 = vmul.f32 %v479_v0, %v1070_v56  ;;  %v1083_v11 = vadd.f32 %v446_v8, %v311_v4  ;;  %v448_v12 = vpop.f32.mrb[15].mxu0  ;;  %v566_v13 = vadd.f32 1.0, %v838_v3  ;;  %v540_v24 = vmul.f32 0.7978846, %v524_v10 }
 0x116   : > { %v496_v15 = vmul.f32 %v480_v7, %v1073_v43  ;;  %v1086_v16 = vadd.f32 %v448_v12, %v311_v4  ;;  %v581_v18 = vmul.f32 %v565_v9, %v453_v37  ;;  %v526_v19 = vadd.f32 %v510_v5, %v1061_v32 }
 0x117   : > { %v840_v20 = vpop.eup %839  ;;  %v481_v22 = vmul.f32 0.044715, %v1083_v11  ;;  %v582_v23 = vmul.f32 %v566_v13, %v454_v45  ;;  %v457_v30 = vmul.f32 0.5, %v1034_v2  ;;  %847 = vtanh.f32 %v540_v24 }
 0x118   : > { %v842_v26 = vpop.eup %841  ;;  %v482_v27 = vmul.f32 0.044715, %v1086_v16  ;;  %v788_v28 = vpack.c.bf16 %v581_v18, %v579_v1  ;;  %v512_v31 = vmul.f32 %v496_v15, %v1073_v43  ;;  %v542_v37 = vmul.f32 0.7978846, %v526_v19 }
 0x119   : > { %v497_v33 = vmul.f32 %v481_v22, %v1083_v11  ;;  %v786_v36 = vpack.c.bf16 %v582_v23, %v580_v14  ;;  %v567_v39 = vadd.f32 1.0, %v840_v20  ;;  %v525_v41 = vadd.f32 %v509_v63, %v1057_v35 }
 0x11a   : > { %v498_v38 = vmul.f32 %v482_v27, %v1086_v16  ;;  %v511_v44 = vmul.f32 %v495_v51, %v1070_v56  ;;  %v568_v34 = vadd.f32 1.0, %v842_v26  ;;  %849 = vtanh.f32 %v542_v37 }
 0x11b   : > { %v844_v42 = vpop.eup %843  ;;  %787 = vmatprep.subr.bf16.mxu1 %v786_v36  ;;  %v539_v54 = vmul.f32 0.7978846, %v523_v25  ;;  %v513_v45 = vmul.f32 %v497_v33, %v1083_v11  ;;  %v541_v40 = vmul.f32 0.7978846, %v525_v41  ;;  %v458_v48 = vmul.f32 0.5, %v1037_v6 }
 0x11c   : > { %v846_v2 = vpop.eup %845  ;;  %v514_v46 = vmul.f32 %v498_v38, %v1086_v16  ;;  %789 = vmatpush1.bf16.msra.mxu1 %v788_v28  ;;  %v569_v47 = vadd.f32 1.0, %v844_v42  ;;  %v528_v50 = vadd.f32 %v512_v31, %v1073_v43  ;;  %v583_v52 = vmul.f32 %v567_v39, %v455_v60 }
 0x11d   : > { %v570_v49 = vadd.f32 1.0, %v846_v2  ;;  %851 = vtanh.f32 %v539_v54  ;;  %v584_v57 = vmul.f32 %v568_v34, %v456_v29  ;;  %v527_v61 = vadd.f32 %v511_v44, %v1070_v56 }
 0x11e   : > { %v585_v53 = vmul.f32 %v569_v47, %v457_v30  ;;  %853 = vtanh.f32 %v541_v40  ;;  %v530_v55 = vadd.f32 %v514_v46, %v1086_v16  ;;  %v544_v59 = vmul.f32 0.7978846, %v528_v50 }
 0x11f   : > { %v586_v58 = vmul.f32 %v570_v49, %v458_v48  ;;  %v529_v0 = vadd.f32 %v513_v45, %v1083_v11  ;;  %v543_v6 = vmul.f32 0.7978846, %v527_v61  ;;  %v460_v7 = vmul.f32 0.5, %v1049_v21 }
 0x120   : > { %v792_v62 = vpack.c.bf16 %v585_v53, %v583_v52  ;;  %v546_v63 = vmul.f32 0.7978846, %v530_v55  ;;  %855 = vtanh.f32 %v544_v59  ;;  %v462_v8 = vmul.f32 0.5, %v1061_v32 }
 0x121   : > { %v790_v1 = vpack.c.bf16 %v586_v58, %v584_v57  ;;  %v545_v3 = vmul.f32 0.7978846, %v529_v0  ;;  %v848_v60 = vpop.eup %847  ;;  %v459_v15 = vmul.f32 0.5, %v1045_v17  ;;  %v461_v18 = vmul.f32 0.5, %v1057_v35 }
 0x122   : > { %857 = vtanh.f32 %v546_v63  ;;  %v572_v5 = vadd.f32 1.0, %v848_v60  ;;  %v464_v27 = vmul.f32 0.5, %v1073_v43  ;;  %v466_v28 = vmul.f32 0.5, %v1086_v16  ;;  %v595_v43 = vld [vmem:[%s1135_s3] sm:$0x1] }
 0x123   : > { %791 = vmatprep.subr.bf16.mxu1 %v790_v1  ;;  %859 = vtanh.f32 %v543_v6  ;;  %v463_v17 = vmul.f32 0.5, %v1070_v56  ;;  %v465_v36 = vmul.f32 0.5, %v1083_v11  ;;  %v602_v56 = vlaneseq  ;;  %v600_v11 = vpop.permute.xlu0 %599 }
 0x124   : > { %793 = vmatpush1.bf16.msra.mxu1 %v792_v62  ;;  %861 = vtanh.f32 %v545_v3  ;;  %v850_v4 = vpop.eup %849  ;;  %v588_v12 = vmul.f32 %v572_v5, %v460_v7  ;;  %v889_v44 = vmov 1966171168  }
 0x125   : > { %v574_v9 = vadd.f32 1.0, %v850_v4  ;;  %v603_v16 = vshrl.u32 %v602_v56, 7  ;;  %v685_v34 = vunpack.c.l.s4 %v889_v44  ;;  %vm701_vm2 = vcmp.lt.s32.totalorder %v602_v56, 256 }
 0x127   : > { %v852_v10 = vpop.eup %851  ;;  %v590_v13 = vmul.f32 %v574_v9, %v462_v8  ;;  %v604_v54 = vsub.s32 0, %v603_v16  ;;  %v686_v2 = vunpack.c.0.s8 %v685_v34 }
 0x128   : > { %v854_v51 = vpop.eup %853  ;;  %v571_v14 = vadd.f32 1.0, %v852_v10 }
 0x129   : > { %v573_v19 = vadd.f32 1.0, %v854_v51  ;;  %v794_v20 = vpack.c.bf16 %v590_v13, %v588_v12  ;;  %v605_v45 = vrot.slane %v600_v11, %v604_v54  ;;  %v689_v49 = vsub.s32 %v686_v2, %v603_v16 }
 0x12a   : > { %v856_v22 = vpop.eup %855  ;;  %v587_v23 = vmul.f32 %v571_v14, %v459_v15 }
 0x12b   : > { %v589_v24 = vmul.f32 %v573_v19, %v461_v18  ;;  %795 = vmatprep.subr.bf16.mxu1 %v794_v20  ;;  %v576_v21 = vadd.f32 1.0, %v856_v22 }
 0x12c   : > { %v858_v25 = vpop.eup %857 }
 0x12d   : > { %v860_v26 = vpop.eup %859  ;;  %v796_v32 = vpack.c.bf16 %v589_v24, %v587_v23  ;;  %v578_v29 = vadd.f32 1.0, %v858_v25  ;;  %v592_v35 = vmul.f32 %v576_v21, %v464_v27 }
 0x12e   : > { %v862_v30 = vpop.eup %861  ;;  %v575_v31 = vadd.f32 1.0, %v860_v26 }
 0x12f   : > { %797 = vmatpush1.bf16.msra.mxu1 %v796_v32  ;;  %v594_v33 = vmul.f32 %v578_v29, %v466_v28  ;;  %v577_v37 = vadd.f32 1.0, %v862_v30 }
 0x130   : > { %v591_v39 = vmul.f32 %v575_v31, %v463_v17 }
 0x131   : > { %v798_v38 = vpack.c.bf16 %v594_v33, %v592_v35  ;;  %v593_v41 = vmul.f32 %v577_v37, %v465_v36 }
 0x133   : > { %799 = vmatprep.subr.bf16.mxu1 %v798_v38  ;;  %v800_v42 = vpack.c.bf16 %v593_v41, %v591_v39 }
 0x135   : > { %801 = vmatpush1.bf16.msra.mxu1 %v800_v42 }
 0x138   : > { %778 = vmatmul.mubr.msk.f32.vlgmr.msra.gmra.mrb[0].mxu1 %vm606_vm1, %v595_v43 }
 0x20b   : > { %v676_v46 = vpop.f32.mrb[0].mxu1 }
 0x20c   : > { %v677_v47 = vadd.f32 %v676_v46, %v605_v45  ;;  %v678_v40 = vpop.f32.mrb[1].mxu1 }
 0x20d   : > { %v679_v48 = vadd.f32 %v678_v40, %v605_v45 }
 0x20f   : > { %v683_v50 = vcombine.low %v677_v47, %v679_v48 }
 0x211   : > { %v690_v52 = vrot.slane %v683_v50, %v689_v49 }
 0x213   : > { %v697_v53 = vrot.slane %v690_v52, %v689_v49 }
 0x215   : > { %703 = vst.msk [vmem:[%s251_s7] sm:$0x3] %vm701_vm2, %v697_v53 }
 0x216 PF: > { %p14_p9 = scmp.ge.s32.totalorder %s940_s23, 4   ;;  %s1138_s20 = smov %s881_s21 }
 0x217   : > { %s1139_s21 = smov %s949_s26  ;;  %s1140_s22 = smov %s940_s23 }
 0x218   :  { %16 = sbr.rel (!%p14_p9) target bundleno = 5 (0x5), region = 98 }

</bundles_post_ra>
